<compile_context>
chip_gen: v7x
topology: tpu7x:2x2x1
jax: 0.10.0
libtpu: 0.0.40
codegen_flags: <defaults>
</compile_context>

<pallas_src>
import functools

import numpy as np
import jax
import jax.numpy as jnp
from jax.experimental import pallas as pl
from jax.experimental.pallas import tpu as pltpu

# ---------------------------------------------------------------------------
# Small configuration consistent with FlowDecoder.__init__ / forward
# ---------------------------------------------------------------------------
B = 2                  # batch
IN_CHANNELS = 8        # in_channels
HIDDEN = 32            # hidden_channels
KERNEL_SIZE = 3        # kernel_size (odd)
DILATION_RATE = 1      # dilation_rate
N_BLOCKS = 2           # n_blocks
N_LAYERS = 3           # n_layers
N_SPLIT = 4            # n_split
N_SQZ = 2              # n_sqz
GIN = 16               # gin_channels (x-vector dim)
SIGMOID_SCALE = False
T = 16                 # time steps before channel squeeze

C_SQZ = IN_CHANNELS * N_SQZ   # channels after squeeze  (16)
T_SQZ = T // N_SQZ            # time after squeeze      (8)
HALF = C_SQZ // 2

# MXU operand dtype. float32 is safe everywhere (and matches the f32
# reference); on v6e/v7x set jnp.bfloat16 for ~2x MXU throughput / half the
# operand VMEM.  Accumulation is always f32 (preferred_element_type).
MXU_DTYPE = jnp.float32


# ---------------------------------------------------------------------------
# commons.channel_squeeze / channel_unsqueeze (pure reshape glue -> plain JAX)
# ---------------------------------------------------------------------------
def channel_squeeze(x, x_mask, n_sqz):
    b, c, t = x.shape
    t = (t // n_sqz) * n_sqz
    x = x[:, :, :t]
    x_sqz = x.reshape(b, c, t // n_sqz, n_sqz)
    x_sqz = jnp.transpose(x_sqz, (0, 3, 1, 2)).reshape(b, c * n_sqz, t // n_sqz)
    x_mask = x_mask[:, :, n_sqz - 1::n_sqz]
    return x_sqz * x_mask, x_mask


def channel_unsqueeze(x, x_mask, n_sqz):
    b, c, t = x.shape
    x_unsqz = x.reshape(b, n_sqz, c // n_sqz, t)
    x_unsqz = jnp.transpose(x_unsqz, (0, 2, 3, 1)).reshape(b, c // n_sqz, t * n_sqz)
    x_mask = jnp.repeat(x_mask[..., None], n_sqz, axis=-1).reshape(b, 1, t * n_sqz)
    return x_unsqz * x_mask, x_mask


# ---------------------------------------------------------------------------
# Host-side parameter / constant preprocessing
# ---------------------------------------------------------------------------
def _make_tap_masks(t_valid, t_pad, kernel_size, dilation_rate, n_layers):
    """Per-(layer, tap) validity masks on the lane-padded time axis.

    Zero-padded Conv1d taps that would read outside [0, t_valid) (or any lane
    in the zero-pad region) must contribute exactly zero."""
    t_idx = np.arange(t_pad)
    masks = np.zeros((n_layers, kernel_size, 1, t_pad), np.float32)
    for i in range(n_layers):
        dil = dilation_rate ** i
        pad = (kernel_size * dil - dil) // 2
        for k in range(kernel_size):
            off = k * dil - pad
            masks[i, k, 0] = ((t_idx < t_valid)
                              & (t_idx + off >= 0)
                              & (t_idx + off < t_valid))
    return jnp.asarray(masks)


def _expand_invconv(w, channels, n_split):
    """Expand the [n_split, n_split] InvConvNear weight into an equivalent
    [channels, channels] channel-mixing matrix (absorbs torch's view/permute
    glue) so the whole op is a single matmul on the folded activation."""
    grp = channels // n_split
    ns2 = n_split // 2
    ch = np.arange(channels)
    s1 = ch // (grp * ns2)
    rem = ch % (grp * ns2)
    gidx = rem // ns2
    s2 = rem % ns2
    s = s1 * ns2 + s2                                   # split index per channel
    same_group = jnp.asarray((gidx[:, None] == gidx[None, :]).astype(np.float32))
    return w[s][:, s] * same_group


# ---------------------------------------------------------------------------
# Fused flow kernel: all blocks, one padded batch segment per grid step
# ---------------------------------------------------------------------------
def _flow_kernel(x_ref, m_ref, tapm_ref, gc_ref,
                 invl_ref, invr_ref, fb_ref,
                 ws_ref, bs_ref, wi_ref, bi_ref, wr_ref, br_ref,
                 we_ref, be_ref,
                 z_ref, ld_ref, hcol_ref, *,
                 n_blocks, n_layers, kernel_size, dilation_rate, sigmoid_scale):
    x = x_ref[0]                       # [C, T_PAD]
    m = m_ref[0]                       # [1, T_PAD]
    C, T_pad = x.shape
    half = C // 2
    H = ws_ref.shape[1]

    def mdot(w, v):                    # MXU matmul, f32 accumulation
        return jnp.dot(w.astype(MXU_DTYPE), v.astype(MXU_DTYPE),
                       preferred_element_type=jnp.float32)

    x0c = x[:half]                     # carried activations (values, not refs)
    x1c = x[half:]
    ld_lanes = jnp.zeros((1, T_pad), jnp.float32)

    for blk in range(n_blocks):                       # static: all blocks fused
        # ---- ActNorm + InvConvNear (pre-fused channel mix, split in column
        # halves so the previous block's x0/z1 feed in without a concat) -----
        x_mix = (mdot(invl_ref[blk], x0c) + mdot(invr_ref[blk], x1c)
                 + fb_ref[blk]) * m                   # [C, T_PAD]
        x0 = x_mix[:half]
        x1 = x_mix[half:]

        # ---- CouplingBlock --------------------------------------------------
        h = (mdot(ws_ref[blk], x0) + bs_ref[blk]) * m  # [H, T_PAD]
        gcond = gc_ref[0, blk]                         # [2*H*L, 1]
        out_acc = jnp.zeros((H, T_pad), jnp.float32)
        for i in range(n_layers):
            dil = dilation_rate ** i
            padw = (kernel_size * dil - dil) // 2
            # im2col: shifted taps (XLU roll + boundary mask) written into a
            # persistent VMEM scratch via aligned sublane-slice stores.
            for k in range(kernel_size):
                off = k * dil - padw
                if off == 0:
                    tap = h
                else:
                    tap = pltpu.roll(h, (-off) % T_pad, axis=1) * tapm_ref[i, k]
                hcol_ref[k * H:(k + 1) * H, :] = tap
            x_in = mdot(wi_ref[blk, i], hcol_ref[...]) + bi_ref[blk, i]  # [2H,T]
            in_act = x_in + gcond[i * 2 * H:(i + 1) * 2 * H]   # lane broadcast
            acts = jnp.tanh(in_act[:H]) * jax.nn.sigmoid(in_act[H:])
            rs = mdot(wr_ref[blk, i], acts) + br_ref[blk, i]             # [2H,T]
            if i < n_layers - 1:
                h = (h + rs[:H]) * m
            out_acc = out_acc + rs[H:]
        out_acc = out_acc * m
        out = mdot(we_ref[blk], out_acc) + be_ref[blk]                   # [C,T]
        mean = out[:half]
        logs = out[half:]
        if sigmoid_scale:
            logs = jnp.log(1e-6 + jax.nn.sigmoid(logs + 2.0))
        z1 = (mean + jnp.exp(logs) * x1) * m
        # per-lane coupling logdet; one cross-lane reduce after all blocks
        ld_lanes = ld_lanes + jnp.sum(logs * m, axis=0, keepdims=True)
        x0c, x1c = x0, z1              # value carry -> no VMEM/HBM round trip

    # single lane-dense output store (only after the last block)
    z_ref[0, :half, :] = x0c
    z_ref[0, half:, :] = x1c
    ld_ref[0] = jnp.sum(ld_lanes, axis=1, keepdims=True)


# ---------------------------------------------------------------------------
# FlowDecoder.forward (reverse=False)
# ---------------------------------------------------------------------------
def flow_decoder_forward(x, x_mask, g, params):
    # stack the per-block parameter dicts -> leading N_BLOCKS axis
    p = {k: jnp.stack([blk[k] for blk in params]) for k in params[0]}

    x_sqz, m_sqz = channel_squeeze(x, x_mask, N_SQZ)   # [B,C,Tt], [B,1,Tt]
    Bb, C, Tt = x_sqz.shape
    half = C // 2
    T_pad = max(128, ((Tt + 127) // 128) * 128)        # lane-dense time axis

    # data-independent logdet terms (ActNorm scale, InvConvNear slogdet)
    x_len = jnp.sum(m_sqz, axis=(1, 2))                              # [B]
    an_ld = jnp.sum(p["an_logs"]) * x_len
    _, lad = jnp.linalg.slogdet(p["inv_w"])                          # plain JAX
    inv_ld = jnp.sum(lad) * (C / N_SPLIT) * x_len

    # zero-pad the squeezed time axis to T_pad lanes; pad columns are masked
    x_pad = jnp.pad(x_sqz, ((0, 0), (0, 0), (0, T_pad - Tt)))
    m_pad = jnp.pad(m_sqz, ((0, 0), (0, 0), (0, T_pad - Tt)))

    # ActNorm fused into the pre-expanded InvConvNear channel-mixing matrix,
    # split into column halves for the concat-free inter-block handoff.
    invm = jax.vmap(lambda w: _expand_invconv(w, C, N_SPLIT))(p["inv_w"])
    scale = jnp.exp(p["an_logs"][:, :, 0])                           # [NB, C]
    invm_scaled = invm * scale[:, None, :]
    fbias = jnp.einsum("noc,nci->noi", invm, p["an_bias"])           # [NB,C,1]
    invm_l = invm_scaled[:, :, :half]
    invm_r = invm_scaled[:, :, half:]

    # im2col-stacked dilated-conv tap weights: [NB, L, 2H, K*H]
    wi_stacked = jnp.transpose(p["wi"], (0, 1, 3, 2, 4)).reshape(
        N_BLOCKS, N_LAYERS, 2 * HIDDEN, KERNEL_SIZE * HIDDEN)
    # Conv1d zero-padding boundary masks per (layer, tap): [L, K, 1, T_pad]
    tap_mask = _make_tap_masks(Tt, T_pad, KERNEL_SIZE, DILATION_RATE, N_LAYERS)

    # speaker conditioning shrunk to one column per (batch, block):
    # wc @ g + bc  ->  [B, NB, 2*H*L, 1]  (lane-broadcast inside the kernel)
    gcond = (jnp.einsum("noi,bi->bno", p["wc"], g)
             + p["bc"][:, :, 0][None])[..., None]

    args = (x_pad, m_pad, tap_mask, gcond,
            invm_l, invm_r, fbias,
            p["ws"], p["bs"], wi_stacked, p["bi"], p["wr"], p["br"],
            p["we"], p["be"])

    def _resident(shape):                       # weights: block index constant
        nd = len(shape)
        return pl.BlockSpec(tuple(shape), lambda b, _n=nd: (0,) * _n)

    def _per_batch(shape):                      # one batch segment per step
        rest = len(shape) - 1
        return pl.BlockSpec((1,) + tuple(shape[1:]),
                            lambda b, _r=rest: (b,) + (0,) * _r)

    in_specs = [_per_batch(x_pad.shape), _per_batch(m_pad.shape),
                _resident(tap_mask.shape), _per_batch(gcond.shape)]
    in_specs += [_resident(a.shape) for a in args[4:]]

    kern = functools.partial(
        _flow_kernel, n_blocks=N_BLOCKS, n_layers=N_LAYERS,
        kernel_size=KERNEL_SIZE, dilation_rate=DILATION_RATE,
        sigmoid_scale=SIGMOID_SCALE)

    z_pad, ld = pl.pallas_call(
        kern,
        grid=(Bb,),
        in_specs=in_specs,
        out_specs=(_per_batch((Bb, C, T_pad)),
                   _per_batch((Bb, 1, 1))),
        out_shape=(jax.ShapeDtypeStruct((Bb, C, T_pad), jnp.float32),
                   jax.ShapeDtypeStruct((Bb, 1, 1), jnp.float32)),
        scratch_shapes=[pltpu.VMEM((KERNEL_SIZE * HIDDEN, T_pad), jnp.float32)],
        compiler_params=pltpu.CompilerParams(
            dimension_semantics=("parallel",)),
    )(*args)

    # drop time padding, unfold channel squeeze
    z_sqz = z_pad[:, :, :Tt]
    z, _ = channel_unsqueeze(z_sqz, m_sqz, N_SQZ)
    return z, ld[:, 0, 0] + an_ld + inv_ld


# ---------------------------------------------------------------------------
# Deterministic parameter init (shapes from the module __init__)
# ---------------------------------------------------------------------------
def init_params(key):
    params = []
    for _ in range(N_BLOCKS):
        keys = jax.random.split(key, 16)
        key = keys[0]

        def nrm(k, shape, scale=0.05):
            return scale * jax.random.normal(k, shape, jnp.float32)

        an_logs = nrm(keys[1], (C_SQZ, 1), 0.1)
        an_bias = nrm(keys[2], (C_SQZ, 1), 0.1)
        # InvConvNear: orthogonal init with positive determinant
        q, _ = jnp.linalg.qr(jax.random.normal(keys[3], (N_SPLIT, N_SPLIT), jnp.float32))
        q = jnp.where(jnp.linalg.det(q) < 0, q.at[:, 0].set(-q[:, 0]), q)

        ws = nrm(keys[4], (HIDDEN, HALF))
        bs = nrm(keys[5], (HIDDEN, 1))
        wc = nrm(keys[6], (2 * HIDDEN * N_LAYERS, GIN))
        bc = nrm(keys[7], (2 * HIDDEN * N_LAYERS, 1))
        wi = nrm(keys[8], (N_LAYERS, KERNEL_SIZE, 2 * HIDDEN, HIDDEN))
        bi = nrm(keys[9], (N_LAYERS, 2 * HIDDEN, 1))
        wr = nrm(keys[10], (N_LAYERS, 2 * HIDDEN, HIDDEN))
        br = nrm(keys[11], (N_LAYERS, 2 * HIDDEN, 1))
        # last WN layer only has HIDDEN (skip) outputs: pack them in the upper
        # half of the stacked weight, zero the unused residual half.
        wr = wr.at[N_LAYERS - 1, :HIDDEN, :].set(0.0)
        br = br.at[N_LAYERS - 1, :HIDDEN, :].set(0.0)
        # NOTE: PyTorch zero-inits the `end` conv (coupling starts as identity);
        # we use small deterministic random values so the kernel path is exercised.
        we = nrm(keys[12], (C_SQZ, HIDDEN))
        be = nrm(keys[13], (C_SQZ, 1))
        params.append(dict(an_logs=an_logs, an_bias=an_bias, inv_w=q,
                           ws=ws, bs=bs, wc=wc, bc=bc, wi=wi, bi=bi,
                           wr=wr, br=br, we=we, be=be))
    return params


# ---------------------------------------------------------------------------
# Pure-JAX reference (same math, no Pallas) for a numerical sanity check
# ---------------------------------------------------------------------------
_HP = jax.lax.Precision.HIGHEST


def _ref_actnorm(x, m, logs, bias):
    z = (bias[None] + jnp.exp(logs)[None] * x) * m
    return z, jnp.sum(logs) * jnp.sum(m, axis=(1, 2))


def _ref_invconv(w, x, m, n_split):
    b, c, t = x.shape
    grp = c // n_split
    xr = x.reshape(b, 2, grp, n_split // 2, t)
    xr = jnp.transpose(xr, (0, 1, 3, 2, 4)).reshape(b, n_split, grp * t)
    zr = jnp.einsum("oi,bis->bos", w, xr, precision=_HP)
    z = zr.reshape(b, 2, n_split // 2, grp, t)
    z = jnp.transpose(z, (0, 1, 3, 2, 4)).reshape(b, c, t) * m
    _, lad = jnp.linalg.slogdet(w)
    return z, lad * (c / n_split) * jnp.sum(m, axis=(1, 2))


def _ref_coupling(x, m, g, p):
    b, c, t = x.shape
    half = c // 2
    H = HIDDEN
    x0, x1 = x[:, :half], x[:, half:]
    h = (jnp.einsum("oi,bit->bot", p["ws"], x0, precision=_HP) + p["bs"][None]) * m
    g_all = jnp.einsum("oi,bis->bos", p["wc"], g, precision=_HP) + p["bc"][None]
    out_acc = jnp.zeros((b, H, t), jnp.float32)
    for i in range(N_LAYERS):
        dil = DILATION_RATE ** i
        pad = (KERNEL_SIZE * dil - dil) // 2
        hp = jnp.pad(h, ((0, 0), (0, 0), (pad, pad)))
        conv = sum(jnp.einsum("oi,bit->bot", p["wi"][i, k],
                              hp[:, :, k * dil:k * dil + t], precision=_HP)
                   for k in range(KERNEL_SIZE))
        x_in = conv + p["bi"][i][None]
        in_act = x_in + g_all[:, i * 2 * H:(i + 1) * 2 * H]
        acts = jnp.tanh(in_act[:, :H]) * jax.nn.sigmoid(in_act[:, H:])
        rs = jnp.einsum("oi,bit->bot", p["wr"][i], acts, precision=_HP) + p["br"][i][None]
        if i < N_LAYERS - 1:
            h = (h + rs[:, :H]) * m
        out_acc = out_acc + rs[:, H:]
    out_acc = out_acc * m
    out = jnp.einsum("oi,bit->bot", p["we"], out_acc, precision=_HP) + p["be"][None]
    m_shift, logs = out[:, :half], out[:, half:]
    if SIGMOID_SCALE:
        logs = jnp.log(1e-6 + jax.nn.sigmoid(logs + 2.0))
    z1 = (m_shift + jnp.exp(logs) * x1) * m
    return jnp.concatenate([x0, z1], axis=1), jnp.sum(logs * m, axis=(1, 2))


def reference_forward(x, x_mask, g, params):
    g = g[..., None]
    x, m = channel_squeeze(x, x_mask, N_SQZ)
    ld = jnp.zeros((x.shape[0],), jnp.float32)
    for p in params:
        x, d = _ref_actnorm(x, m, p["an_logs"], p["an_bias"]); ld = ld + d
        x, d = _ref_invconv(p["inv_w"], x, m, N_SPLIT); ld = ld + d
        x, d = _ref_coupling(x, m, g, p); ld = ld + d
    x, _ = channel_unsqueeze(x, m, N_SQZ)
    return x, ld


# ---------------------------------------------------------------------------
if __name__ == "__main__":
    key = jax.random.PRNGKey(0)
    kx, kg, kp = jax.random.split(key, 3)

    x = jax.random.normal(kx, (B, IN_CHANNELS, T), jnp.float32)
    lengths = jnp.array([T, 12], jnp.int32)
    x_mask = (jnp.arange(T)[None, None, :] < lengths[:, None, None]).astype(jnp.float32)
    g_raw = jax.random.normal(kg, (B, GIN), jnp.float32)
    g = g_raw / jnp.linalg.norm(g_raw, axis=-1, keepdims=True)   # normalized x-vector

    params = init_params(kp)

    z, logdet = jax.jit(flow_decoder_forward)(x, x_mask, g, params)
    jax.block_until_ready(z)
    jax.block_until_ready(logdet)

    z_ref, logdet_ref = reference_forward(x, x_mask, g, params)
    np.testing.assert_allclose(np.asarray(z), np.asarray(z_ref), rtol=1e-2, atol=1e-2)
    np.testing.assert_allclose(np.asarray(logdet), np.asarray(logdet_ref),
                               rtol=1e-2, atol=1e-2)

    print("KERNEL_OK")
</pallas_src>

<mosaic_0001>
module attributes {stable_mosaic.version = 11 : i64} {
  func.func @_flow_kernel(%arg0: i32, %arg1: memref<1x16x128xf32, #tpu.memory_space<vmem>>, %arg2: memref<1x1x128xf32, #tpu.memory_space<vmem>>, %arg3: memref<3x3x1x128xf32, #tpu.memory_space<vmem>>, %arg4: memref<1x2x192x1xf32, #tpu.memory_space<vmem>>, %arg5: memref<2x16x8xf32, #tpu.memory_space<vmem>>, %arg6: memref<2x16x8xf32, #tpu.memory_space<vmem>>, %arg7: memref<2x16x1xf32, #tpu.memory_space<vmem>>, %arg8: memref<2x32x8xf32, #tpu.memory_space<vmem>>, %arg9: memref<2x32x1xf32, #tpu.memory_space<vmem>>, %arg10: memref<2x3x64x96xf32, #tpu.memory_space<vmem>>, %arg11: memref<2x3x64x1xf32, #tpu.memory_space<vmem>>, %arg12: memref<2x3x64x32xf32, #tpu.memory_space<vmem>>, %arg13: memref<2x3x64x1xf32, #tpu.memory_space<vmem>>, %arg14: memref<2x16x32xf32, #tpu.memory_space<vmem>>, %arg15: memref<2x16x1xf32, #tpu.memory_space<vmem>>, %arg16: memref<1x16x128xf32, #tpu.memory_space<vmem>>, %arg17: memref<1x1x1xf32, #tpu.memory_space<vmem>>, %arg18: memref<96x128xf32, #tpu.memory_space<vmem>>) attributes {dimension_semantics = [#tpu.dimension_semantics<parallel>], iteration_bounds = array<i64: 2>, scalar_prefetch = 0 : i64, scratch_operands = 1 : i64, tpu.core_type = #tpu.core_type<tc>, window_params = [{transform_indices = @transform_0, window_bounds = array<i64: 1, 16, 128>}, {transform_indices = @transform_1, window_bounds = array<i64: 1, 1, 128>}, {pipeline_mode = #tpu.pipeline_mode<synchronous>, transform_indices = @transform_2, window_bounds = array<i64: 3, 3, 1, 128>}, {transform_indices = @transform_3, window_bounds = array<i64: 1, 2, 192, 1>}, {pipeline_mode = #tpu.pipeline_mode<synchronous>, transform_indices = @transform_4, window_bounds = array<i64: 2, 16, 8>}, {pipeline_mode = #tpu.pipeline_mode<synchronous>, transform_indices = @transform_5, window_bounds = array<i64: 2, 16, 8>}, {pipeline_mode = #tpu.pipeline_mode<synchronous>, transform_indices = @transform_6, window_bounds = array<i64: 2, 16, 1>}, {pipeline_mode = #tpu.pipeline_mode<synchronous>, transform_indices = @transform_7, window_bounds = array<i64: 2, 32, 8>}, {pipeline_mode = #tpu.pipeline_mode<synchronous>, transform_indices = @transform_8, window_bounds = array<i64: 2, 32, 1>}, {pipeline_mode = #tpu.pipeline_mode<synchronous>, transform_indices = @transform_9, window_bounds = array<i64: 2, 3, 64, 96>}, {pipeline_mode = #tpu.pipeline_mode<synchronous>, transform_indices = @transform_10, window_bounds = array<i64: 2, 3, 64, 1>}, {pipeline_mode = #tpu.pipeline_mode<synchronous>, transform_indices = @transform_11, window_bounds = array<i64: 2, 3, 64, 32>}, {pipeline_mode = #tpu.pipeline_mode<synchronous>, transform_indices = @transform_12, window_bounds = array<i64: 2, 3, 64, 1>}, {pipeline_mode = #tpu.pipeline_mode<synchronous>, transform_indices = @transform_13, window_bounds = array<i64: 2, 16, 32>}, {pipeline_mode = #tpu.pipeline_mode<synchronous>, transform_indices = @transform_14, window_bounds = array<i64: 2, 16, 1>}, {transform_indices = @transform_15, window_bounds = array<i64: 1, 16, 128>}, {transform_indices = @transform_16, window_bounds = array<i64: 1, 1, 1>}]} {
    %c0 = arith.constant 0 : index
    %c0_0 = arith.constant 0 : index
    %c0_1 = arith.constant 0 : index
    %0 = vector.load %arg1[%c0, %c0_0, %c0_1] : memref<1x16x128xf32, #tpu.memory_space<vmem>>, vector<1x16x128xf32>
    %1 = vector.shape_cast %0 : vector<1x16x128xf32> to vector<16x128xf32>
    %c0_2 = arith.constant 0 : index
    %c0_3 = arith.constant 0 : index
    %c0_4 = arith.constant 0 : index
    %2 = vector.load %arg2[%c0_2, %c0_3, %c0_4] : memref<1x1x128xf32, #tpu.memory_space<vmem>>, vector<1x1x128xf32>
    %3 = vector.shape_cast %2 : vector<1x1x128xf32> to vector<1x128xf32>
    %4 = vector.extract_strided_slice %1 {offsets = [0, 0], sizes = [8, 128], strides = [1, 1]} : vector<16x128xf32> to vector<8x128xf32>
    %5 = vector.extract_strided_slice %1 {offsets = [8, 0], sizes = [8, 128], strides = [1, 1]} : vector<16x128xf32> to vector<8x128xf32>
    %cst = arith.constant 0.000000e+00 : f32
    %6 = vector.broadcast %cst : f32 to vector<1x128xf32>
    %c0_5 = arith.constant 0 : index
    %c0_6 = arith.constant 0 : index
    %c0_7 = arith.constant 0 : index
    %7 = vector.load %arg5[%c0_5, %c0_6, %c0_7] : memref<2x16x8xf32, #tpu.memory_space<vmem>>, vector<1x16x8xf32>
    %8 = vector.shape_cast %7 : vector<1x16x8xf32> to vector<16x8xf32>
    %cst_8 = arith.constant dense<0.000000e+00> : vector<16x128xf32>
    %9 = tpu.matmul %8, %4, %cst_8 {dimension_numbers = #tpu.dot_dimension_numbers<[1], [0], [0], [1], [0, 0, 1, 1], [], []>} : vector<16x8xf32>, vector<8x128xf32>, vector<16x128xf32> -> vector<16x128xf32>
    %c0_9 = arith.constant 0 : index
    %c0_10 = arith.constant 0 : index
    %c0_11 = arith.constant 0 : index
    %10 = vector.load %arg6[%c0_9, %c0_10, %c0_11] : memref<2x16x8xf32, #tpu.memory_space<vmem>>, vector<1x16x8xf32>
    %11 = vector.shape_cast %10 : vector<1x16x8xf32> to vector<16x8xf32>
    %cst_12 = arith.constant dense<0.000000e+00> : vector<16x128xf32>
    %12 = tpu.matmul %11, %5, %cst_12 {dimension_numbers = #tpu.dot_dimension_numbers<[1], [0], [0], [1], [0, 0, 1, 1], [], []>} : vector<16x8xf32>, vector<8x128xf32>, vector<16x128xf32> -> vector<16x128xf32>
    %13 = arith.addf %9, %12 : vector<16x128xf32>
    %c0_13 = arith.constant 0 : index
    %c0_14 = arith.constant 0 : index
    %c0_15 = arith.constant 0 : index
    %14 = vector.load %arg7[%c0_13, %c0_14, %c0_15] : memref<2x16x1xf32, #tpu.memory_space<vmem>>, vector<1x16x1xf32>
    %15 = vector.shape_cast %14 : vector<1x16x1xf32> to vector<16x1xf32>
    %16 = vector.broadcast %15 : vector<16x1xf32> to vector<16x128xf32>
    %17 = arith.addf %13, %16 : vector<16x128xf32>
    %18 = vector.broadcast %3 : vector<1x128xf32> to vector<16x128xf32>
    %19 = arith.mulf %17, %18 : vector<16x128xf32>
    %20 = vector.extract_strided_slice %19 {offsets = [0, 0], sizes = [8, 128], strides = [1, 1]} : vector<16x128xf32> to vector<8x128xf32>
    %21 = vector.extract_strided_slice %19 {offsets = [8, 0], sizes = [8, 128], strides = [1, 1]} : vector<16x128xf32> to vector<8x128xf32>
    %c0_16 = arith.constant 0 : index
    %c0_17 = arith.constant 0 : index
    %c0_18 = arith.constant 0 : index
    %22 = vector.load %arg8[%c0_16, %c0_17, %c0_18] : memref<2x32x8xf32, #tpu.memory_space<vmem>>, vector<1x32x8xf32>
    %23 = vector.shape_cast %22 : vector<1x32x8xf32> to vector<32x8xf32>
    %cst_19 = arith.constant dense<0.000000e+00> : vector<32x128xf32>
    %24 = tpu.matmul %23, %20, %cst_19 {dimension_numbers = #tpu.dot_dimension_numbers<[1], [0], [0], [1], [0, 0, 1, 1], [], []>} : vector<32x8xf32>, vector<8x128xf32>, vector<32x128xf32> -> vector<32x128xf32>
    %c0_20 = arith.constant 0 : index
    %c0_21 = arith.constant 0 : index
    %c0_22 = arith.constant 0 : index
    %25 = vector.load %arg9[%c0_20, %c0_21, %c0_22] : memref<2x32x1xf32, #tpu.memory_space<vmem>>, vector<1x32x1xf32>
    %26 = vector.shape_cast %25 : vector<1x32x1xf32> to vector<32x1xf32>
    %27 = vector.broadcast %26 : vector<32x1xf32> to vector<32x128xf32>
    %28 = arith.addf %24, %27 : vector<32x128xf32>
    %29 = vector.broadcast %3 : vector<1x128xf32> to vector<32x128xf32>
    %30 = arith.mulf %28, %29 : vector<32x128xf32>
    %c0_23 = arith.constant 0 : index
    %c0_24 = arith.constant 0 : index
    %c0_25 = arith.constant 0 : index
    %c0_26 = arith.constant 0 : index
    %31 = vector.load %arg4[%c0_23, %c0_24, %c0_25, %c0_26] : memref<1x2x192x1xf32, #tpu.memory_space<vmem>>, vector<1x1x192x1xf32>
    %32 = vector.shape_cast %31 : vector<1x1x192x1xf32> to vector<192x1xf32>
    %cst_27 = arith.constant 0.000000e+00 : f32
    %33 = vector.broadcast %cst_27 : f32 to vector<32x128xf32>
    %c1_i32 = arith.constant 1 : i32
    %34 = tpu.dynamic_rotate %30 by %c1_i32 dim 1 : vector<32x128xf32>, i32 -> vector<32x128xf32>
    %c0_28 = arith.constant 0 : index
    %c0_29 = arith.constant 0 : index
    %c0_30 = arith.constant 0 : index
    %c0_31 = arith.constant 0 : index
    %35 = vector.load %arg3[%c0_28, %c0_29, %c0_30, %c0_31] : memref<3x3x1x128xf32, #tpu.memory_space<vmem>>, vector<1x1x1x128xf32>
    %36 = vector.shape_cast %35 : vector<1x1x1x128xf32> to vector<1x128xf32>
    %37 = vector.broadcast %36 : vector<1x128xf32> to vector<32x128xf32>
    %38 = arith.mulf %34, %37 : vector<32x128xf32>
    %c0_32 = arith.constant 0 : index
    %c0_33 = arith.constant 0 : index
    %39 = vector.load %arg18[%c0_32, %c0_33] : memref<96x128xf32, #tpu.memory_space<vmem>>, vector<32x128xf32>
    tpu.vector_store %arg18[%c0_32, %c0_33], %38 {strides = array<i32>} : memref<96x128xf32, #tpu.memory_space<vmem>>, vector<32x128xf32>,
    %c32 = arith.constant 32 : index
    %c0_34 = arith.constant 0 : index
    %40 = vector.load %arg18[%c32, %c0_34] : memref<96x128xf32, #tpu.memory_space<vmem>>, vector<32x128xf32>
    tpu.vector_store %arg18[%c32, %c0_34], %30 {strides = array<i32>} : memref<96x128xf32, #tpu.memory_space<vmem>>, vector<32x128xf32>,
    %c127_i32 = arith.constant 127 : i32
    %41 = tpu.dynamic_rotate %30 by %c127_i32 dim 1 : vector<32x128xf32>, i32 -> vector<32x128xf32>
    %c0_35 = arith.constant 0 : index
    %c2 = arith.constant 2 : index
    %c0_36 = arith.constant 0 : index
    %c0_37 = arith.constant 0 : index
    %42 = vector.load %arg3[%c0_35, %c2, %c0_36, %c0_37] : memref<3x3x1x128xf32, #tpu.memory_space<vmem>>, vector<1x1x1x128xf32>
    %43 = vector.shape_cast %42 : vector<1x1x1x128xf32> to vector<1x128xf32>
    %44 = vector.broadcast %43 : vector<1x128xf32> to vector<32x128xf32>
    %45 = arith.mulf %41, %44 : vector<32x128xf32>
    %c64 = arith.constant 64 : index
    %c0_38 = arith.constant 0 : index
    %46 = vector.load %arg18[%c64, %c0_38] : memref<96x128xf32, #tpu.memory_space<vmem>>, vector<32x128xf32>
    tpu.vector_store %arg18[%c64, %c0_38], %45 {strides = array<i32>} : memref<96x128xf32, #tpu.memory_space<vmem>>, vector<32x128xf32>,
    %c0_39 = arith.constant 0 : index
    %c0_40 = arith.constant 0 : index
    %c0_41 = arith.constant 0 : index
    %c0_42 = arith.constant 0 : index
    %47 = vector.load %arg10[%c0_39, %c0_40, %c0_41, %c0_42] : memref<2x3x64x96xf32, #tpu.memory_space<vmem>>, vector<1x1x64x96xf32>
    %48 = vector.shape_cast %47 : vector<1x1x64x96xf32> to vector<64x96xf32>
    %c0_43 = arith.constant 0 : index
    %c0_44 = arith.constant 0 : index
    %49 = vector.load %arg18[%c0_43, %c0_44] : memref<96x128xf32, #tpu.memory_space<vmem>>, vector<96x128xf32>
    %cst_45 = arith.constant dense<0.000000e+00> : vector<64x128xf32>
    %50 = tpu.matmul %48, %49, %cst_45 {dimension_numbers = #tpu.dot_dimension_numbers<[1], [0], [0], [1], [0, 0, 1, 1], [], []>} : vector<64x96xf32>, vector<96x128xf32>, vector<64x128xf32> -> vector<64x128xf32>
    %c0_46 = arith.constant 0 : index
    %c0_47 = arith.constant 0 : index
    %c0_48 = arith.constant 0 : index
    %c0_49 = arith.constant 0 : index
    %51 = vector.load %arg11[%c0_46, %c0_47, %c0_48, %c0_49] : memref<2x3x64x1xf32, #tpu.memory_space<vmem>>, vector<1x1x64x1xf32>
    %52 = vector.shape_cast %51 : vector<1x1x64x1xf32> to vector<64x1xf32>
    %53 = vector.broadcast %52 : vector<64x1xf32> to vector<64x128xf32>
    %54 = arith.addf %50, %53 : vector<64x128xf32>
    %55 = vector.extract_strided_slice %32 {offsets = [0, 0], sizes = [64, 1], strides = [1, 1]} : vector<192x1xf32> to vector<64x1xf32>
    %56 = vector.broadcast %55 : vector<64x1xf32> to vector<64x128xf32>
    %57 = arith.addf %54, %56 : vector<64x128xf32>
    %58 = vector.extract_strided_slice %57 {offsets = [0, 0], sizes = [32, 128], strides = [1, 1]} : vector<64x128xf32> to vector<32x128xf32>
    %59 = math.tanh %58 : vector<32x128xf32>
    %60 = vector.extract_strided_slice %57 {offsets = [32, 0], sizes = [32, 128], strides = [1, 1]} : vector<64x128xf32> to vector<32x128xf32>
    %61 = arith.negf %60 : vector<32x128xf32>
    %62 = math.exp %61 : vector<32x128xf32>
    %cst_50 = arith.constant 1.000000e+00 : f32
    %63 = vector.broadcast %cst_50 : f32 to vector<32x128xf32>
    %64 = arith.addf %63, %62 : vector<32x128xf32>
    %65 = arith.divf %63, %64 : vector<32x128xf32>
    %66 = arith.mulf %59, %65 : vector<32x128xf32>
    %c0_51 = arith.constant 0 : index
    %c0_52 = arith.constant 0 : index
    %c0_53 = arith.constant 0 : index
    %c0_54 = arith.constant 0 : index
    %67 = vector.load %arg12[%c0_51, %c0_52, %c0_53, %c0_54] : memref<2x3x64x32xf32, #tpu.memory_space<vmem>>, vector<1x1x64x32xf32>
    %68 = vector.shape_cast %67 : vector<1x1x64x32xf32> to vector<64x32xf32>
    %cst_55 = arith.constant dense<0.000000e+00> : vector<64x128xf32>
    %69 = tpu.matmul %68, %66, %cst_55 {dimension_numbers = #tpu.dot_dimension_numbers<[1], [0], [0], [1], [0, 0, 1, 1], [], []>} : vector<64x32xf32>, vector<32x128xf32>, vector<64x128xf32> -> vector<64x128xf32>
    %c0_56 = arith.constant 0 : index
    %c0_57 = arith.constant 0 : index
    %c0_58 = arith.constant 0 : index
    %c0_59 = arith.constant 0 : index
    %70 = vector.load %arg13[%c0_56, %c0_57, %c0_58, %c0_59] : memref<2x3x64x1xf32, #tpu.memory_space<vmem>>, vector<1x1x64x1xf32>
    %71 = vector.shape_cast %70 : vector<1x1x64x1xf32> to vector<64x1xf32>
    %72 = vector.broadcast %71 : vector<64x1xf32> to vector<64x128xf32>
    %73 = arith.addf %69, %72 : vector<64x128xf32>
    %74 = vector.extract_strided_slice %73 {offsets = [0, 0], sizes = [32, 128], strides = [1, 1]} : vector<64x128xf32> to vector<32x128xf32>
    %75 = arith.addf %30, %74 : vector<32x128xf32>
    %76 = vector.broadcast %3 : vector<1x128xf32> to vector<32x128xf32>
    %77 = arith.mulf %75, %76 : vector<32x128xf32>
    %78 = vector.extract_strided_slice %73 {offsets = [32, 0], sizes = [32, 128], strides = [1, 1]} : vector<64x128xf32> to vector<32x128xf32>
    %79 = arith.addf %33, %78 : vector<32x128xf32>
    %c1_i32_60 = arith.constant 1 : i32
    %80 = tpu.dynamic_rotate %77 by %c1_i32_60 dim 1 : vector<32x128xf32>, i32 -> vector<32x128xf32>
    %c1 = arith.constant 1 : index
    %c0_61 = arith.constant 0 : index
    %c0_62 = arith.constant 0 : index
    %c0_63 = arith.constant 0 : index
    %81 = vector.load %arg3[%c1, %c0_61, %c0_62, %c0_63] : memref<3x3x1x128xf32, #tpu.memory_space<vmem>>, vector<1x1x1x128xf32>
    %82 = vector.shape_cast %81 : vector<1x1x1x128xf32> to vector<1x128xf32>
    %83 = vector.broadcast %82 : vector<1x128xf32> to vector<32x128xf32>
    %84 = arith.mulf %80, %83 : vector<32x128xf32>
    %c0_64 = arith.constant 0 : index
    %c0_65 = arith.constant 0 : index
    %85 = vector.load %arg18[%c0_64, %c0_65] : memref<96x128xf32, #tpu.memory_space<vmem>>, vector<32x128xf32>
    tpu.vector_store %arg18[%c0_64, %c0_65], %84 {strides = array<i32>} : memref<96x128xf32, #tpu.memory_space<vmem>>, vector<32x128xf32>,
    %c32_66 = arith.constant 32 : index
    %c0_67 = arith.constant 0 : index
    %86 = vector.load %arg18[%c32_66, %c0_67] : memref<96x128xf32, #tpu.memory_space<vmem>>, vector<32x128xf32>
    tpu.vector_store %arg18[%c32_66, %c0_67], %77 {strides = array<i32>} : memref<96x128xf32, #tpu.memory_space<vmem>>, vector<32x128xf32>,
    %c127_i32_68 = arith.constant 127 : i32
    %87 = tpu.dynamic_rotate %77 by %c127_i32_68 dim 1 : vector<32x128xf32>, i32 -> vector<32x128xf32>
    %c1_69 = arith.constant 1 : index
    %c2_70 = arith.constant 2 : index
    %c0_71 = arith.constant 0 : index
    %c0_72 = arith.constant 0 : index
    %88 = vector.load %arg3[%c1_69, %c2_70, %c0_71, %c0_72] : memref<3x3x1x128xf32, #tpu.memory_space<vmem>>, vector<1x1x1x128xf32>
    %89 = vector.shape_cast %88 : vector<1x1x1x128xf32> to vector<1x128xf32>
    %90 = vector.broadcast %89 : vector<1x128xf32> to vector<32x128xf32>
    %91 = arith.mulf %87, %90 : vector<32x128xf32>
    %c64_73 = arith.constant 64 : index
    %c0_74 = arith.constant 0 : index
    %92 = vector.load %arg18[%c64_73, %c0_74] : memref<96x128xf32, #tpu.memory_space<vmem>>, vector<32x128xf32>
    tpu.vector_store %arg18[%c64_73, %c0_74], %91 {strides = array<i32>} : memref<96x128xf32, #tpu.memory_space<vmem>>, vector<32x128xf32>,
    %c0_75 = arith.constant 0 : index
    %c1_76 = arith.constant 1 : index
    %c0_77 = arith.constant 0 : index
    %c0_78 = arith.constant 0 : index
    %93 = vector.load %arg10[%c0_75, %c1_76, %c0_77, %c0_78] : memref<2x3x64x96xf32, #tpu.memory_space<vmem>>, vector<1x1x64x96xf32>
    %94 = vector.shape_cast %93 : vector<1x1x64x96xf32> to vector<64x96xf32>
    %c0_79 = arith.constant 0 : index
    %c0_80 = arith.constant 0 : index
    %95 = vector.load %arg18[%c0_79, %c0_80] : memref<96x128xf32, #tpu.memory_space<vmem>>, vector<96x128xf32>
    %cst_81 = arith.constant dense<0.000000e+00> : vector<64x128xf32>
    %96 = tpu.matmul %94, %95, %cst_81 {dimension_numbers = #tpu.dot_dimension_numbers<[1], [0], [0], [1], [0, 0, 1, 1], [], []>} : vector<64x96xf32>, vector<96x128xf32>, vector<64x128xf32> -> vector<64x128xf32>
    %c0_82 = arith.constant 0 : index
    %c1_83 = arith.constant 1 : index
    %c0_84 = arith.constant 0 : index
    %c0_85 = arith.constant 0 : index
    %97 = vector.load %arg11[%c0_82, %c1_83, %c0_84, %c0_85] : memref<2x3x64x1xf32, #tpu.memory_space<vmem>>, vector<1x1x64x1xf32>
    %98 = vector.shape_cast %97 : vector<1x1x64x1xf32> to vector<64x1xf32>
    %99 = vector.broadcast %98 : vector<64x1xf32> to vector<64x128xf32>
    %100 = arith.addf %96, %99 : vector<64x128xf32>
    %101 = vector.extract_strided_slice %32 {offsets = [64, 0], sizes = [64, 1], strides = [1, 1]} : vector<192x1xf32> to vector<64x1xf32>
    %102 = vector.broadcast %101 : vector<64x1xf32> to vector<64x128xf32>
    %103 = arith.addf %100, %102 : vector<64x128xf32>
    %104 = vector.extract_strided_slice %103 {offsets = [0, 0], sizes = [32, 128], strides = [1, 1]} : vector<64x128xf32> to vector<32x128xf32>
    %105 = math.tanh %104 : vector<32x128xf32>
    %106 = vector.extract_strided_slice %103 {offsets = [32, 0], sizes = [32, 128], strides = [1, 1]} : vector<64x128xf32> to vector<32x128xf32>
    %107 = arith.negf %106 : vector<32x128xf32>
    %108 = math.exp %107 : vector<32x128xf32>
    %cst_86 = arith.constant 1.000000e+00 : f32
    %109 = vector.broadcast %cst_86 : f32 to vector<32x128xf32>
    %110 = arith.addf %109, %108 : vector<32x128xf32>
    %111 = arith.divf %109, %110 : vector<32x128xf32>
    %112 = arith.mulf %105, %111 : vector<32x128xf32>
    %c0_87 = arith.constant 0 : index
    %c1_88 = arith.constant 1 : index
    %c0_89 = arith.constant 0 : index
    %c0_90 = arith.constant 0 : index
    %113 = vector.load %arg12[%c0_87, %c1_88, %c0_89, %c0_90] : memref<2x3x64x32xf32, #tpu.memory_space<vmem>>, vector<1x1x64x32xf32>
    %114 = vector.shape_cast %113 : vector<1x1x64x32xf32> to vector<64x32xf32>
    %cst_91 = arith.constant dense<0.000000e+00> : vector<64x128xf32>
    %115 = tpu.matmul %114, %112, %cst_91 {dimension_numbers = #tpu.dot_dimension_numbers<[1], [0], [0], [1], [0, 0, 1, 1], [], []>} : vector<64x32xf32>, vector<32x128xf32>, vector<64x128xf32> -> vector<64x128xf32>
    %c0_92 = arith.constant 0 : index
    %c1_93 = arith.constant 1 : index
    %c0_94 = arith.constant 0 : index
    %c0_95 = arith.constant 0 : index
    %116 = vector.load %arg13[%c0_92, %c1_93, %c0_94, %c0_95] : memref<2x3x64x1xf32, #tpu.memory_space<vmem>>, vector<1x1x64x1xf32>
    %117 = vector.shape_cast %116 : vector<1x1x64x1xf32> to vector<64x1xf32>
    %118 = vector.broadcast %117 : vector<64x1xf32> to vector<64x128xf32>
    %119 = arith.addf %115, %118 : vector<64x128xf32>
    %120 = vector.extract_strided_slice %119 {offsets = [0, 0], sizes = [32, 128], strides = [1, 1]} : vector<64x128xf32> to vector<32x128xf32>
    %121 = arith.addf %77, %120 : vector<32x128xf32>
    %122 = vector.broadcast %3 : vector<1x128xf32> to vector<32x128xf32>
    %123 = arith.mulf %121, %122 : vector<32x128xf32>
    %124 = vector.extract_strided_slice %119 {offsets = [32, 0], sizes = [32, 128], strides = [1, 1]} : vector<64x128xf32> to vector<32x128xf32>
    %125 = arith.addf %79, %124 : vector<32x128xf32>
    %c1_i32_96 = arith.constant 1 : i32
    %126 = tpu.dynamic_rotate %123 by %c1_i32_96 dim 1 : vector<32x128xf32>, i32 -> vector<32x128xf32>
    %c2_97 = arith.constant 2 : index
    %c0_98 = arith.constant 0 : index
    %c0_99 = arith.constant 0 : index
    %c0_100 = arith.constant 0 : index
    %127 = vector.load %arg3[%c2_97, %c0_98, %c0_99, %c0_100] : memref<3x3x1x128xf32, #tpu.memory_space<vmem>>, vector<1x1x1x128xf32>
    %128 = vector.shape_cast %127 : vector<1x1x1x128xf32> to vector<1x128xf32>
    %129 = vector.broadcast %128 : vector<1x128xf32> to vector<32x128xf32>
    %130 = arith.mulf %126, %129 : vector<32x128xf32>
    %c0_101 = arith.constant 0 : index
    %c0_102 = arith.constant 0 : index
    %131 = vector.load %arg18[%c0_101, %c0_102] : memref<96x128xf32, #tpu.memory_space<vmem>>, vector<32x128xf32>
    tpu.vector_store %arg18[%c0_101, %c0_102], %130 {strides = array<i32>} : memref<96x128xf32, #tpu.memory_space<vmem>>, vector<32x128xf32>,
    %c32_103 = arith.constant 32 : index
    %c0_104 = arith.constant 0 : index
    %132 = vector.load %arg18[%c32_103, %c0_104] : memref<96x128xf32, #tpu.memory_space<vmem>>, vector<32x128xf32>
    tpu.vector_store %arg18[%c32_103, %c0_104], %123 {strides = array<i32>} : memref<96x128xf32, #tpu.memory_space<vmem>>, vector<32x128xf32>,
    %c127_i32_105 = arith.constant 127 : i32
    %133 = tpu.dynamic_rotate %123 by %c127_i32_105 dim 1 : vector<32x128xf32>, i32 -> vector<32x128xf32>
    %c2_106 = arith.constant 2 : index
    %c2_107 = arith.constant 2 : index
    %c0_108 = arith.constant 0 : index
    %c0_109 = arith.constant 0 : index
    %134 = vector.load %arg3[%c2_106, %c2_107, %c0_108, %c0_109] : memref<3x3x1x128xf32, #tpu.memory_space<vmem>>, vector<1x1x1x128xf32>
    %135 = vector.shape_cast %134 : vector<1x1x1x128xf32> to vector<1x128xf32>
    %136 = vector.broadcast %135 : vector<1x128xf32> to vector<32x128xf32>
    %137 = arith.mulf %133, %136 : vector<32x128xf32>
    %c64_110 = arith.constant 64 : index
    %c0_111 = arith.constant 0 : index
    %138 = vector.load %arg18[%c64_110, %c0_111] : memref<96x128xf32, #tpu.memory_space<vmem>>, vector<32x128xf32>
    tpu.vector_store %arg18[%c64_110, %c0_111], %137 {strides = array<i32>} : memref<96x128xf32, #tpu.memory_space<vmem>>, vector<32x128xf32>,
    %c0_112 = arith.constant 0 : index
    %c2_113 = arith.constant 2 : index
    %c0_114 = arith.constant 0 : index
    %c0_115 = arith.constant 0 : index
    %139 = vector.load %arg10[%c0_112, %c2_113, %c0_114, %c0_115] : memref<2x3x64x96xf32, #tpu.memory_space<vmem>>, vector<1x1x64x96xf32>
    %140 = vector.shape_cast %139 : vector<1x1x64x96xf32> to vector<64x96xf32>
    %c0_116 = arith.constant 0 : index
    %c0_117 = arith.constant 0 : index
    %141 = vector.load %arg18[%c0_116, %c0_117] : memref<96x128xf32, #tpu.memory_space<vmem>>, vector<96x128xf32>
    %cst_118 = arith.constant dense<0.000000e+00> : vector<64x128xf32>
    %142 = tpu.matmul %140, %141, %cst_118 {dimension_numbers = #tpu.dot_dimension_numbers<[1], [0], [0], [1], [0, 0, 1, 1], [], []>} : vector<64x96xf32>, vector<96x128xf32>, vector<64x128xf32> -> vector<64x128xf32>
    %c0_119 = arith.constant 0 : index
    %c2_120 = arith.constant 2 : index
    %c0_121 = arith.constant 0 : index
    %c0_122 = arith.constant 0 : index
    %143 = vector.load %arg11[%c0_119, %c2_120, %c0_121, %c0_122] : memref<2x3x64x1xf32, #tpu.memory_space<vmem>>, vector<1x1x64x1xf32>
    %144 = vector.shape_cast %143 : vector<1x1x64x1xf32> to vector<64x1xf32>
    %145 = vector.broadcast %144 : vector<64x1xf32> to vector<64x128xf32>
    %146 = arith.addf %142, %145 : vector<64x128xf32>
    %147 = vector.extract_strided_slice %32 {offsets = [128, 0], sizes = [64, 1], strides = [1, 1]} : vector<192x1xf32> to vector<64x1xf32>
    %148 = vector.broadcast %147 : vector<64x1xf32> to vector<64x128xf32>
    %149 = arith.addf %146, %148 : vector<64x128xf32>
    %150 = vector.extract_strided_slice %149 {offsets = [0, 0], sizes = [32, 128], strides = [1, 1]} : vector<64x128xf32> to vector<32x128xf32>
    %151 = math.tanh %150 : vector<32x128xf32>
    %152 = vector.extract_strided_slice %149 {offsets = [32, 0], sizes = [32, 128], strides = [1, 1]} : vector<64x128xf32> to vector<32x128xf32>
    %153 = arith.negf %152 : vector<32x128xf32>
    %154 = math.exp %153 : vector<32x128xf32>
    %cst_123 = arith.constant 1.000000e+00 : f32
    %155 = vector.broadcast %cst_123 : f32 to vector<32x128xf32>
    %156 = arith.addf %155, %154 : vector<32x128xf32>
    %157 = arith.divf %155, %156 : vector<32x128xf32>
    %158 = arith.mulf %151, %157 : vector<32x128xf32>
    %c0_124 = arith.constant 0 : index
    %c2_125 = arith.constant 2 : index
    %c0_126 = arith.constant 0 : index
    %c0_127 = arith.constant 0 : index
    %159 = vector.load %arg12[%c0_124, %c2_125, %c0_126, %c0_127] : memref<2x3x64x32xf32, #tpu.memory_space<vmem>>, vector<1x1x64x32xf32>
    %160 = vector.shape_cast %159 : vector<1x1x64x32xf32> to vector<64x32xf32>
    %cst_128 = arith.constant dense<0.000000e+00> : vector<64x128xf32>
    %161 = tpu.matmul %160, %158, %cst_128 {dimension_numbers = #tpu.dot_dimension_numbers<[1], [0], [0], [1], [0, 0, 1, 1], [], []>} : vector<64x32xf32>, vector<32x128xf32>, vector<64x128xf32> -> vector<64x128xf32>
    %c0_129 = arith.constant 0 : index
    %c2_130 = arith.constant 2 : index
    %c0_131 = arith.constant 0 : index
    %c0_132 = arith.constant 0 : index
    %162 = vector.load %arg13[%c0_129, %c2_130, %c0_131, %c0_132] : memref<2x3x64x1xf32, #tpu.memory_space<vmem>>, vector<1x1x64x1xf32>
    %163 = vector.shape_cast %162 : vector<1x1x64x1xf32> to vector<64x1xf32>
    %164 = vector.broadcast %163 : vector<64x1xf32> to vector<64x128xf32>
    %165 = arith.addf %161, %164 : vector<64x128xf32>
    %166 = vector.extract_strided_slice %165 {offsets = [32, 0], sizes = [32, 128], strides = [1, 1]} : vector<64x128xf32> to vector<32x128xf32>
    %167 = arith.addf %125, %166 : vector<32x128xf32>
    %168 = vector.broadcast %3 : vector<1x128xf32> to vector<32x128xf32>
    %169 = arith.mulf %167, %168 : vector<32x128xf32>
    %c0_133 = arith.constant 0 : index
    %c0_134 = arith.constant 0 : index
    %c0_135 = arith.constant 0 : index
    %170 = vector.load %arg14[%c0_133, %c0_134, %c0_135] : memref<2x16x32xf32, #tpu.memory_space<vmem>>, vector<1x16x32xf32>
    %171 = vector.shape_cast %170 : vector<1x16x32xf32> to vector<16x32xf32>
    %cst_136 = arith.constant dense<0.000000e+00> : vector<16x128xf32>
    %172 = tpu.matmul %171, %169, %cst_136 {dimension_numbers = #tpu.dot_dimension_numbers<[1], [0], [0], [1], [0, 0, 1, 1], [], []>} : vector<16x32xf32>, vector<32x128xf32>, vector<16x128xf32> -> vector<16x128xf32>
    %c0_137 = arith.constant 0 : index
    %c0_138 = arith.constant 0 : index
    %c0_139 = arith.constant 0 : index
    %173 = vector.load %arg15[%c0_137, %c0_138, %c0_139] : memref<2x16x1xf32, #tpu.memory_space<vmem>>, vector<1x16x1xf32>
    %174 = vector.shape_cast %173 : vector<1x16x1xf32> to vector<16x1xf32>
    %175 = vector.broadcast %174 : vector<16x1xf32> to vector<16x128xf32>
    %176 = arith.addf %172, %175 : vector<16x128xf32>
    %177 = vector.extract_strided_slice %176 {offsets = [0, 0], sizes = [8, 128], strides = [1, 1]} : vector<16x128xf32> to vector<8x128xf32>
    %178 = vector.extract_strided_slice %176 {offsets = [8, 0], sizes = [8, 128], strides = [1, 1]} : vector<16x128xf32> to vector<8x128xf32>
    %179 = math.exp %178 : vector<8x128xf32>
    %180 = arith.mulf %179, %21 : vector<8x128xf32>
    %181 = arith.addf %177, %180 : vector<8x128xf32>
    %182 = vector.broadcast %3 : vector<1x128xf32> to vector<8x128xf32>
    %183 = arith.mulf %181, %182 : vector<8x128xf32>
    %184 = vector.broadcast %3 : vector<1x128xf32> to vector<8x128xf32>
    %185 = arith.mulf %178, %184 : vector<8x128xf32>
    %cst_140 = arith.constant dense<0.000000e+00> : vector<128xf32>
    %186 = vector.multi_reduction <add>, %185, %cst_140 [0] : vector<8x128xf32> to vector<128xf32>
    %187 = vector.shape_cast %186 : vector<128xf32> to vector<1x128xf32>
    %188 = arith.addf %6, %187 : vector<1x128xf32>
    %c1_141 = arith.constant 1 : index
    %c0_142 = arith.constant 0 : index
    %c0_143 = arith.constant 0 : index
    %189 = vector.load %arg5[%c1_141, %c0_142, %c0_143] : memref<2x16x8xf32, #tpu.memory_space<vmem>>, vector<1x16x8xf32>
    %190 = vector.shape_cast %189 : vector<1x16x8xf32> to vector<16x8xf32>
    %cst_144 = arith.constant dense<0.000000e+00> : vector<16x128xf32>
    %191 = tpu.matmul %190, %20, %cst_144 {dimension_numbers = #tpu.dot_dimension_numbers<[1], [0], [0], [1], [0, 0, 1, 1], [], []>} : vector<16x8xf32>, vector<8x128xf32>, vector<16x128xf32> -> vector<16x128xf32>
    %c1_145 = arith.constant 1 : index
    %c0_146 = arith.constant 0 : index
    %c0_147 = arith.constant 0 : index
    %192 = vector.load %arg6[%c1_145, %c0_146, %c0_147] : memref<2x16x8xf32, #tpu.memory_space<vmem>>, vector<1x16x8xf32>
    %193 = vector.shape_cast %192 : vector<1x16x8xf32> to vector<16x8xf32>
    %cst_148 = arith.constant dense<0.000000e+00> : vector<16x128xf32>
    %194 = tpu.matmul %193, %183, %cst_148 {dimension_numbers = #tpu.dot_dimension_numbers<[1], [0], [0], [1], [0, 0, 1, 1], [], []>} : vector<16x8xf32>, vector<8x128xf32>, vector<16x128xf32> -> vector<16x128xf32>
    %195 = arith.addf %191, %194 : vector<16x128xf32>
    %c1_149 = arith.constant 1 : index
    %c0_150 = arith.constant 0 : index
    %c0_151 = arith.constant 0 : index
    %196 = vector.load %arg7[%c1_149, %c0_150, %c0_151] : memref<2x16x1xf32, #tpu.memory_space<vmem>>, vector<1x16x1xf32>
    %197 = vector.shape_cast %196 : vector<1x16x1xf32> to vector<16x1xf32>
    %198 = vector.broadcast %197 : vector<16x1xf32> to vector<16x128xf32>
    %199 = arith.addf %195, %198 : vector<16x128xf32>
    %200 = vector.broadcast %3 : vector<1x128xf32> to vector<16x128xf32>
    %201 = arith.mulf %199, %200 : vector<16x128xf32>
    %202 = vector.extract_strided_slice %201 {offsets = [0, 0], sizes = [8, 128], strides = [1, 1]} : vector<16x128xf32> to vector<8x128xf32>
    %203 = vector.extract_strided_slice %201 {offsets = [8, 0], sizes = [8, 128], strides = [1, 1]} : vector<16x128xf32> to vector<8x128xf32>
    %c1_152 = arith.constant 1 : index
    %c0_153 = arith.constant 0 : index
    %c0_154 = arith.constant 0 : index
    %204 = vector.load %arg8[%c1_152, %c0_153, %c0_154] : memref<2x32x8xf32, #tpu.memory_space<vmem>>, vector<1x32x8xf32>
    %205 = vector.shape_cast %204 : vector<1x32x8xf32> to vector<32x8xf32>
    %cst_155 = arith.constant dense<0.000000e+00> : vector<32x128xf32>
    %206 = tpu.matmul %205, %202, %cst_155 {dimension_numbers = #tpu.dot_dimension_numbers<[1], [0], [0], [1], [0, 0, 1, 1], [], []>} : vector<32x8xf32>, vector<8x128xf32>, vector<32x128xf32> -> vector<32x128xf32>
    %c1_156 = arith.constant 1 : index
    %c0_157 = arith.constant 0 : index
    %c0_158 = arith.constant 0 : index
    %207 = vector.load %arg9[%c1_156, %c0_157, %c0_158] : memref<2x32x1xf32, #tpu.memory_space<vmem>>, vector<1x32x1xf32>
    %208 = vector.shape_cast %207 : vector<1x32x1xf32> to vector<32x1xf32>
    %209 = vector.broadcast %208 : vector<32x1xf32> to vector<32x128xf32>
    %210 = arith.addf %206, %209 : vector<32x128xf32>
    %211 = vector.broadcast %3 : vector<1x128xf32> to vector<32x128xf32>
    %212 = arith.mulf %210, %211 : vector<32x128xf32>
    %c0_159 = arith.constant 0 : index
    %c1_160 = arith.constant 1 : index
    %c0_161 = arith.constant 0 : index
    %c0_162 = arith.constant 0 : index
    %213 = vector.load %arg4[%c0_159, %c1_160, %c0_161, %c0_162] : memref<1x2x192x1xf32, #tpu.memory_space<vmem>>, vector<1x1x192x1xf32>
    %214 = vector.shape_cast %213 : vector<1x1x192x1xf32> to vector<192x1xf32>
    %cst_163 = arith.constant 0.000000e+00 : f32
    %215 = vector.broadcast %cst_163 : f32 to vector<32x128xf32>
    %c1_i32_164 = arith.constant 1 : i32
    %216 = tpu.dynamic_rotate %212 by %c1_i32_164 dim 1 : vector<32x128xf32>, i32 -> vector<32x128xf32>
    %c0_165 = arith.constant 0 : index
    %c0_166 = arith.constant 0 : index
    %c0_167 = arith.constant 0 : index
    %c0_168 = arith.constant 0 : index
    %217 = vector.load %arg3[%c0_165, %c0_166, %c0_167, %c0_168] : memref<3x3x1x128xf32, #tpu.memory_space<vmem>>, vector<1x1x1x128xf32>
    %218 = vector.shape_cast %217 : vector<1x1x1x128xf32> to vector<1x128xf32>
    %219 = vector.broadcast %218 : vector<1x128xf32> to vector<32x128xf32>
    %220 = arith.mulf %216, %219 : vector<32x128xf32>
    %c0_169 = arith.constant 0 : index
    %c0_170 = arith.constant 0 : index
    %221 = vector.load %arg18[%c0_169, %c0_170] : memref<96x128xf32, #tpu.memory_space<vmem>>, vector<32x128xf32>
    tpu.vector_store %arg18[%c0_169, %c0_170], %220 {strides = array<i32>} : memref<96x128xf32, #tpu.memory_space<vmem>>, vector<32x128xf32>,
    %c32_171 = arith.constant 32 : index
    %c0_172 = arith.constant 0 : index
    %222 = vector.load %arg18[%c32_171, %c0_172] : memref<96x128xf32, #tpu.memory_space<vmem>>, vector<32x128xf32>
    tpu.vector_store %arg18[%c32_171, %c0_172], %212 {strides = array<i32>} : memref<96x128xf32, #tpu.memory_space<vmem>>, vector<32x128xf32>,
    %c127_i32_173 = arith.constant 127 : i32
    %223 = tpu.dynamic_rotate %212 by %c127_i32_173 dim 1 : vector<32x128xf32>, i32 -> vector<32x128xf32>
    %c0_174 = arith.constant 0 : index
    %c2_175 = arith.constant 2 : index
    %c0_176 = arith.constant 0 : index
    %c0_177 = arith.constant 0 : index
    %224 = vector.load %arg3[%c0_174, %c2_175, %c0_176, %c0_177] : memref<3x3x1x128xf32, #tpu.memory_space<vmem>>, vector<1x1x1x128xf32>
    %225 = vector.shape_cast %224 : vector<1x1x1x128xf32> to vector<1x128xf32>
    %226 = vector.broadcast %225 : vector<1x128xf32> to vector<32x128xf32>
    %227 = arith.mulf %223, %226 : vector<32x128xf32>
    %c64_178 = arith.constant 64 : index
    %c0_179 = arith.constant 0 : index
    %228 = vector.load %arg18[%c64_178, %c0_179] : memref<96x128xf32, #tpu.memory_space<vmem>>, vector<32x128xf32>
    tpu.vector_store %arg18[%c64_178, %c0_179], %227 {strides = array<i32>} : memref<96x128xf32, #tpu.memory_space<vmem>>, vector<32x128xf32>,
    %c1_180 = arith.constant 1 : index
    %c0_181 = arith.constant 0 : index
    %c0_182 = arith.constant 0 : index
    %c0_183 = arith.constant 0 : index
    %229 = vector.load %arg10[%c1_180, %c0_181, %c0_182, %c0_183] : memref<2x3x64x96xf32, #tpu.memory_space<vmem>>, vector<1x1x64x96xf32>
    %230 = vector.shape_cast %229 : vector<1x1x64x96xf32> to vector<64x96xf32>
    %c0_184 = arith.constant 0 : index
    %c0_185 = arith.constant 0 : index
    %231 = vector.load %arg18[%c0_184, %c0_185] : memref<96x128xf32, #tpu.memory_space<vmem>>, vector<96x128xf32>
    %cst_186 = arith.constant dense<0.000000e+00> : vector<64x128xf32>
    %232 = tpu.matmul %230, %231, %cst_186 {dimension_numbers = #tpu.dot_dimension_numbers<[1], [0], [0], [1], [0, 0, 1, 1], [], []>} : vector<64x96xf32>, vector<96x128xf32>, vector<64x128xf32> -> vector<64x128xf32>
    %c1_187 = arith.constant 1 : index
    %c0_188 = arith.constant 0 : index
    %c0_189 = arith.constant 0 : index
    %c0_190 = arith.constant 0 : index
    %233 = vector.load %arg11[%c1_187, %c0_188, %c0_189, %c0_190] : memref<2x3x64x1xf32, #tpu.memory_space<vmem>>, vector<1x1x64x1xf32>
    %234 = vector.shape_cast %233 : vector<1x1x64x1xf32> to vector<64x1xf32>
    %235 = vector.broadcast %234 : vector<64x1xf32> to vector<64x128xf32>
    %236 = arith.addf %232, %235 : vector<64x128xf32>
    %237 = vector.extract_strided_slice %214 {offsets = [0, 0], sizes = [64, 1], strides = [1, 1]} : vector<192x1xf32> to vector<64x1xf32>
    %238 = vector.broadcast %237 : vector<64x1xf32> to vector<64x128xf32>
    %239 = arith.addf %236, %238 : vector<64x128xf32>
    %240 = vector.extract_strided_slice %239 {offsets = [0, 0], sizes = [32, 128], strides = [1, 1]} : vector<64x128xf32> to vector<32x128xf32>
    %241 = math.tanh %240 : vector<32x128xf32>
    %242 = vector.extract_strided_slice %239 {offsets = [32, 0], sizes = [32, 128], strides = [1, 1]} : vector<64x128xf32> to vector<32x128xf32>
    %243 = arith.negf %242 : vector<32x128xf32>
    %244 = math.exp %243 : vector<32x128xf32>
    %cst_191 = arith.constant 1.000000e+00 : f32
    %245 = vector.broadcast %cst_191 : f32 to vector<32x128xf32>
    %246 = arith.addf %245, %244 : vector<32x128xf32>
    %247 = arith.divf %245, %246 : vector<32x128xf32>
    %248 = arith.mulf %241, %247 : vector<32x128xf32>
    %c1_192 = arith.constant 1 : index
    %c0_193 = arith.constant 0 : index
    %c0_194 = arith.constant 0 : index
    %c0_195 = arith.constant 0 : index
    %249 = vector.load %arg12[%c1_192, %c0_193, %c0_194, %c0_195] : memref<2x3x64x32xf32, #tpu.memory_space<vmem>>, vector<1x1x64x32xf32>
    %250 = vector.shape_cast %249 : vector<1x1x64x32xf32> to vector<64x32xf32>
    %cst_196 = arith.constant dense<0.000000e+00> : vector<64x128xf32>
    %251 = tpu.matmul %250, %248, %cst_196 {dimension_numbers = #tpu.dot_dimension_numbers<[1], [0], [0], [1], [0, 0, 1, 1], [], []>} : vector<64x32xf32>, vector<32x128xf32>, vector<64x128xf32> -> vector<64x128xf32>
    %c1_197 = arith.constant 1 : index
    %c0_198 = arith.constant 0 : index
    %c0_199 = arith.constant 0 : index
    %c0_200 = arith.constant 0 : index
    %252 = vector.load %arg13[%c1_197, %c0_198, %c0_199, %c0_200] : memref<2x3x64x1xf32, #tpu.memory_space<vmem>>, vector<1x1x64x1xf32>
    %253 = vector.shape_cast %252 : vector<1x1x64x1xf32> to vector<64x1xf32>
    %254 = vector.broadcast %253 : vector<64x1xf32> to vector<64x128xf32>
    %255 = arith.addf %251, %254 : vector<64x128xf32>
    %256 = vector.extract_strided_slice %255 {offsets = [0, 0], sizes = [32, 128], strides = [1, 1]} : vector<64x128xf32> to vector<32x128xf32>
    %257 = arith.addf %212, %256 : vector<32x128xf32>
    %258 = vector.broadcast %3 : vector<1x128xf32> to vector<32x128xf32>
    %259 = arith.mulf %257, %258 : vector<32x128xf32>
    %260 = vector.extract_strided_slice %255 {offsets = [32, 0], sizes = [32, 128], strides = [1, 1]} : vector<64x128xf32> to vector<32x128xf32>
    %261 = arith.addf %215, %260 : vector<32x128xf32>
    %c1_i32_201 = arith.constant 1 : i32
    %262 = tpu.dynamic_rotate %259 by %c1_i32_201 dim 1 : vector<32x128xf32>, i32 -> vector<32x128xf32>
    %c1_202 = arith.constant 1 : index
    %c0_203 = arith.constant 0 : index
    %c0_204 = arith.constant 0 : index
    %c0_205 = arith.constant 0 : index
    %263 = vector.load %arg3[%c1_202, %c0_203, %c0_204, %c0_205] : memref<3x3x1x128xf32, #tpu.memory_space<vmem>>, vector<1x1x1x128xf32>
    %264 = vector.shape_cast %263 : vector<1x1x1x128xf32> to vector<1x128xf32>
    %265 = vector.broadcast %264 : vector<1x128xf32> to vector<32x128xf32>
    %266 = arith.mulf %262, %265 : vector<32x128xf32>
    %c0_206 = arith.constant 0 : index
    %c0_207 = arith.constant 0 : index
    %267 = vector.load %arg18[%c0_206, %c0_207] : memref<96x128xf32, #tpu.memory_space<vmem>>, vector<32x128xf32>
    tpu.vector_store %arg18[%c0_206, %c0_207], %266 {strides = array<i32>} : memref<96x128xf32, #tpu.memory_space<vmem>>, vector<32x128xf32>,
    %c32_208 = arith.constant 32 : index
    %c0_209 = arith.constant 0 : index
    %268 = vector.load %arg18[%c32_208, %c0_209] : memref<96x128xf32, #tpu.memory_space<vmem>>, vector<32x128xf32>
    tpu.vector_store %arg18[%c32_208, %c0_209], %259 {strides = array<i32>} : memref<96x128xf32, #tpu.memory_space<vmem>>, vector<32x128xf32>,
    %c127_i32_210 = arith.constant 127 : i32
    %269 = tpu.dynamic_rotate %259 by %c127_i32_210 dim 1 : vector<32x128xf32>, i32 -> vector<32x128xf32>
    %c1_211 = arith.constant 1 : index
    %c2_212 = arith.constant 2 : index
    %c0_213 = arith.constant 0 : index
    %c0_214 = arith.constant 0 : index
    %270 = vector.load %arg3[%c1_211, %c2_212, %c0_213, %c0_214] : memref<3x3x1x128xf32, #tpu.memory_space<vmem>>, vector<1x1x1x128xf32>
    %271 = vector.shape_cast %270 : vector<1x1x1x128xf32> to vector<1x128xf32>
    %272 = vector.broadcast %271 : vector<1x128xf32> to vector<32x128xf32>
    %273 = arith.mulf %269, %272 : vector<32x128xf32>
    %c64_215 = arith.constant 64 : index
    %c0_216 = arith.constant 0 : index
    %274 = vector.load %arg18[%c64_215, %c0_216] : memref<96x128xf32, #tpu.memory_space<vmem>>, vector<32x128xf32>
    tpu.vector_store %arg18[%c64_215, %c0_216], %273 {strides = array<i32>} : memref<96x128xf32, #tpu.memory_space<vmem>>, vector<32x128xf32>,
    %c1_217 = arith.constant 1 : index
    %c1_218 = arith.constant 1 : index
    %c0_219 = arith.constant 0 : index
    %c0_220 = arith.constant 0 : index
    %275 = vector.load %arg10[%c1_217, %c1_218, %c0_219, %c0_220] : memref<2x3x64x96xf32, #tpu.memory_space<vmem>>, vector<1x1x64x96xf32>
    %276 = vector.shape_cast %275 : vector<1x1x64x96xf32> to vector<64x96xf32>
    %c0_221 = arith.constant 0 : index
    %c0_222 = arith.constant 0 : index
    %277 = vector.load %arg18[%c0_221, %c0_222] : memref<96x128xf32, #tpu.memory_space<vmem>>, vector<96x128xf32>
    %cst_223 = arith.constant dense<0.000000e+00> : vector<64x128xf32>
    %278 = tpu.matmul %276, %277, %cst_223 {dimension_numbers = #tpu.dot_dimension_numbers<[1], [0], [0], [1], [0, 0, 1, 1], [], []>} : vector<64x96xf32>, vector<96x128xf32>, vector<64x128xf32> -> vector<64x128xf32>
    %c1_224 = arith.constant 1 : index
    %c1_225 = arith.constant 1 : index
    %c0_226 = arith.constant 0 : index
    %c0_227 = arith.constant 0 : index
    %279 = vector.load %arg11[%c1_224, %c1_225, %c0_226, %c0_227] : memref<2x3x64x1xf32, #tpu.memory_space<vmem>>, vector<1x1x64x1xf32>
    %280 = vector.shape_cast %279 : vector<1x1x64x1xf32> to vector<64x1xf32>
    %281 = vector.broadcast %280 : vector<64x1xf32> to vector<64x128xf32>
    %282 = arith.addf %278, %281 : vector<64x128xf32>
    %283 = vector.extract_strided_slice %214 {offsets = [64, 0], sizes = [64, 1], strides = [1, 1]} : vector<192x1xf32> to vector<64x1xf32>
    %284 = vector.broadcast %283 : vector<64x1xf32> to vector<64x128xf32>
    %285 = arith.addf %282, %284 : vector<64x128xf32>
    %286 = vector.extract_strided_slice %285 {offsets = [0, 0], sizes = [32, 128], strides = [1, 1]} : vector<64x128xf32> to vector<32x128xf32>
    %287 = math.tanh %286 : vector<32x128xf32>
    %288 = vector.extract_strided_slice %285 {offsets = [32, 0], sizes = [32, 128], strides = [1, 1]} : vector<64x128xf32> to vector<32x128xf32>
    %289 = arith.negf %288 : vector<32x128xf32>
    %290 = math.exp %289 : vector<32x128xf32>
    %cst_228 = arith.constant 1.000000e+00 : f32
    %291 = vector.broadcast %cst_228 : f32 to vector<32x128xf32>
    %292 = arith.addf %291, %290 : vector<32x128xf32>
    %293 = arith.divf %291, %292 : vector<32x128xf32>
    %294 = arith.mulf %287, %293 : vector<32x128xf32>
    %c1_229 = arith.constant 1 : index
    %c1_230 = arith.constant 1 : index
    %c0_231 = arith.constant 0 : index
    %c0_232 = arith.constant 0 : index
    %295 = vector.load %arg12[%c1_229, %c1_230, %c0_231, %c0_232] : memref<2x3x64x32xf32, #tpu.memory_space<vmem>>, vector<1x1x64x32xf32>
    %296 = vector.shape_cast %295 : vector<1x1x64x32xf32> to vector<64x32xf32>
    %cst_233 = arith.constant dense<0.000000e+00> : vector<64x128xf32>
    %297 = tpu.matmul %296, %294, %cst_233 {dimension_numbers = #tpu.dot_dimension_numbers<[1], [0], [0], [1], [0, 0, 1, 1], [], []>} : vector<64x32xf32>, vector<32x128xf32>, vector<64x128xf32> -> vector<64x128xf32>
    %c1_234 = arith.constant 1 : index
    %c1_235 = arith.constant 1 : index
    %c0_236 = arith.constant 0 : index
    %c0_237 = arith.constant 0 : index
    %298 = vector.load %arg13[%c1_234, %c1_235, %c0_236, %c0_237] : memref<2x3x64x1xf32, #tpu.memory_space<vmem>>, vector<1x1x64x1xf32>
    %299 = vector.shape_cast %298 : vector<1x1x64x1xf32> to vector<64x1xf32>
    %300 = vector.broadcast %299 : vector<64x1xf32> to vector<64x128xf32>
    %301 = arith.addf %297, %300 : vector<64x128xf32>
    %302 = vector.extract_strided_slice %301 {offsets = [0, 0], sizes = [32, 128], strides = [1, 1]} : vector<64x128xf32> to vector<32x128xf32>
    %303 = arith.addf %259, %302 : vector<32x128xf32>
    %304 = vector.broadcast %3 : vector<1x128xf32> to vector<32x128xf32>
    %305 = arith.mulf %303, %304 : vector<32x128xf32>
    %306 = vector.extract_strided_slice %301 {offsets = [32, 0], sizes = [32, 128], strides = [1, 1]} : vector<64x128xf32> to vector<32x128xf32>
    %307 = arith.addf %261, %306 : vector<32x128xf32>
    %c1_i32_238 = arith.constant 1 : i32
    %308 = tpu.dynamic_rotate %305 by %c1_i32_238 dim 1 : vector<32x128xf32>, i32 -> vector<32x128xf32>
    %c2_239 = arith.constant 2 : index
    %c0_240 = arith.constant 0 : index
    %c0_241 = arith.constant 0 : index
    %c0_242 = arith.constant 0 : index
    %309 = vector.load %arg3[%c2_239, %c0_240, %c0_241, %c0_242] : memref<3x3x1x128xf32, #tpu.memory_space<vmem>>, vector<1x1x1x128xf32>
    %310 = vector.shape_cast %309 : vector<1x1x1x128xf32> to vector<1x128xf32>
    %311 = vector.broadcast %310 : vector<1x128xf32> to vector<32x128xf32>
    %312 = arith.mulf %308, %311 : vector<32x128xf32>
    %c0_243 = arith.constant 0 : index
    %c0_244 = arith.constant 0 : index
    %313 = vector.load %arg18[%c0_243, %c0_244] : memref<96x128xf32, #tpu.memory_space<vmem>>, vector<32x128xf32>
    tpu.vector_store %arg18[%c0_243, %c0_244], %312 {strides = array<i32>} : memref<96x128xf32, #tpu.memory_space<vmem>>, vector<32x128xf32>,
    %c32_245 = arith.constant 32 : index
    %c0_246 = arith.constant 0 : index
    %314 = vector.load %arg18[%c32_245, %c0_246] : memref<96x128xf32, #tpu.memory_space<vmem>>, vector<32x128xf32>
    tpu.vector_store %arg18[%c32_245, %c0_246], %305 {strides = array<i32>} : memref<96x128xf32, #tpu.memory_space<vmem>>, vector<32x128xf32>,
    %c127_i32_247 = arith.constant 127 : i32
    %315 = tpu.dynamic_rotate %305 by %c127_i32_247 dim 1 : vector<32x128xf32>, i32 -> vector<32x128xf32>
    %c2_248 = arith.constant 2 : index
    %c2_249 = arith.constant 2 : index
    %c0_250 = arith.constant 0 : index
    %c0_251 = arith.constant 0 : index
    %316 = vector.load %arg3[%c2_248, %c2_249, %c0_250, %c0_251] : memref<3x3x1x128xf32, #tpu.memory_space<vmem>>, vector<1x1x1x128xf32>
    %317 = vector.shape_cast %316 : vector<1x1x1x128xf32> to vector<1x128xf32>
    %318 = vector.broadcast %317 : vector<1x128xf32> to vector<32x128xf32>
    %319 = arith.mulf %315, %318 : vector<32x128xf32>
    %c64_252 = arith.constant 64 : index
    %c0_253 = arith.constant 0 : index
    %320 = vector.load %arg18[%c64_252, %c0_253] : memref<96x128xf32, #tpu.memory_space<vmem>>, vector<32x128xf32>
    tpu.vector_store %arg18[%c64_252, %c0_253], %319 {strides = array<i32>} : memref<96x128xf32, #tpu.memory_space<vmem>>, vector<32x128xf32>,
    %c1_254 = arith.constant 1 : index
    %c2_255 = arith.constant 2 : index
    %c0_256 = arith.constant 0 : index
    %c0_257 = arith.constant 0 : index
    %321 = vector.load %arg10[%c1_254, %c2_255, %c0_256, %c0_257] : memref<2x3x64x96xf32, #tpu.memory_space<vmem>>, vector<1x1x64x96xf32>
    %322 = vector.shape_cast %321 : vector<1x1x64x96xf32> to vector<64x96xf32>
    %c0_258 = arith.constant 0 : index
    %c0_259 = arith.constant 0 : index
    %323 = vector.load %arg18[%c0_258, %c0_259] : memref<96x128xf32, #tpu.memory_space<vmem>>, vector<96x128xf32>
    %cst_260 = arith.constant dense<0.000000e+00> : vector<64x128xf32>
    %324 = tpu.matmul %322, %323, %cst_260 {dimension_numbers = #tpu.dot_dimension_numbers<[1], [0], [0], [1], [0, 0, 1, 1], [], []>} : vector<64x96xf32>, vector<96x128xf32>, vector<64x128xf32> -> vector<64x128xf32>
    %c1_261 = arith.constant 1 : index
    %c2_262 = arith.constant 2 : index
    %c0_263 = arith.constant 0 : index
    %c0_264 = arith.constant 0 : index
    %325 = vector.load %arg11[%c1_261, %c2_262, %c0_263, %c0_264] : memref<2x3x64x1xf32, #tpu.memory_space<vmem>>, vector<1x1x64x1xf32>
    %326 = vector.shape_cast %325 : vector<1x1x64x1xf32> to vector<64x1xf32>
    %327 = vector.broadcast %326 : vector<64x1xf32> to vector<64x128xf32>
    %328 = arith.addf %324, %327 : vector<64x128xf32>
    %329 = vector.extract_strided_slice %214 {offsets = [128, 0], sizes = [64, 1], strides = [1, 1]} : vector<192x1xf32> to vector<64x1xf32>
    %330 = vector.broadcast %329 : vector<64x1xf32> to vector<64x128xf32>
    %331 = arith.addf %328, %330 : vector<64x128xf32>
    %332 = vector.extract_strided_slice %331 {offsets = [0, 0], sizes = [32, 128], strides = [1, 1]} : vector<64x128xf32> to vector<32x128xf32>
    %333 = math.tanh %332 : vector<32x128xf32>
    %334 = vector.extract_strided_slice %331 {offsets = [32, 0], sizes = [32, 128], strides = [1, 1]} : vector<64x128xf32> to vector<32x128xf32>
    %335 = arith.negf %334 : vector<32x128xf32>
    %336 = math.exp %335 : vector<32x128xf32>
    %cst_265 = arith.constant 1.000000e+00 : f32
    %337 = vector.broadcast %cst_265 : f32 to vector<32x128xf32>
    %338 = arith.addf %337, %336 : vector<32x128xf32>
    %339 = arith.divf %337, %338 : vector<32x128xf32>
    %340 = arith.mulf %333, %339 : vector<32x128xf32>
    %c1_266 = arith.constant 1 : index
    %c2_267 = arith.constant 2 : index
    %c0_268 = arith.constant 0 : index
    %c0_269 = arith.constant 0 : index
    %341 = vector.load %arg12[%c1_266, %c2_267, %c0_268, %c0_269] : memref<2x3x64x32xf32, #tpu.memory_space<vmem>>, vector<1x1x64x32xf32>
    %342 = vector.shape_cast %341 : vector<1x1x64x32xf32> to vector<64x32xf32>
    %cst_270 = arith.constant dense<0.000000e+00> : vector<64x128xf32>
    %343 = tpu.matmul %342, %340, %cst_270 {dimension_numbers = #tpu.dot_dimension_numbers<[1], [0], [0], [1], [0, 0, 1, 1], [], []>} : vector<64x32xf32>, vector<32x128xf32>, vector<64x128xf32> -> vector<64x128xf32>
    %c1_271 = arith.constant 1 : index
    %c2_272 = arith.constant 2 : index
    %c0_273 = arith.constant 0 : index
    %c0_274 = arith.constant 0 : index
    %344 = vector.load %arg13[%c1_271, %c2_272, %c0_273, %c0_274] : memref<2x3x64x1xf32, #tpu.memory_space<vmem>>, vector<1x1x64x1xf32>
    %345 = vector.shape_cast %344 : vector<1x1x64x1xf32> to vector<64x1xf32>
    %346 = vector.broadcast %345 : vector<64x1xf32> to vector<64x128xf32>
    %347 = arith.addf %343, %346 : vector<64x128xf32>
    %348 = vector.extract_strided_slice %347 {offsets = [32, 0], sizes = [32, 128], strides = [1, 1]} : vector<64x128xf32> to vector<32x128xf32>
    %349 = arith.addf %307, %348 : vector<32x128xf32>
    %350 = vector.broadcast %3 : vector<1x128xf32> to vector<32x128xf32>
    %351 = arith.mulf %349, %350 : vector<32x128xf32>
    %c1_275 = arith.constant 1 : index
    %c0_276 = arith.constant 0 : index
    %c0_277 = arith.constant 0 : index
    %352 = vector.load %arg14[%c1_275, %c0_276, %c0_277] : memref<2x16x32xf32, #tpu.memory_space<vmem>>, vector<1x16x32xf32>
    %353 = vector.shape_cast %352 : vector<1x16x32xf32> to vector<16x32xf32>
    %cst_278 = arith.constant dense<0.000000e+00> : vector<16x128xf32>
    %354 = tpu.matmul %353, %351, %cst_278 {dimension_numbers = #tpu.dot_dimension_numbers<[1], [0], [0], [1], [0, 0, 1, 1], [], []>} : vector<16x32xf32>, vector<32x128xf32>, vector<16x128xf32> -> vector<16x128xf32>
    %c1_279 = arith.constant 1 : index
    %c0_280 = arith.constant 0 : index
    %c0_281 = arith.constant 0 : index
    %355 = vector.load %arg15[%c1_279, %c0_280, %c0_281] : memref<2x16x1xf32, #tpu.memory_space<vmem>>, vector<1x16x1xf32>
    %356 = vector.shape_cast %355 : vector<1x16x1xf32> to vector<16x1xf32>
    %357 = vector.broadcast %356 : vector<16x1xf32> to vector<16x128xf32>
    %358 = arith.addf %354, %357 : vector<16x128xf32>
    %359 = vector.extract_strided_slice %358 {offsets = [0, 0], sizes = [8, 128], strides = [1, 1]} : vector<16x128xf32> to vector<8x128xf32>
    %360 = vector.extract_strided_slice %358 {offsets = [8, 0], sizes = [8, 128], strides = [1, 1]} : vector<16x128xf32> to vector<8x128xf32>
    %361 = math.exp %360 : vector<8x128xf32>
    %362 = arith.mulf %361, %203 : vector<8x128xf32>
    %363 = arith.addf %359, %362 : vector<8x128xf32>
    %364 = vector.broadcast %3 : vector<1x128xf32> to vector<8x128xf32>
    %365 = arith.mulf %363, %364 : vector<8x128xf32>
    %366 = vector.broadcast %3 : vector<1x128xf32> to vector<8x128xf32>
    %367 = arith.mulf %360, %366 : vector<8x128xf32>
    %cst_282 = arith.constant dense<0.000000e+00> : vector<128xf32>
    %368 = vector.multi_reduction <add>, %367, %cst_282 [0] : vector<8x128xf32> to vector<128xf32>
    %369 = vector.shape_cast %368 : vector<128xf32> to vector<1x128xf32>
    %370 = arith.addf %188, %369 : vector<1x128xf32>
    %c0_283 = arith.constant 0 : index
    %c0_284 = arith.constant 0 : index
    %c0_285 = arith.constant 0 : index
    %371 = vector.load %arg16[%c0_283, %c0_284, %c0_285] : memref<1x16x128xf32, #tpu.memory_space<vmem>>, vector<1x8x128xf32>
    %372 = vector.shape_cast %371 : vector<1x8x128xf32> to vector<8x128xf32>
    %373 = vector.shape_cast %202 : vector<8x128xf32> to vector<1x8x128xf32>
    tpu.vector_store %arg16[%c0_283, %c0_284, %c0_285], %373 {strides = array<i32>} : memref<1x16x128xf32, #tpu.memory_space<vmem>>, vector<1x8x128xf32>,
    %c0_286 = arith.constant 0 : index
    %c8 = arith.constant 8 : index
    %c0_287 = arith.constant 0 : index
    %374 = vector.load %arg16[%c0_286, %c8, %c0_287] : memref<1x16x128xf32, #tpu.memory_space<vmem>>, vector<1x8x128xf32>
    %375 = vector.shape_cast %374 : vector<1x8x128xf32> to vector<8x128xf32>
    %376 = vector.shape_cast %365 : vector<8x128xf32> to vector<1x8x128xf32>
    tpu.vector_store %arg16[%c0_286, %c8, %c0_287], %376 {strides = array<i32>} : memref<1x16x128xf32, #tpu.memory_space<vmem>>, vector<1x8x128xf32>,
    %cst_288 = arith.constant dense<0.000000e+00> : vector<1xf32>
    %377 = vector.multi_reduction <add>, %370, %cst_288 [1] : vector<1x128xf32> to vector<1xf32>
    %378 = vector.shape_cast %377 : vector<1xf32> to vector<1x1xf32>
    %c0_289 = arith.constant 0 : index
    %c0_290 = arith.constant 0 : index
    %c0_291 = arith.constant 0 : index
    %379 = vector.load %arg17[%c0_289, %c0_290, %c0_291] : memref<1x1x1xf32, #tpu.memory_space<vmem>>, vector<1x1x1xf32>
    %380 = vector.shape_cast %379 : vector<1x1x1xf32> to vector<1x1xf32>
    %381 = vector.shape_cast %378 : vector<1x1xf32> to vector<1x1x1xf32>
    tpu.vector_store %arg17[%c0_289, %c0_290, %c0_291], %381 {strides = array<i32>} : memref<1x1x1xf32, #tpu.memory_space<vmem>>, vector<1x1x1xf32>,
    return
  }
  func.func @transform_0(%arg0: i32) -> (i32, i32, i32) {
    %c0_i32 = arith.constant 0 : i32
    %c0_i32_0 = arith.constant 0 : i32
    %c0_i32_1 = arith.constant 0 : i32
    return %arg0, %c0_i32, %c0_i32_0 : i32, i32, i32
  }
  func.func @transform_1(%arg0: i32) -> (i32, i32, i32) {
    %c0_i32 = arith.constant 0 : i32
    %c0_i32_0 = arith.constant 0 : i32
    %c0_i32_1 = arith.constant 0 : i32
    return %arg0, %c0_i32, %c0_i32_0 : i32, i32, i32
  }
  func.func @transform_2(%arg0: i32) -> (i32, i32, i32, i32) {
    %c0_i32 = arith.constant 0 : i32
    %c0_i32_0 = arith.constant 0 : i32
    %c0_i32_1 = arith.constant 0 : i32
    %c0_i32_2 = arith.constant 0 : i32
    %c0_i32_3 = arith.constant 0 : i32
    return %c0_i32, %c0_i32_0, %c0_i32_1, %c0_i32_2 : i32, i32, i32, i32
  }
  func.func @transform_3(%arg0: i32) -> (i32, i32, i32, i32) {
    %c0_i32 = arith.constant 0 : i32
    %c0_i32_0 = arith.constant 0 : i32
    %c0_i32_1 = arith.constant 0 : i32
    %c0_i32_2 = arith.constant 0 : i32
    return %arg0, %c0_i32, %c0_i32_0, %c0_i32_1 : i32, i32, i32, i32
  }
  func.func @transform_4(%arg0: i32) -> (i32, i32, i32) {
    %c0_i32 = arith.constant 0 : i32
    %c0_i32_0 = arith.constant 0 : i32
    %c0_i32_1 = arith.constant 0 : i32
    %c0_i32_2 = arith.constant 0 : i32
    return %c0_i32, %c0_i32_0, %c0_i32_1 : i32, i32, i32
  }
  func.func @transform_5(%arg0: i32) -> (i32, i32, i32) {
    %c0_i32 = arith.constant 0 : i32
    %c0_i32_0 = arith.constant 0 : i32
    %c0_i32_1 = arith.constant 0 : i32
    %c0_i32_2 = arith.constant 0 : i32
    return %c0_i32, %c0_i32_0, %c0_i32_1 : i32, i32, i32
  }
  func.func @transform_6(%arg0: i32) -> (i32, i32, i32) {
    %c0_i32 = arith.constant 0 : i32
    %c0_i32_0 = arith.constant 0 : i32
    %c0_i32_1 = arith.constant 0 : i32
    %c0_i32_2 = arith.constant 0 : i32
    return %c0_i32, %c0_i32_0, %c0_i32_1 : i32, i32, i32
  }
  func.func @transform_7(%arg0: i32) -> (i32, i32, i32) {
    %c0_i32 = arith.constant 0 : i32
    %c0_i32_0 = arith.constant 0 : i32
    %c0_i32_1 = arith.constant 0 : i32
    %c0_i32_2 = arith.constant 0 : i32
    return %c0_i32, %c0_i32_0, %c0_i32_1 : i32, i32, i32
  }
  func.func @transform_8(%arg0: i32) -> (i32, i32, i32) {
    %c0_i32 = arith.constant 0 : i32
    %c0_i32_0 = arith.constant 0 : i32
    %c0_i32_1 = arith.constant 0 : i32
    %c0_i32_2 = arith.constant 0 : i32
    return %c0_i32, %c0_i32_0, %c0_i32_1 : i32, i32, i32
  }
  func.func @transform_9(%arg0: i32) -> (i32, i32, i32, i32) {
    %c0_i32 = arith.constant 0 : i32
    %c0_i32_0 = arith.constant 0 : i32
    %c0_i32_1 = arith.constant 0 : i32
    %c0_i32_2 = arith.constant 0 : i32
    %c0_i32_3 = arith.constant 0 : i32
    return %c0_i32, %c0_i32_0, %c0_i32_1, %c0_i32_2 : i32, i32, i32, i32
  }
  func.func @transform_10(%arg0: i32) -> (i32, i32, i32, i32) {
    %c0_i32 = arith.constant 0 : i32
    %c0_i32_0 = arith.constant 0 : i32
    %c0_i32_1 = arith.constant 0 : i32
    %c0_i32_2 = arith.constant 0 : i32
    %c0_i32_3 = arith.constant 0 : i32
    return %c0_i32, %c0_i32_0, %c0_i32_1, %c0_i32_2 : i32, i32, i32, i32
  }
  func.func @transform_11(%arg0: i32) -> (i32, i32, i32, i32) {
    %c0_i32 = arith.constant 0 : i32
    %c0_i32_0 = arith.constant 0 : i32
    %c0_i32_1 = arith.constant 0 : i32
    %c0_i32_2 = arith.constant 0 : i32
    %c0_i32_3 = arith.constant 0 : i32
    return %c0_i32, %c0_i32_0, %c0_i32_1, %c0_i32_2 : i32, i32, i32, i32
  }
  func.func @transform_12(%arg0: i32) -> (i32, i32, i32, i32) {
    %c0_i32 = arith.constant 0 : i32
    %c0_i32_0 = arith.constant 0 : i32
    %c0_i32_1 = arith.constant 0 : i32
    %c0_i32_2 = arith.constant 0 : i32
    %c0_i32_3 = arith.constant 0 : i32
    return %c0_i32, %c0_i32_0, %c0_i32_1, %c0_i32_2 : i32, i32, i32, i32
  }
  func.func @transform_13(%arg0: i32) -> (i32, i32, i32) {
    %c0_i32 = arith.constant 0 : i32
    %c0_i32_0 = arith.constant 0 : i32
    %c0_i32_1 = arith.constant 0 : i32
    %c0_i32_2 = arith.constant 0 : i32
    return %c0_i32, %c0_i32_0, %c0_i32_1 : i32, i32, i32
  }
  func.func @transform_14(%arg0: i32) -> (i32, i32, i32) {
    %c0_i32 = arith.constant 0 : i32
    %c0_i32_0 = arith.constant 0 : i32
    %c0_i32_1 = arith.constant 0 : i32
    %c0_i32_2 = arith.constant 0 : i32
    return %c0_i32, %c0_i32_0, %c0_i32_1 : i32, i32, i32
  }
  func.func @transform_15(%arg0: i32) -> (i32, i32, i32) {
    %c0_i32 = arith.constant 0 : i32
    %c0_i32_0 = arith.constant 0 : i32
    %c0_i32_1 = arith.constant 0 : i32
    return %arg0, %c0_i32, %c0_i32_0 : i32, i32, i32
  }
  func.func @transform_16(%arg0: i32) -> (i32, i32, i32) {
    %c0_i32 = arith.constant 0 : i32
    %c0_i32_0 = arith.constant 0 : i32
    %c0_i32_1 = arith.constant 0 : i32
    return %arg0, %c0_i32, %c0_i32_0 : i32, i32, i32
  }
}

</mosaic_0001>

<bundles_post_ra>
// kernel: custom-call.2
= control target key start
LH: loop header
LB: loop body
LE: loop exit
PB: predicated region body
PF: predicated region fallthrough
CT: control target
= control target key end

     0   :  { %5 = vsyncpa [#allocation6], 0  ;;  %s942_s0 = inlined_call_operand.vmem [shape: f32[2,4,4], index: 0, kind: input, shape index: {}]   ;;  %s943_s1 = inlined_call_operand.vmem [shape: f32[2,4,4], index: 1, kind: output, shape index: {0}]   ;;  %s944_s2 = inlined_call_operand.hbm [shape: s32[2,4], index: 2, kind: output, shape index: {1}]   ;;  %s945_s3 = inlined_call_operand.hbm [shape: s32[2,4], index: 3, kind: output, shape index: {2}]  }
   0x1   :  { %7 = vsyncpa [#allocation6 + $0x1], 0 }
   0x2   :  { %8 = vsyncpa [#allocation9], 0 }
   0x3   :  { %10 = vsyncpa [#allocation9 + $0x1], 0  ;;  %s739_s12 = smov 0   ;;  %s741_s13 = smov 0  }
   0x4   :  { %s743_s14 = smov 0   ;;  %s745_s15 = smov 0  }
   0x5 LB: > { %s760_s16 = sadd.s32 4294967295, %s710_s15   ;;  %s536_s17 = sadd.s32 4294967294, %s710_s15   ;;  %s710_s15 = sphi %s745_s15, %s951_s15   ;;  %s706_s14 = sphi %s743_s14, %s950_s14   ;;  %s702_s13 = sphi %s741_s13, %s949_s13   ;;  %s698_s12 = sphi %s739_s12, %s948_s12  }
   0x6   : > { %s764_s18 = sadd.s32 1, %s710_s15   ;;  %s20_s19 = sshrl.u32 %s710_s15, 3 }
   0x7   : > { %s21_s20 = sshrl.u32 %s764_s18, 3  ;;  %s25_s21 = sadd.s32 1, %s706_s14 }
   0x8   : > { %s22_s22 = ssub.s32 %s20_s19, %s21_s20  ;;  %p35_p0 = scmp.ne.s32.totalorder %s706_s14, %s702_s13 }
   0x9   : > { %p23_p1 = scmp.eq.s32.totalorder %s22_s22, 0  ;;  %p36_p2 = scmp.eq.s32.totalorder %s760_s16, 1 }
   0xa   : > { %p41_p3 = scmp.ne.s32.totalorder %s702_s13, %s698_s12  ;;  %p42_p4 = scmp.eq.s32.totalorder %s536_s17, 1 }
   0xb   : > { %s775_s23 = scalar_select %p23_p1, %s706_s14, %s25_s21  }
   0xc   : > { %p777_p5 = por %p36_p2, %p35_p0  ;;  %p781_p6 = por %p42_p4, %p41_p3 }
   0xd   : > { %p538_p7 = scmp.ge.s32.totalorder %s710_s15, 2 }
   0xe   : > { %s88_s26 = sand.u32 (!%p538_p7), 1, %s710_s15   ;;  %s540_s27 = sshll.u32 (!%p538_p7), %s710_s15, 2 }
   0xf   : > { %86 = sbr.rel (%p538_p7) target bundleno = 22 (0x16), region = 16  ;;  %s539_s28 = sshll.u32 (!%p538_p7), %s88_s26, 2 }
  0x10   : > { %s92_s4 = scalar_lea.vmem (!%p538_p7), %s942_s0, %s540_s27  ;;  %s90_s5 = scalar_lea.vmem (!%p538_p7), [#allocation1], %s539_s28 }
  0x11   : > { %v108_v0 = vld [vmem:[%s92_s4] sm:$0xf] (!%p538_p7) }
  0x12   : > { %109 = vst [vmem:[%s90_s5] sm:$0xf] (!%p538_p7), %v108_v0 }
  0x16 PF: > { %p541_p8 = scmp.ge.s32.totalorder %s710_s15, 1  ;;  %p125_p9 = scmp.lt.s32.totalorder %s710_s15, 3 }
  0x18   : > { %p126_p10 = pnand %p541_p8, %p125_p9 }
  0x1a   : > { %129 = sbr.rel (%p126_p10) target bundleno = 456 (0x1c8), region = 50 }
  0x21   : > { %s136_s6 = sand.u32 1, %s760_s16   ;;  %s797_s7 = sand.u32 1, %s702_s13   ;;  %v170_v1 = vlaneseq  ;;  %v716_v4 = vmov 0  }
  0x22   : > { %s799_s8 = sshll.u32 %s136_s6, 2  ;;  %s544_s9 = sshll.u32 %s797_s7, 1 }
  0x23   : > { %v803_v2 = vshrl.u32 %v170_v1, 7  ;;  %s138_s10 = scalar_lea.vmem [#allocation1], %s799_s8  ;;  %s165_s11 = sand.u32 7, %s760_s16  }
  0x24   : > { %v159_v3 = vld [vmem:[%s138_s10] sm:$0xf]  ;;  %s808_s17 = scalar_lea.vmem [#allocation4], %s165_s11  ;;  %s142_s19 = scalar_lea.vmem [#allocation3], %s799_s8 }
  0x25   : > { %160 = vst [vmem:[#allocation0] sm:$0xf] %v159_v3  ;;  %174 = vst [vmem:[#allocation10] sm:$0xff] %v803_v2  ;;  %s812_s20 = scalar_lea.vmem [#allocation5], %s544_s9  ;;  %s814_s21 = scalar_lea.vmem [#allocation8], %s544_s9 }
  0x26   : > { %169 = vst [vmem:[%s808_s17] sm:$0x1] %v716_v4  ;;  %s816_s22 = scalar_lea.vmem [#allocation7], %s165_s11  ;;  %s818_s26 = smov 0  }
  0x2c   : > { %v163_v5 = vld [vmem:[#allocation0] sm:$0xff] }
  0x2d   : > { %164 = vst [vmem:[#allocation2] sm:$0xff] %v163_v5 }
  0x2e LB: >> { %vm190_vm0 = vcmp.lt.s32.totalorder %v803_v2, 4  ;;  %v825_v8 = vstv %s714_s26  ;;  %s231_s27 = ssub.s32 128, %s714_s26  ;;  %v237_v38 = vand.u32 127, %v170_v1  ;;  %v240_v40 = vld [vmem:[%s808_s17] ss:$0 sm:$0xff]  ;;  %s243_s28 = scalar_lea.vmem [#allocation2], %s714_s26  ;;  %s714_s26 = sphi %s818_s26, %s180_s26  }
  0x2f   : >> { %vm189_vm1 = vcmp.ge.s32.totalorder %v803_v2, %v825_v8  ;;  %s249_s30 = scalar_lea.vmem [#allocation10], %s714_s26  ;;  %vm269_vm15 = vcmp.gt.s32.totalorder %v803_v2, %v825_v8  ;;  %s180_s26 = sadd.s32 1, %s714_s26  }
  0x30   : >> { %vm191_vm3 = vmand %vm189_vm1, %vm190_vm0  ;;  %vm261_vm12 = vcmp.gt.s32.totalorder %v237_v38, %v825_v8  ;;  %vm238_vm13 = vcmp.eq.s32.totalorder %v237_v38, %v825_v8  ;;  %v251_v42 = vld [vmem:[%s249_s30] ss:$0 sm:$0xff]  ;;  %p177_p11 = scmp.ge.s32.totalorder %s180_s26, 4  }
  0x31   : >> { %vm273_vm1 = vmand %vm269_vm15, %vm238_vm13  ;;  %s550_s6 = sshll.u32 (%p177_p11), %s760_s16, 2  ;;  %s397_s9 = sshrl.u32 (%p177_p11), %s760_s16, 3 }
  0x32   : > { %s857_s10 = sshll.u32 (%p177_p11), %s397_s9, 5  ;;  %s404_s11 = sshll.u32 (%p177_p11), %s812_s20, 4  ;;  %s405_s11 = int_to_ptr.vmem [resolvable:$true] %s404_s11 }
  0x34   : >> { %v185_v6 = vld [vmem:[#allocation2] sm:$0xff]  ;;  %v245_v41 = vld [vmem:[%s243_s28] ss:$0 sm:$0xff] }
  0x35   : >> { %v186_v7 = vand.u32 2147483647, %v185_v6 }
  0x37   : >> { %vm546_vm2 = vcmp.gt.f32.partialorder %v186_v7, -inf }
  0x38   : >> { %vm193_vm4 = vmand %vm191_vm3, %vm546_vm2 }
  0x39   : >> { %v194_v9 = vsel %vm193_vm4, %v803_v2, %v825_v8  ;;  %v195_v10 = vsel %vm193_vm4, %v186_v7, -inf }
  0x3a   : >> { %v196_v11 = vrot.slane %v195_v10, 1  ;;  %v197_v12 = vrot.slane %v194_v9, 1 }
  0x3c   : >> { %vm198_vm5 = vcmp.ge.f32.partialorder %v196_v11, %v195_v10  ;;  %v201_v13 = vrot.slane %v196_v11, 1  ;;  %v202_v14 = vrot.slane %v197_v12, 1 }
  0x3d   : >> { %v199_v15 = vsel %vm198_vm5, %v196_v11, %v195_v10  ;;  %v200_v16 = vsel %vm198_vm5, %v197_v12, %v194_v9 }
  0x3e   : >> { %vm203_vm6 = vcmp.ge.f32.partialorder %v201_v13, %v199_v15  ;;  %v206_v17 = vrot.slane %v201_v13, 1  ;;  %v207_v18 = vrot.slane %v202_v14, 1 }
  0x3f   : >> { %v204_v19 = vsel %vm203_vm6, %v201_v13, %v199_v15  ;;  %v205_v20 = vsel %vm203_vm6, %v202_v14, %v200_v16 }
  0x40   : >> { %vm208_vm7 = vcmp.ge.f32.partialorder %v206_v17, %v204_v19  ;;  %v211_v21 = vrot.slane %v206_v17, 1  ;;  %v212_v22 = vrot.slane %v207_v18, 1 }
  0x41   : >> { %v209_v23 = vsel %vm208_vm7, %v206_v17, %v204_v19  ;;  %v210_v24 = vsel %vm208_vm7, %v207_v18, %v205_v20 }
  0x42   : >> { %vm213_vm8 = vcmp.ge.f32.partialorder %v211_v21, %v209_v23  ;;  %v216_v25 = vrot.slane %v211_v21, 1  ;;  %v217_v26 = vrot.slane %v212_v22, 1 }
  0x43   : >> { %v214_v27 = vsel %vm213_vm8, %v211_v21, %v209_v23  ;;  %v215_v28 = vsel %vm213_vm8, %v212_v22, %v210_v24 }
  0x44   : >> { %vm218_vm9 = vcmp.ge.f32.partialorder %v216_v25, %v214_v27  ;;  %v221_v29 = vrot.slane %v216_v25, 1  ;;  %v222_v30 = vrot.slane %v217_v26, 1 }
  0x45   : >> { %v219_v31 = vsel %vm218_vm9, %v216_v25, %v214_v27  ;;  %v220_v32 = vsel %vm218_vm9, %v217_v26, %v215_v28 }
  0x46   : >> { %vm223_vm10 = vcmp.ge.f32.partialorder %v221_v29, %v219_v31  ;;  %v226_v33 = vrot.slane %v221_v29, 1  ;;  %v227_v34 = vrot.slane %v222_v30, 1 }
  0x47   : >> { %v224_v35 = vsel %vm223_vm10, %v221_v29, %v219_v31  ;;  %v225_v36 = vsel %vm223_vm10, %v222_v30, %v220_v32 }
  0x48   : >> { %vm228_vm11 = vcmp.ge.f32.partialorder %v226_v33, %v224_v35 }
  0x49   : >> { %v230_v37 = vsel %vm228_vm11, %v227_v34, %v225_v36 }
  0x4a   : >> { %232 = vrot.lane.b32.xlu0 %v230_v37, %s231_s27  ;;  %s864_s27 = scalar_lea.hbm (%p177_p11), %s944_s2, %s857_s10 }
  0xbc   : >> { %v233_v39 = vpop.permute.xlu0 %232 }
  0xbd   : >> { %555 = vpush %v233_v39 }
  0xee   : >> { %s556_s29 = spop %555 }
  0xef   : >> { %v239_v43 = vstv %s556_s29  ;;  %s244_s4 = scalar_lea.vmem [#allocation2], %s556_s29  ;;  %s250_s5 = scalar_lea.vmem [#allocation10], %s556_s29 }
  0xf0   : >> { %v246_v44 = vld [vmem:[%s244_s4] ss:$0 sm:$0xff]  ;;  %v241_v46 = vsel %vm238_vm13, %v239_v43, %v240_v40  ;;  %s612_s29 = scalar_lea.vmem (%p177_p11), %s405_s11, 32 }
  0xf1   : >> { %v252_v45 = vld [vmem:[%s250_s5] ss:$0 sm:$0xff]  ;;  %247 = vst [vmem:[%s244_s4] sm:$0x1] %v245_v41  ;;  %vm255_vm14 = vcmp.ne.f32.partialorder %v246_v44, 0.0  ;;  %242 = vst [vmem:[%s808_s17] sm:$0x1] %v241_v46  ;;  %v262_v53 = vsel %vm261_vm12, %v246_v44, 0.0  ;;  %p613_p12 = scmp.ne.s32.totalorder (%p177_p11), %s405_s11, %s612_s29 }
  0xf2   : >> { %253 = vst [vmem:[%s250_s5] sm:$0x1] %v251_v42  ;;  %248 = vst [vmem:[%s243_s28] sm:$0x1] %v246_v44  ;;  %s352_s28 = scalar_lea.sflag (%p177_p11), [#allocation6], %s797_s7 }
  0xf3   : >> { %254 = vst [vmem:[%s249_s30] sm:$0x1] %v252_v45  ;;  %vm256_vm0 = vmand %vm238_vm13, %vm255_vm14  ;;  %p614_p13 = pnand (%p177_p11), %p613_p12, %p777_p5  ;;  %s717_s30 = smov (%p177_p11), [#allocation5]  }
  0xf4   : >> { %v257_v47 = vsel %vm256_vm0, %v246_v44, 1.0  ;;  %s616_s4 = sshll.u32 (%p177_p11), %s717_s30, 4  ;;  %s617_s4 = int_to_ptr.vmem [resolvable:$false] %s616_s4 }
  0xf5   : >> { %v270_v48 = vsel %vm269_vm15, %v257_v47, 1.0  ;;  %p615_p0 = pneg (%p177_p11), %p614_p13  ;;  %s618_s5 = scalar_lea.vmem (%p177_p11), %s617_s4, 64 }
  0xf6   : >> { %610 = vrcp.f32 %v270_v48  ;;  %p619_p1 = scmp.lt.s32.totalorder (%p177_p11), %s405_s11, %s617_s4  ;;  %p620_p2 = scmp.lt.s32.totalorder (%p177_p11), %s618_s5, %s612_s29 }
  0xf8   : > { %v338_v59 = vld [vmem:[#allocation4] sm:$0x3] (%p177_p11)  ;;  %p621_p3 = por (%p177_p11), %p620_p2, %p619_p1 }
  0xf9   : >> { %v266_v50 = vld [vmem:[#allocation2] sm:$0xff]  ;;  %340 = vst [vmem:[%s812_s20] sm:$0x3] (%p177_p11), %v338_v59 }
  0xfa   : > { %v280_v57 = vld [vmem:[#allocation10] sm:$0xff] (%p177_p11)  ;;  %p622_p4 = pnand (%p177_p11), %p621_p3, %p615_p0 }
 0x100   : >> { %v611_v49 = vpop.eup %610 }
 0x101   : >> { %v272_v51 = vmul.f32 %v611_v49, %v266_v50 }
 0x103   : >> { %v274_v52 = vsel %vm273_vm1, %v272_v51, 0.0 }
 0x104   : >> { %275 = vadd.xlane.f32.xlu0 %v274_v52 }
 0x131   : > { %296 = vxpose.xlu0.b32.start.end [1/1] (short) (narrow) (%p177_p11), %v280_v57, 8 }
 0x190   : > { %179 = sbr.rel (!%p177_p11) target bundleno = 46 (0x2e), region = 173 }
 0x191   : >> { %v276_v54 = vpop.xlane.xlu0 %275 }
 0x192   : >> { %v277_v55 = vmul.f32 %v276_v54, %v262_v53 }
 0x194   : >> { %v278_v56 = vsub.f32 %v272_v51, %v277_v55 }
 0x196   : >> { %279 = vst [vmem:[#allocation2] sm:$0xff] %v278_v56 }
 0x19d   : > { %v332_v58 = vld [vmem:[#allocation2] sm:$0xf] }
 0x19e   : > { %334 = vst [vmem:[%s142_s19] sm:$0xf] %v332_v58 }
 0x19f   : > { %625 = shalt.err (!%p622_p4)
}
 0x1a0   : > { %s626_s20 = scalar_lea.hbm %s864_s27, 32  ;;  %s630_s26 = scalar_lea.hbm %s944_s2, 32 }
 0x1a1   : > { %p627_p8 = scmp.ne.s32.totalorder %s864_s27, %s626_s20  ;;  %p631_p11 = scmp.lt.u32.totalorder %s864_s27, %s944_s2 }
 0x1a2   : > { %p632_p12 = scmp.lt.u32.totalorder %s630_s26, %s626_s20  ;;  %p634_p0 = scmp.lt.u32.totalorder %s626_s20, %s864_s27 }
 0x1a3   : > { %p628_p9 = pnand %p627_p8, %p777_p5 }
 0x1a4   : > { %p633_p13 = por %p632_p12, %p631_p11 }
 0x1a5   : > { %p629_p10 = pneg %p628_p9 }
 0x1a6   : > { %p635_p1 = por %p634_p0, %p633_p13 }
 0x1a8   : > { %p636_p2 = pnand %p635_p1, %p629_p10 }
 0x1aa   : > { %639 = shalt.err (!%p636_p2)
}
 0x1ab   : > { %557 = dma.vmem_to_hbm [thread:$0]  (%p777_p5), %s405_s11, 32, %s864_s27, %s352_s28   ;;  %v378_v60 = vld [vmem:[%s142_s19] sm:$0xf] }
 0x1ac   : > { %s362_s20 = scalar_lea.vmem %s943_s1, %s550_s6  ;;  %s418_s9 = sshll.u32 %s814_s21, 4  ;;  %s899_s9 = int_to_ptr.vmem [resolvable:$true] %s418_s9 }
 0x1ad   : > { %379 = vst [vmem:[%s362_s20] sm:$0xf] %v378_v60  ;;  %s897_s30 = scalar_lea.hbm %s945_s3, %s857_s10  ;;  %s357_s16 = scalar_lea.sflag [#allocation9], %s797_s7 }
 0x1ae   : > { %s640_s6 = scalar_lea.vmem %s899_s9, 32  ;;  %s718_s8 = smov [#allocation8]  }
 0x1af   : > { %p641_p3 = scmp.ne.s32.totalorder %s899_s9, %s640_s6  ;;  %s644_s19 = sshll.u32 %s718_s8, 4  ;;  %s645_s19 = int_to_ptr.vmem [resolvable:$false] %s644_s19 }
 0x1b0   : > { %p647_p9 = scmp.lt.s32.totalorder %s899_s9, %s645_s19 }
 0x1b1   : > { %v312_v61 = vpop.trf.xlu0  ;;  %p642_p4 = pnand %p641_p3, %p777_p5 }
 0x1b2   : > { %328 = vst [vmem:[%s816_s22] sm:$0x1] %v312_v61  ;;  %s646_s22 = scalar_lea.vmem %s645_s19, 64 }
 0x1b3   : > { %p643_p8 = pneg %p642_p4  ;;  %p648_p10 = scmp.lt.s32.totalorder %s646_s22, %s640_s6 }
 0x1b5   : > { %p649_p11 = por %p648_p10, %p647_p9 }
 0x1b7   : > { %p650_p12 = pnand %p649_p11, %p643_p8 }
 0x1b9   : > { %v344_v62 = vld [vmem:[#allocation7] sm:$0x3] }
 0x1ba   : > { %346 = vst [vmem:[%s814_s21] sm:$0x3] %v344_v62 }
 0x1bb   : > { %653 = shalt.err (!%p650_p12)
}
 0x1bc   : > { %s654_s7 = scalar_lea.hbm %s897_s30, 32  ;;  %s658_s11 = scalar_lea.hbm %s945_s3, 32 }
 0x1bd   : > { %p655_p13 = scmp.ne.s32.totalorder %s897_s30, %s654_s7  ;;  %p659_p2 = scmp.lt.u32.totalorder %s897_s30, %s945_s3 }
 0x1be   : > { %p660_p3 = scmp.lt.u32.totalorder %s658_s11, %s654_s7  ;;  %p662_p8 = scmp.lt.u32.totalorder %s654_s7, %s897_s30 }
 0x1bf   : > { %p656_p0 = pnand %p655_p13, %p777_p5 }
 0x1c0   : > { %p661_p4 = por %p660_p3, %p659_p2 }
 0x1c1   : > { %p657_p1 = pneg %p656_p0 }
 0x1c2   : > { %p663_p9 = por %p662_p8, %p661_p4 }
 0x1c4   : > { %p664_p10 = pnand %p663_p9, %p657_p1 }
 0x1c6   : > { %667 = shalt.err (!%p664_p10)
}
 0x1c7   : > { %558 = dma.vmem_to_hbm [thread:$0]  (%p777_p5), %s899_s9, 32, %s897_s30, %s357_s16  }
 0x1c8 PF: > { %s434_s4 = sand.u32 1, %s698_s12   ;;  %p562_p11 = pnand %p538_p7, %p781_p6 }
 0x1c9   : > { %s435_s29 = scalar_lea.sflag [#allocation6], %s434_s4 }
 0x1ca   : > { %689 = dma.done.wait (!%p562_p11), %s435_s29, 32  }
 0x1cb   : > { %691 = vsyncadd (!%p562_p11), %s435_s29, 4294967264  ;;  %s444_s5 = scalar_lea.sflag [#allocation9], %s434_s4 }
 0x1cc   : > { %693 = dma.done.wait (!%p562_p11), %s444_s5, 32  }
 0x1cd   : > { %695 = vsyncadd (!%p562_p11), %s444_s5, 4294967264  ;;  %p13_p5 = scmp.ge.s32.totalorder %s764_s18, 4   ;;  %s948_s12 = smov %s702_s13 }
 0x1ce   : > { %s949_s13 = smov %s706_s14  ;;  %s950_s14 = smov %s775_s23 }
 0x1cf   : > { %s951_s15 = smov %s764_s18  ;;  %15 = sbr.rel (!%p13_p5) target bundleno = 5 (0x5), region = 184 }
 0x1d6   :  { %449 = vsyncpa [#allocation6], 1 }
 0x1d7   :  { %451 = vsyncpa [#allocation6 + $0x1], 1 }
 0x1d8   :  { %452 = vsyncpa [#allocation9], 1 }
 0x1d9   :  { %454 = vsyncpa [#allocation9 + $0x1], 1 }

// kernel: mul.39
= control target key start
LH: loop header
LB: loop body
LE: loop exit
PB: predicated region body
PF: predicated region fallthrough
CT: control target
= control target key end

     0   :  { %s7_s6 = smov 3  ;;  %s21_s9 = smov 3  ;;  %vm4_vm0 = vcmask 15360   ;;  %vm11_vm1 = vcmask 130160   ;;  %vm18_vm2 = vcmask 113760   ;;  %vm25_vm3 = vcmask 97360   ;;  %s119_s0 = inlined_call_operand.vmem [shape: f32[2,8,1,2], index: 0, kind: input, shape index: {}]   ;;  %s120_s1 = inlined_call_operand.vmem [shape: f32[2,16], index: 1, kind: output, shape index: {}]  }
   0x1   :  { %v61_v0 = vld [vmem:[%s119_s0 + $0x7] ss:$8 sm:%s7_s6]   ;;  %s75_s10 = smov 14   ;;  %v63_v1 = vld [vmem:[%s119_s0 + $0x5] ss:$8 sm:%s21_s9]   ;;  %s14_s13 = smov 3 }
   0x2   :  { %9 = vrot.lane.b32.xlu0 %v61_v0, %s75_s10  ;;  %s76_s14 = smov 10   ;;  %v62_v2 = vld [vmem:[%s119_s0 + $0x6] ss:$8 sm:%s14_s13]   ;;  %s28_s17 = smov 3  ;;  %vm32_vm4 = vcmask 80960   ;;  %vm39_vm5 = vcmask 64560  }
   0x3   :  { %23 = vrot.lane.b32.xlu1 %v63_v1, %s76_s14  ;;  %v64_v3 = vld [vmem:[%s119_s0 + $0x4] ss:$8 sm:%s28_s17]   ;;  %s35_s20 = smov 3  ;;  %s42_s21 = smov 3  ;;  %vm46_vm6 = vcmask 48160   ;;  %vm53_vm7 = vcmask 31760  }
   0x4   :  { %s77_s22 = smov 12   ;;  %s78_s23 = smov 8   ;;  %v65_v4 = vld [vmem:[%s119_s0 + $0x3] ss:$8 sm:%s35_s20]   ;;  %v66_v5 = vld [vmem:[%s119_s0 + $0x2] ss:$8 sm:%s42_s21]  }
   0x5   :  { %s2_s26 = smov 3  ;;  %s49_s29 = smov 3 }
   0x6   :  { %16 = vrot.lane.b32.xlu0 %v62_v2, %s77_s22  ;;  %v3_v6 = vld [vmem:[%s119_s0] ss:$8 sm:%s2_s26]   ;;  %s79_s3 = smov 6   ;;  %s80_s4 = smov 4  }
   0x7   :  { %30 = vrot.lane.b32.xlu1 %v64_v3, %s78_s23  ;;  %5 = vst.msk [vmem:[#allocation0] sm:$0x3] %vm4_vm0, %v3_v6   ;;  %v67_v7 = vld [vmem:[%s119_s0 + $0x1] ss:$8 sm:%s49_s29]   ;;  %s81_s0 = smov 2  }
   0xa   :  { %37 = vrot.lane.b32.xlu0 %v65_v4, %s79_s3 }
   0xb   :  { %44 = vrot.lane.b32.xlu1 %v66_v5, %s80_s4 }
   0xe   :  { %51 = vrot.lane.b32.xlu0 %v67_v7, %s81_s0 }
  0x74   :  { %v10_v8 = vpop.permute.xlu0 %9  }
  0x75   :  { %12 = vst.msk [vmem:[#allocation0] sm:$0x3] %vm11_vm1, %v10_v8   ;;  %v24_v9 = vpop.permute.xlu1 %23  }
  0x78   :  { %v17_v10 = vpop.permute.xlu0 %16  }
  0x79   :  { %19 = vst.msk [vmem:[#allocation0] sm:$0x3] %vm18_vm2, %v17_v10   ;;  %v31_v11 = vpop.permute.xlu1 %30  }
  0x7a   :  { %26 = vst.msk [vmem:[#allocation0] sm:$0x3] %vm25_vm3, %v24_v9  }
  0x7b   :  { %33 = vst.msk [vmem:[#allocation0] sm:$0x3] %vm32_vm4, %v31_v11  }
  0x7c   :  { %v38_v12 = vpop.permute.xlu0 %37  }
  0x7d   :  { %40 = vst.msk [vmem:[#allocation0] sm:$0x3] %vm39_vm5, %v38_v12   ;;  %v45_v13 = vpop.permute.xlu1 %44  }
  0x7e   :  { %47 = vst.msk [vmem:[#allocation0] sm:$0x3] %vm46_vm6, %v45_v13  }
  0x80   :  { %v52_v14 = vpop.permute.xlu0 %51  }
  0x81   :  { %54 = vst.msk [vmem:[#allocation0] sm:$0x3] %vm53_vm7, %v52_v14  }
  0x88   :  { %v58_v15 = vld [vmem:[#allocation0] sm:$0x3] }
  0x89   :  { %60 = vst [vmem:[%s120_s1] sm:$0x3] %v58_v15 }

// kernel: flow_decoder_forward.1
= control target key start
LH: loop header
LB: loop body
LE: loop exit
PB: predicated region body
PF: predicated region fallthrough
CT: control target
= control target key end

     0   :  { %s6238_s21 = smov 0   ;;  %s7373_s0 = inlined_call_operand.vmem [shape: f32[2,16,128], index: 0, kind: input, shape index: {}]   ;;  %s7374_s1 = inlined_call_operand.vmem [shape: f32[2,1,128], index: 1, kind: input, shape index: {}]   ;;  %s7375_s2 = inlined_call_operand.vmem [shape: f32[3,3,1,128], index: 2, kind: input, shape index: {}]   ;;  %s7376_s3 = inlined_call_operand.vmem [shape: f32[2,2,192,1], index: 3, kind: input, shape index: {}]   ;;  %s7377_s4 = inlined_call_operand.vmem [shape: f32[2,16,8], index: 4, kind: input, shape index: {}]   ;;  %s7378_s5 = inlined_call_operand.vmem [shape: f32[2,16,8], index: 5, kind: input, shape index: {}]   ;;  %s7379_s6 = inlined_call_operand.vmem [shape: f32[2,16,1], index: 6, kind: input, shape index: {}]   ;;  %s7380_s7 = inlined_call_operand.vmem [shape: f32[2,32,8], index: 7, kind: input, shape index: {}]   ;;  %s7381_s8 = inlined_call_operand.vmem [shape: f32[2,32,1], index: 8, kind: input, shape index: {}]   ;;  %s7382_s9 = inlined_call_operand.vmem [shape: f32[2,3,64,96], index: 9, kind: input, shape index: {}]   ;;  %s7383_s10 = inlined_call_operand.vmem [shape: f32[2,3,64,1], index: 10, kind: input, shape index: {}]   ;;  %s7384_s11 = inlined_call_operand.vmem [shape: f32[2,3,64,32], index: 11, kind: input, shape index: {}]   ;;  %s7385_s12 = inlined_call_operand.vmem [shape: f32[2,3,64,1], index: 12, kind: input, shape index: {}]   ;;  %s7386_s13 = inlined_call_operand.vmem [shape: f32[2,16,32], index: 13, kind: input, shape index: {}]   ;;  %s7387_s14 = inlined_call_operand.vmem [shape: f32[2,16,1], index: 14, kind: input, shape index: {}]   ;;  %s7388_s15 = inlined_call_operand.vmem [shape: f32[2,16,128], index: 15, kind: output, shape index: {0}]   ;;  %s7389_s16 = inlined_call_operand.vmem [shape: f32[2,1,1], index: 16, kind: output, shape index: {1}]  }
   0x1   :  { %7395 = sst [smem:[#allocation3_spill]] %s7373_s0 }
   0x2   :  { %7396 = sst [smem:[#allocation4_spill]] %s7374_s1 }
   0x3   :  { %7397 = sst [smem:[#allocation5_spill]] %s7376_s3 }
   0x4 LB: > { %s4723_s22 = sadd.s32 4294967295, %s6148_s21   ;;  %p4727_p0 = scmp.ge.s32.totalorder %s6148_s21, 1  ;;  %s6148_s21 = sphi %s6238_s21, %s27_s21  }
   0x5   : > { %p483_p1 = scmp.lt.s32.totalorder %s6148_s21, 3 }
   0x7   : > { %p484_p2 = pnand %p4727_p0, %p483_p1 }
   0x8   : > { %p544_p3 = scmp.lt.s32.totalorder (!%p484_p2), %s4723_s22, 1  ;;  %v570_v0 = vld [vmem:[%s7378_s5] sm:$0xff] (!%p484_p2)  ;;  %vm572_vm0 = vcmask (!%p484_p2), 64512   ;;  %v6150_v1 = vmov (!%p484_p2), 0   ;;  %s7398_s17 = sld [smem:[#allocation3_spill]] (!%p484_p2)  ;;  %v571_v5 = vld [vmem:[%s7378_s5 + $0x8] sm:$0xff] (!%p484_p2) }
   0x9   : > { %487 = sbr.rel (%p484_p2) target bundleno = 5300 (0x14b4), region = 80  ;;  %5330 = vmatprep.mubr.msk.f32.mxu0 (!%p484_p2), %vm572_vm0, %v570_v0  ;;  %5990 = vset.pattern.permute.xlu0 (!%p484_p2), %v6150_v1  ;;  %v735_v2 = vld [vmem:[%s7379_s6] sm:$0xff] (!%p484_p2)  ;;  %v764_v8 = vld [vmem:[%s7381_s8 + $0x18] sm:$0xff] (!%p484_p2)  ;;  %v569_v9 = vld [vmem:[%s7377_s4 + $0x8] sm:$0xff] (!%p484_p2)  ;;  %s7399_s1 = sld [smem:[#allocation4_spill]] (!%p484_p2)  ;;  %vm1029_vm1 = vcmask (!%p484_p2), 785408  }
   0xa   : > { %739 = vperm.xlu0 (!%p484_p2), %5990, %v735_v2   ;;  %5991 = vset.pattern.permute.xlu1 (!%p484_p2), %v6150_v1  ;;  %v761_v3 = vld [vmem:[%s7381_s8] sm:$0xff] (!%p484_p2)  ;;  %v762_v11 = vld [vmem:[%s7381_s8 + $0x8] sm:$0xff] (!%p484_p2)  ;;  %v763_v12 = vld [vmem:[%s7381_s8 + $0x10] sm:$0xff] (!%p484_p2)  ;;  %s7391_s19 = smov (!%p484_p2), 127   ;;  %s7400_s3 = sld [smem:[#allocation5_spill]] (!%p484_p2)  ;;  %vm1295_vm2 = vcmask (!%p484_p2), 261120  }
   0xb   : > { %v568_v7 = vld [vmem:[%s7377_s4] sm:$0xff] (!%p484_p2)  ;;  %772 = vperm.xlu1 (!%p484_p2), %5991, %v762_v11   ;;  %v758_v19 = vld [vmem:[%s7380_s7 + $0x8] sm:$0xff] (!%p484_p2)  ;;  %v759_v20 = vld [vmem:[%s7380_s7 + $0x10] sm:$0xff] (!%p484_p2)  ;;  %s7401_s23 = smov (!%p484_p2), 127   ;;  %vm4620_vm3 = vcmask (!%p484_p2), 0  }
   0xc   : > { %v757_v10 = vld [vmem:[%s7380_s7] sm:$0xff] (!%p484_p2)  ;;  %v760_v21 = vld [vmem:[%s7380_s7 + $0x18] sm:$0xff] (!%p484_p2)  ;;  %v986_v38 = vld [vmem:[%s7383_s10 + $0x28] sm:$0xff] (!%p484_p2) }
   0xd   : > { %5340 = vmatprep.mubr.msk.f32.mxu1 (!%p484_p2), %vm572_vm0, %v757_v10  ;;  %v961_v39 = vld [vmem:[%s7382_s9] sm:$0xff] (!%p484_p2)  ;;  %v988_v43 = vld [vmem:[%s7383_s10 + $0x38] sm:$0xff] (!%p484_p2)  ;;  %v987_v44 = vld [vmem:[%s7383_s10 + $0x30] sm:$0xff] (!%p484_p2) }
   0xe   : > { %767 = vperm.xlu0 (!%p484_p2), %5990, %v761_v3   ;;  %v985_v40 = vld [vmem:[%s7383_s10 + $0x20] sm:$0xff] (!%p484_p2)  ;;  %v982_v47 = vld [vmem:[%s7383_s10 + $0x8] sm:$0xff] (!%p484_p2)  ;;  %v984_v51 = vld [vmem:[%s7383_s10 + $0x18] sm:$0xff] (!%p484_p2) }
   0xf   : > { %777 = vperm.xlu1 (!%p484_p2), %5991, %v763_v12   ;;  %v981_v48 = vld [vmem:[%s7383_s10] sm:$0xff] (!%p484_p2)  ;;  %v983_v52 = vld [vmem:[%s7383_s10 + $0x10] sm:$0xff] (!%p484_p2)  ;;  %v1248_v55 = vld [vmem:[%s7385_s12 + $0x8] sm:$0xff] (!%p484_p2) }
  0x10   : > { %s7405_s22 = smov (!%p544_p3, %s4723_s22), 1  ;;  %v1247_v56 = vld [vmem:[%s7385_s12] sm:$0xff]  ;;  %v1250_v57 = vld [vmem:[%s7385_s12 + $0x18] sm:$0xff]  ;;  %v1249_v58 = vld [vmem:[%s7385_s12 + $0x10] sm:$0xff] }
  0x11   : > { %s7390_s29 = sshll.u32 %s7405_s22, 4  ;;  %s6293_s25 = scalar_lea.vmem %s7399_s1, %s7405_s22  ;;  %v4742_v59 = vld [vmem:[%s7375_s2] ss:$0 sm:$0xff] }
  0x12   : > { %s548_s18 = scalar_lea.vmem %s7398_s17, %s7390_s29  ;;  %782 = vperm.xlu0 %5990, %v764_v8   ;;  %v6298_v14 = vld [vmem:[%s6293_s25] ss:$0 sm:$0xff]  ;;  %s5978_s20 = smul.u32 384, %s7405_s22 }
  0x13   : > { %v566_v4 = vld [vmem:[%s548_s18 + $0x8] sm:$0xff]  ;;  %v565_v6 = vld [vmem:[%s548_s18] sm:$0xff]  ;;  %s7393_s18 = smov 1   ;;  %s7402_s17 = smov 1  }
  0x14   : > { %5328 = vmatprep.subr.mxu0 %v566_v4  ;;  %s6355_s0 = scalar_lea.vmem %s7400_s3, %s5978_s20  ;;  %s7403_s27 = sshll.u32 %s7405_s22, 4 }
  0x15   : > { %5329 = vmatpush3.msra.mxu0 %v566_v4  ;;  %v891_v41 = vld [vmem:[%s6355_s0 + $0x28] sm:$0xff]  ;;  %v890_v42 = vld [vmem:[%s6355_s0 + $0x20] sm:$0xff]  ;;  %v893_v45 = vld [vmem:[%s6355_s0 + $0x38] sm:$0xff]  ;;  %s6855_s30 = scalar_lea.vmem %s7388_s15, %s7403_s27  ;;  %s564_s20 = scalar_lea.vmem %s7389_s16, %s7405_s22 }
  0x16   : > { %5331 = vmatmul.mubr.msk.f32.vlgmr.msra.gmra.mrb[0].mxu0 %vm572_vm0, %v571_v5  ;;  %5333 = vmatprep.subr.mxu0 %v565_v6  ;;  %v892_v46 = vld [vmem:[%s6355_s0 + $0x30] sm:$0xff]  ;;  %v887_v49 = vld [vmem:[%s6355_s0 + $0x8] sm:$0xff]  ;;  %v886_v50 = vld [vmem:[%s6355_s0] sm:$0xff] }
  0x17   : > { %5334 = vmatpush3.msra.mxu0 %v565_v6  ;;  %5335 = vmatprep.mubr.msk.f32.mxu0 %vm572_vm0, %v568_v7  ;;  %v889_v53 = vld [vmem:[%s6355_s0 + $0x18] sm:$0xff]  ;;  %v888_v54 = vld [vmem:[%s6355_s0 + $0x10] sm:$0xff] }
  0x1e   : > { %5336 = vmatmul.mubr.msk.f32.vlgmr.msra.gmra.mrb[0].mxu0 %vm572_vm0, %v569_v9  ;;  %v4744_v9 = vld [vmem:[%s7375_s2 + $0x2] ss:$0 sm:$0xff] }
  0x89   : > { %v740_v15 = vpop.permute.xlu0 %739 }
  0x8a   : > { %v773_v23 = vpop.permute.xlu1 %772 }
  0x8d   : > { %v768_v22 = vpop.permute.xlu0 %767 }
  0x8e   : > { %v778_v32 = vpop.permute.xlu1 %777 }
  0x91   : > { %v783_v29 = vpop.permute.xlu0 %782 }
  0xf1   : > { %v6295_v13 = vpop.f32.mrb[0].mxu0 }
  0xf2   : > { %v726_v16 = vpop.f32.mrb[1].mxu0 }
  0xf3   : > { %v747_v17 = vadd.f32 %v740_v15, %v726_v16 }
  0xf5   : > { %v6301_v18 = vmul.f32 %v6298_v14, %v747_v17 }
  0xf7   : > { %5338 = vmatprep.subr.mxu1 %v6301_v18 }
  0xf8   : > { %5339 = vmatpush3.msra.mxu1 %v6301_v18 }
  0xf9   : > { %5341 = vmatmul.mubr.msk.f32.vlgmr.msra.gmra.mrb[0].mxu1 %vm572_vm0, %v758_v19 }
  0xfa   : > { %5343 = vmatprep.mubr.msk.f32.mxu1 %vm572_vm0, %v759_v20 }
  0xfd   : > { %5344 = vmatmul.mubr.msk.f32.gmra.mrb[2].mxu1 %vm572_vm0, %v760_v21 }
  0xfe   : > { %5370 = vmatprep.mubr.msk.f32.mxu1 %vm1029_vm1, %v961_v39 }
 0x1cc   : > { %v5342_v24 = vpop.f32.mrb[0].mxu1 }
 0x1cd   : > { %v869_v25 = vadd.f32 %v5342_v24, %v773_v23  ;;  %v863_v26 = vpop.f32.mrb[1].mxu1  ;;  %v963_v23 = vld [vmem:[%s7382_s9 + $0x10] sm:$0xff]  ;;  %v964_v24 = vld [vmem:[%s7382_s9 + $0x18] sm:$0xff] }
 0x1ce   : > { %v864_v27 = vadd.f32 %v863_v26, %v768_v22  ;;  %v962_v22 = vld [vmem:[%s7382_s9 + $0x8] sm:$0xff] }
 0x1cf   : > { %v6318_v28 = vmul.f32 %v6298_v14, %v869_v25  ;;  %v965_v25 = vld [vmem:[%s7382_s9 + $0x20] sm:$0xff]  ;;  %v966_v26 = vld [vmem:[%s7382_s9 + $0x28] sm:$0xff] }
 0x1d0   : > { %v6321_v30 = vmul.f32 %v6298_v14, %v864_v27  ;;  %v5345_v31 = vpop.f32.mrb[2].mxu1  ;;  %v967_v27 = vld [vmem:[%s7382_s9 + $0x30] sm:$0xff] }
 0x1d1   : > { %v879_v33 = vadd.f32 %v5345_v31, %v783_v29  ;;  %912 = vrot.lane.b32.xlu0 %v6318_v28, %s7393_s18  ;;  %v873_v34 = vpop.f32.mrb[3].mxu1  ;;  %v968_v29 = vld [vmem:[%s7382_s9 + $0x38] sm:$0xff]  ;;  %v1239_v31 = vld [vmem:[%s7384_s11] sm:$0xff] }
 0x1d2   : > { %v874_v35 = vadd.f32 %v873_v34, %v778_v32  ;;  %910 = vrot.lane.b32.xlu1 %v6321_v30, %s7393_s18  ;;  %v5730_v8 = vpack.c.bf16 %v6318_v28, %v6321_v30  ;;  %5390 = vmatprep.mubr.msk.f32.mxu0 %vm1295_vm2, %v1239_v31 }
 0x1d3   : > { %v6328_v36 = vmul.f32 %v6298_v14, %v879_v33 }
 0x1d4   : > { %v6331_v37 = vmul.f32 %v6298_v14, %v874_v35 }
 0x1d5   : > { %916 = vrot.lane.b32.xlu0 %v6328_v36, %s7393_s18 }
 0x1d6   : > { %914 = vrot.lane.b32.xlu1 %v6331_v37, %s7393_s18  ;;  %v5734_v12 = vpack.c.bf16 %v6328_v36, %v6331_v37 }
 0x1d9   : > { %939 = vrot.lane.b32.xlu0 %v6318_v28, %s7391_s19 }
 0x1da   : > { %937 = vrot.lane.b32.xlu1 %v6321_v30, %s7391_s19 }
 0x1dd   : > { %943 = vrot.lane.b32.xlu0 %v6328_v36, %s7391_s19 }
 0x1de   : > { %941 = vrot.lane.b32.xlu1 %v6331_v37, %s7391_s19 }
 0x1e1   : > { %1016 = vperm.xlu0 %5990, %v986_v38  }
 0x1e2   : > { %1011 = vperm.xlu1 %5991, %v985_v40  }
 0x1e5   : > { %1186 = vperm.xlu0 %5990, %v891_v41  }
 0x1e6   : > { %1181 = vperm.xlu1 %5991, %v890_v42  }
 0x1e9   : > { %1026 = vperm.xlu0 %5990, %v988_v43  }
 0x1ea   : > { %1021 = vperm.xlu1 %5991, %v987_v44  }
 0x1ed   : > { %1196 = vperm.xlu0 %5990, %v893_v45  }
 0x1ee   : > { %1191 = vperm.xlu1 %5991, %v892_v46  }
 0x1f1   : > { %996 = vperm.xlu0 %5990, %v982_v47  }
 0x1f2   : > { %991 = vperm.xlu1 %5991, %v981_v48  }
 0x1f5   : > { %1166 = vperm.xlu0 %5990, %v887_v49  }
 0x1f6   : > { %1161 = vperm.xlu1 %5991, %v886_v50  }
 0x1f9   : > { %1006 = vperm.xlu0 %5990, %v984_v51  }
 0x1fa   : > { %1001 = vperm.xlu1 %5991, %v983_v52  }
 0x1fd   : > { %1176 = vperm.xlu0 %5990, %v889_v53  }
 0x1fe   : > { %1171 = vperm.xlu1 %5991, %v888_v54  }
 0x201   : > { %1262 = vperm.xlu0 %5990, %v1248_v55  }
 0x202   : > { %1257 = vperm.xlu1 %5991, %v1247_v56  }
 0x205   : > { %1272 = vperm.xlu0 %5990, %v1250_v57  }
 0x206   : > { %1267 = vperm.xlu1 %5991, %v1249_v58  }
 0x243   : > { %v913_v60 = vpop.permute.xlu0 %912 }
 0x244   : > { %v926_v61 = vmul.f32 %v4742_v59, %v913_v60  ;;  %v911_v62 = vpop.permute.xlu1 %910 }
 0x245   : > { %v925_v63 = vmul.f32 %v4742_v59, %v911_v62 }
 0x247   : > { %v5722_v0 = vpack.c.bf16 %v926_v61, %v925_v63  ;;  %v917_v1 = vpop.permute.xlu0 %916 }
 0x248   : > { %v928_v2 = vmul.f32 %v4742_v59, %v917_v1  ;;  %v915_v3 = vpop.permute.xlu1 %914 }
 0x249   : > { %v927_v4 = vmul.f32 %v4742_v59, %v915_v3  ;;  %5723 = vmatprep.subr.bf16.mxu1 %v5722_v0 }
 0x24a   : > { %5725 = vmatpush3.bf16.msra.mxu1 %v5722_v0 }
 0x24b   : > { %v5726_v5 = vpack.c.bf16 %v928_v2, %v927_v4  ;;  %v940_v6 = vpop.permute.xlu0 %939 }
 0x24c   : > { %v938_v7 = vpop.permute.xlu1 %937  ;;  %v954_v10 = vmul.f32 %v4744_v9, %v940_v6 }
 0x24d   : > { %5727 = vmatprep.subr.bf16.mxu1 %v5726_v5  ;;  %v953_v11 = vmul.f32 %v4744_v9, %v938_v7 }
 0x24e   : > { %5729 = vmatpush3.bf16.msra.mxu1 %v5726_v5 }
 0x24f   : > { %5731 = vmatprep.subr.bf16.mxu1 %v5730_v8  ;;  %v944_v15 = vpop.permute.xlu0 %943  ;;  %v5738_v17 = vpack.c.bf16 %v954_v10, %v953_v11 }
 0x250   : > { %v942_v16 = vpop.permute.xlu1 %941  ;;  %v956_v19 = vmul.f32 %v4744_v9, %v944_v15 }
 0x251   : > { %v955_v20 = vmul.f32 %v4744_v9, %v942_v16 }
 0x252   : > { %5733 = vmatpush3.bf16.msra.mxu1 %v5730_v8 }
 0x253   : > { %5735 = vmatprep.subr.bf16.mxu1 %v5734_v12  ;;  %v5742_v21 = vpack.c.bf16 %v956_v19, %v955_v20 }
 0x256   : > { %5737 = vmatpush3.bf16.msra.mxu1 %v5734_v12 }
 0x257   : > { %5739 = vmatprep.subr.bf16.mxu1 %v5738_v17 }
 0x25a   : > { %5741 = vmatpush3.bf16.msra.mxu1 %v5738_v17 }
 0x25b   : > { %5743 = vmatprep.subr.bf16.mxu1 %v5742_v21 }
 0x25e   : > { %5745 = vmatpush3.bf16.msra.mxu1 %v5742_v21 }
 0x260   : > { %v1017_v32 = vpop.permute.xlu0 %1016 }
 0x261   : > { %5371 = vmatmul.mubr.msk.f32.vlgmr.msra.gmra.mrb[4].mxu1 %vm1029_vm1, %v962_v22  ;;  %v1012_v33 = vpop.permute.xlu1 %1011 }
 0x262   : > { %5373 = vmatprep.mubr.msk.f32.mxu1 %vm1029_vm1, %v963_v23 }
 0x264   : > { %v1187_v34 = vpop.permute.xlu0 %1186 }
 0x265   : > { %5374 = vmatmul.mubr.msk.f32.gmra.mrb[6].mxu1 %vm1029_vm1, %v964_v24  ;;  %v1182_v35 = vpop.permute.xlu1 %1181 }
 0x266   : > { %5376 = vmatprep.mubr.msk.f32.mxu1 %vm1029_vm1, %v965_v25 }
 0x268   : > { %v1027_v38 = vpop.permute.xlu0 %1026 }
 0x269   : > { %5377 = vmatmul.mubr.msk.f32.gmra.mrb[8].mxu1 %vm1029_vm1, %v966_v26  ;;  %v1022_v39 = vpop.permute.xlu1 %1021 }
 0x26a   : > { %5379 = vmatprep.mubr.msk.f32.mxu1 %vm1029_vm1, %v967_v27 }
 0x26c   : > { %v1197_v41 = vpop.permute.xlu0 %1196 }
 0x26d   : > { %5380 = vmatmul.mubr.msk.f32.gmra.mrb[10].mxu1 %vm1029_vm1, %v968_v29  ;;  %v1192_v43 = vpop.permute.xlu1 %1191 }
 0x270   : > { %v997_v46 = vpop.permute.xlu0 %996 }
 0x271   : > { %v992_v47 = vpop.permute.xlu1 %991 }
 0x274   : > { %v1167_v55 = vpop.permute.xlu0 %1166 }
 0x275   : > { %v1162_v59 = vpop.permute.xlu1 %1161 }
 0x278   : > { %v1007_v3 = vpop.permute.xlu0 %1006 }
 0x279   : > { %v1002_v5 = vpop.permute.xlu1 %1001 }
 0x27c   : > { %v1177_v11 = vpop.permute.xlu0 %1176 }
 0x27d   : > { %v1172_v15 = vpop.permute.xlu1 %1171 }
 0x334   : > { %v5372_v40 = vpop.f32.mrb[4].mxu1 }
 0x335   : > { %v1120_v42 = vpop.f32.mrb[5].mxu1  ;;  %v1126_v1 = vadd.f32 %v5372_v40, %v997_v46  ;;  %v1263_v46 = vpop.permute.xlu0 %1262 }
 0x336   : > { %v1121_v4 = vadd.f32 %v1120_v42, %v992_v47  ;;  %v1258_v47 = vpop.permute.xlu1 %1257 }
 0x337   : > { %v1200_v6 = vadd.f32 %v1167_v55, %v1126_v1  ;;  %v1246_v1 = vld [vmem:[%s7384_s11 + $0x38] sm:$0xff] }
 0x338   : > { %v5375_v44 = vpop.f32.mrb[6].mxu1  ;;  %v1199_v8 = vadd.f32 %v1162_v59, %v1121_v4  ;;  %v4781_v4 = vld [vmem:[%s7383_s10 + $0x60] sm:$0xff] }
 0x339   : > { %v1130_v45 = vpop.f32.mrb[7].mxu1  ;;  %v1136_v7 = vadd.f32 %v5375_v44, %v1007_v3  ;;  %v1241_v44 = vld [vmem:[%s7384_s11 + $0x10] sm:$0xff]  ;;  %v4769_v3 = vld [vmem:[%s7382_s9 + $0x40] sm:$0xff] }
 0x33a   : > { %v1131_v9 = vadd.f32 %v1130_v45, %v1002_v5  ;;  %v1242_v45 = vld [vmem:[%s7384_s11 + $0x18] sm:$0xff]  ;;  %v899_v5 = vld [vmem:[%s6355_s0 + $0x68] sm:$0xff] }
 0x33b   : > { %v1202_v16 = vadd.f32 %v1177_v11, %v1136_v7  ;;  %v4784_v7 = vld [vmem:[%s7383_s10 + $0x78] sm:$0xff]  ;;  %v4778_v11 = vld [vmem:[%s7383_s10 + $0x48] sm:$0xff] }
 0x33c   : > { %v5378_v48 = vpop.f32.mrb[8].mxu1  ;;  %v1201_v19 = vadd.f32 %v1172_v15, %v1131_v9  ;;  %v901_v9 = vld [vmem:[%s6355_s0 + $0x78] sm:$0xff]  ;;  %v895_v15 = vld [vmem:[%s6355_s0 + $0x48] sm:$0xff] }
 0x33d   : > { %v1146_v49 = vadd.f32 %v5378_v48, %v1017_v32  ;;  %v1140_v50 = vpop.f32.mrb[9].mxu1 }
 0x33e   : > { %v1141_v51 = vadd.f32 %v1140_v50, %v1012_v33 }
 0x33f   : > { %v1204_v52 = vadd.f32 %v1187_v34, %v1146_v49 }
 0x340   : > { %v1203_v53 = vadd.f32 %v1182_v35, %v1141_v51  ;;  %v5381_v54 = vpop.f32.mrb[10].mxu1 }
 0x341   : > { %v4754_v56 = vmul.f32 -1.442695, %v1204_v52  ;;  %v1156_v57 = vadd.f32 %v5381_v54, %v1027_v38  ;;  %v1150_v58 = vpop.f32.mrb[11].mxu1 }
 0x342   : > { %v4753_v60 = vmul.f32 -1.442695, %v1203_v53  ;;  %v1151_v61 = vadd.f32 %v1150_v58, %v1022_v39  ;;  %v1273_v53 = vpop.permute.xlu0 %1272 }
 0x343   : > { %5992 = vpow2.f32 %v4754_v56  ;;  %v1206_v62 = vadd.f32 %v1197_v41, %v1156_v57  ;;  %v1268_v56 = vpop.permute.xlu1 %1267 }
 0x344   : > { %5994 = vpow2.f32 %v4753_v60  ;;  %v1205_v63 = vadd.f32 %v1192_v43, %v1151_v61  ;;  %v1240_v43 = vld [vmem:[%s7384_s11 + $0x8] sm:$0xff] }
 0x345   : > { %v4756_v0 = vmul.f32 -1.442695, %v1206_v62 }
 0x346   : > { %v4755_v2 = vmul.f32 -1.442695, %v1205_v63 }
 0x347   : > { %5996 = vpow2.f32 %v4756_v0  ;;  %v1245_v0 = vld [vmem:[%s7384_s11 + $0x30] sm:$0xff] }
 0x348   : > { %5998 = vpow2.f32 %v4755_v2  ;;  %v4782_v2 = vld [vmem:[%s7383_s10 + $0x68] sm:$0xff] }
 0x349   : > { %6000 = vtanh.f32 %v1200_v6  ;;  %v898_v6 = vld [vmem:[%s6355_s0 + $0x60] sm:$0xff] }
 0x34a   : > { %6002 = vtanh.f32 %v1199_v8  ;;  %v4783_v8 = vld [vmem:[%s7383_s10 + $0x70] sm:$0xff] }
 0x34d   : > { %v5993_v10 = vpop.eup %5992 }
 0x34e   : > { %v5995_v12 = vpop.eup %5994  ;;  %v1224_v17 = vadd.f32 1.0, %v5993_v10  ;;  %v900_v10 = vld [vmem:[%s6355_s0 + $0x70] sm:$0xff] }
 0x34f   : > { %v1223_v20 = vadd.f32 1.0, %v5995_v12  ;;  %v4777_v12 = vld [vmem:[%s7383_s10 + $0x40] sm:$0xff] }
 0x350   : > { %6004 = vrcp.f32 %v1224_v17  ;;  %v4780_v17 = vld [vmem:[%s7383_s10 + $0x58] sm:$0xff] }
 0x351   : > { %v5997_v21 = vpop.eup %5996  ;;  %6006 = vrcp.f32 %v1223_v20  ;;  %v897_v20 = vld [vmem:[%s6355_s0 + $0x58] sm:$0xff] }
 0x352   : > { %v5999_v22 = vpop.eup %5998  ;;  %6008 = vtanh.f32 %v1202_v16  ;;  %v1226_v23 = vadd.f32 1.0, %v5997_v21  ;;  %v894_v16 = vld [vmem:[%s6355_s0 + $0x40] sm:$0xff]  ;;  %v896_v21 = vld [vmem:[%s6355_s0 + $0x50] sm:$0xff] }
 0x353   : > { %6010 = vtanh.f32 %v1201_v19  ;;  %v1225_v24 = vadd.f32 1.0, %v5999_v22  ;;  %v6001_v25 = vpop.eup %6000  ;;  %v4779_v19 = vld [vmem:[%s7383_s10 + $0x50] sm:$0xff]  ;;  %v4806_v22 = vld [vmem:[%s7385_s12 + $0x48] sm:$0xff] }
 0x354   : > { %6012 = vrcp.f32 %v1226_v23  ;;  %v6003_v26 = vpop.eup %6002  ;;  %v4805_v23 = vld [vmem:[%s7385_s12 + $0x40] sm:$0xff] }
 0x355   : > { %6014 = vrcp.f32 %v1225_v24  ;;  %v4808_v24 = vld [vmem:[%s7385_s12 + $0x58] sm:$0xff] }
 0x35a   : > { %v6005_v27 = vpop.eup %6004 }
 0x35b   : > { %v6007_v29 = vpop.eup %6006  ;;  %v1236_v31 = vmul.f32 %v6005_v27, %v6001_v25  ;;  %v4807_v25 = vld [vmem:[%s7385_s12 + $0x50] sm:$0xff] }
 0x35c   : > { %v6009_v32 = vpop.eup %6008  ;;  %v1235_v33 = vmul.f32 %v6007_v29, %v6003_v26  ;;  %v4766_v26 = vld [vmem:[%s7375_s2 + $0x3] ss:$0 sm:$0xff] }
 0x35d   : > { %v6011_v34 = vpop.eup %6010 }
 0x35e   : > { %v6013_v35 = vpop.eup %6012  ;;  %v5746_v38 = vpack.c.bf16 %v1236_v31, %v1235_v33 }
 0x35f   : > { %v6015_v39 = vpop.eup %6014  ;;  %v1238_v40 = vmul.f32 %v6013_v35, %v6009_v32 }
 0x360   : > { %5747 = vmatprep.subr.bf16.mxu0 %v5746_v38  ;;  %v1237_v41 = vmul.f32 %v6015_v39, %v6011_v34 }
 0x361   : > { %5749 = vmatpush3.bf16.msra.mxu0 %v5746_v38 }
 0x362   : > { %v5750_v42 = vpack.c.bf16 %v1238_v40, %v1237_v41 }
 0x364   : > { %5751 = vmatprep.subr.bf16.mxu0 %v5750_v42 }
 0x365   : > { %5753 = vmatpush3.bf16.msra.mxu0 %v5750_v42 }
 0x368   : > { %5391 = vmatmul.mubr.msk.f32.vlgmr.msra.gmra.mrb[2].mxu0 %vm1295_vm2, %v1240_v43 }
 0x369   : > { %5393 = vmatprep.mubr.msk.f32.mxu0 %vm1295_vm2, %v1241_v44  ;;  %v4768_v44 = vld [vmem:[%s7375_s2 + $0x5] ss:$0 sm:$0xff] }
 0x36c   : > { %5394 = vmatmul.mubr.msk.f32.gmra.mrb[4].mxu0 %vm1295_vm2, %v1242_v45 }
 0x43b   : > { %v5392_v48 = vpop.f32.mrb[2].mxu0 }
 0x43c   : > { %v1392_v49 = vadd.f32 %v5392_v48, %v1263_v46  ;;  %v1386_v50 = vpop.f32.mrb[3].mxu0 }
 0x43d   : > { %v1387_v51 = vadd.f32 %v1386_v50, %v1258_v47 }
 0x43e   : > { %v1426_v52 = vadd.f32 %v1392_v49, %v6318_v28 }
 0x43f   : > { %v1425_v54 = vadd.f32 %v1387_v51, %v6321_v30  ;;  %v5395_v55 = vpop.f32.mrb[4].mxu0 }
 0x440   : > { %v6456_v57 = vmul.f32 %v6298_v14, %v1426_v52  ;;  %v1402_v58 = vadd.f32 %v5395_v55, %v1273_v53  ;;  %v1396_v59 = vpop.f32.mrb[5].mxu0  ;;  %v4771_v55 = vld [vmem:[%s7382_s9 + $0x50] sm:$0xff] }
 0x441   : > { %v6459_v60 = vmul.f32 %v6298_v14, %v1425_v54  ;;  %v1397_v61 = vadd.f32 %v1396_v59, %v1268_v56  ;;  %v4770_v54 = vld [vmem:[%s7382_s9 + $0x48] sm:$0xff]  ;;  %v4772_v56 = vld [vmem:[%s7382_s9 + $0x58] sm:$0xff] }
 0x442   : > { %v1428_v62 = vadd.f32 %v1402_v58, %v6328_v36  ;;  %1439 = vrot.lane.b32.xlu0 %v6456_v57, %s7393_s18  ;;  %v1243_v36 = vld [vmem:[%s7384_s11 + $0x20] sm:$0xff]  ;;  %v4774_v59 = vld [vmem:[%s7382_s9 + $0x68] sm:$0xff] }
 0x443   : > { %v1427_v28 = vadd.f32 %v1397_v61, %v6331_v37  ;;  %1437 = vrot.lane.b32.xlu1 %v6459_v60, %s7393_s18  ;;  %v1244_v37 = vld [vmem:[%s7384_s11 + $0x28] sm:$0xff]  ;;  %5396 = vmatprep.mubr.msk.f32.mxu0 %vm1295_vm2, %v1243_v36  ;;  %v5762_v43 = vpack.c.bf16 %v6456_v57, %v6459_v60  ;;  %v4773_v58 = vld [vmem:[%s7382_s9 + $0x60] sm:$0xff]  ;;  %v4775_v61 = vld [vmem:[%s7382_s9 + $0x70] sm:$0xff] }
 0x444   : > { %v6468_v30 = vmul.f32 %v6298_v14, %v1428_v62  ;;  %5397 = vmatmul.mubr.msk.f32.gmra.mrb[6].mxu0 %vm1295_vm2, %v1244_v37  ;;  %v4776_v62 = vld [vmem:[%s7382_s9 + $0x78] sm:$0xff] }
 0x445   : > { %v6471_v63 = vmul.f32 %v6298_v14, %v1427_v28  ;;  %5399 = vmatprep.mubr.msk.f32.mxu0 %vm1295_vm2, %v1245_v0  ;;  %v4797_v28 = vld [vmem:[%s7384_s11 + $0x40] sm:$0xff] }
 0x446   : > { %1443 = vrot.lane.b32.xlu0 %v6468_v30, %s7393_s18 }
 0x447   : > { %1441 = vrot.lane.b32.xlu1 %v6471_v63, %s7393_s18  ;;  %v5766_v47 = vpack.c.bf16 %v6468_v30, %v6471_v63 }
 0x448   : > { %5400 = vmatmul.mubr.msk.f32.gmra.mrb[8].mxu0 %vm1295_vm2, %v1246_v1 }
 0x449   : > { %5426 = vmatprep.mubr.msk.f32.mxu0 %vm1029_vm1, %v4769_v3 }
 0x44a   : > { %1467 = vrot.lane.b32.xlu0 %v6456_v57, %s7401_s23 }
 0x44b   : > { %1465 = vrot.lane.b32.xlu1 %v6459_v60, %s7401_s23 }
 0x44e   : > { %1471 = vrot.lane.b32.xlu0 %v6468_v30, %s7401_s23 }
 0x44f   : > { %1469 = vrot.lane.b32.xlu1 %v6471_v63, %s7401_s23 }
 0x452   : > { %1546 = vperm.xlu0 %5990, %v4782_v2  }
 0x453   : > { %1541 = vperm.xlu1 %5991, %v4781_v4  }
 0x456   : > { %1715 = vperm.xlu0 %5990, %v899_v5  }
 0x457   : > { %1710 = vperm.xlu1 %5991, %v898_v6  }
 0x45a   : > { %1556 = vperm.xlu0 %5990, %v4784_v7  }
 0x45b   : > { %1551 = vperm.xlu1 %5991, %v4783_v8  }
 0x45e   : > { %1725 = vperm.xlu0 %5990, %v901_v9  }
 0x45f   : > { %1720 = vperm.xlu1 %5991, %v900_v10  }
 0x462   : > { %1526 = vperm.xlu0 %5990, %v4778_v11  }
 0x463   : > { %1521 = vperm.xlu1 %5991, %v4777_v12  }
 0x466   : > { %1695 = vperm.xlu0 %5990, %v895_v15  }
 0x467   : > { %1690 = vperm.xlu1 %5991, %v894_v16  }
 0x46a   : > { %1536 = vperm.xlu0 %5990, %v4780_v17  }
 0x46b   : > { %1531 = vperm.xlu1 %5991, %v4779_v19  }
 0x46e   : > { %1705 = vperm.xlu0 %5990, %v897_v20  }
 0x46f   : > { %1700 = vperm.xlu1 %5991, %v896_v21  }
 0x472   : > { %1793 = vperm.xlu0 %5990, %v4806_v22  }
 0x473   : > { %1788 = vperm.xlu1 %5991, %v4805_v23  }
 0x476   : > { %1803 = vperm.xlu0 %5990, %v4808_v24  }
 0x477   : > { %1798 = vperm.xlu1 %5991, %v4807_v25  }
 0x4b4   : > { %v1440_v27 = vpop.permute.xlu0 %1439 }
 0x4b5   : > { %v1454_v29 = vmul.f32 %v4766_v26, %v1440_v27  ;;  %v1438_v31 = vpop.permute.xlu1 %1437 }
 0x4b6   : > { %v1453_v32 = vmul.f32 %v4766_v26, %v1438_v31 }
 0x4b8   : > { %v5754_v33 = vpack.c.bf16 %v1454_v29, %v1453_v32  ;;  %v1444_v34 = vpop.permute.xlu0 %1443 }
 0x4b9   : > { %v1456_v35 = vmul.f32 %v4766_v26, %v1444_v34  ;;  %v1442_v38 = vpop.permute.xlu1 %1441 }
 0x4ba   : > { %v1455_v39 = vmul.f32 %v4766_v26, %v1442_v38  ;;  %5755 = vmatprep.subr.bf16.mxu0 %v5754_v33 }
 0x4bb   : > { %5757 = vmatpush3.bf16.msra.mxu0 %v5754_v33 }
 0x4bc   : > { %v5758_v40 = vpack.c.bf16 %v1456_v35, %v1455_v39  ;;  %v1468_v41 = vpop.permute.xlu0 %1467 }
 0x4bd   : > { %v1466_v42 = vpop.permute.xlu1 %1465  ;;  %v1482_v45 = vmul.f32 %v4768_v44, %v1468_v41 }
 0x4be   : > { %5759 = vmatprep.subr.bf16.mxu0 %v5758_v40  ;;  %v1481_v46 = vmul.f32 %v4768_v44, %v1466_v42 }
 0x4bf   : > { %5761 = vmatpush3.bf16.msra.mxu0 %v5758_v40 }
 0x4c0   : > { %5763 = vmatprep.subr.bf16.mxu0 %v5762_v43  ;;  %v1472_v48 = vpop.permute.xlu0 %1471  ;;  %v5770_v50 = vpack.c.bf16 %v1482_v45, %v1481_v46 }
 0x4c1   : > { %v1470_v49 = vpop.permute.xlu1 %1469  ;;  %v1484_v51 = vmul.f32 %v4768_v44, %v1472_v48 }
 0x4c2   : > { %v1483_v52 = vmul.f32 %v4768_v44, %v1470_v49 }
 0x4c3   : > { %5765 = vmatpush3.bf16.msra.mxu0 %v5762_v43 }
 0x4c4   : > { %5767 = vmatprep.subr.bf16.mxu0 %v5766_v47  ;;  %v5774_v53 = vpack.c.bf16 %v1484_v51, %v1483_v52 }
 0x4c7   : > { %5769 = vmatpush3.bf16.msra.mxu0 %v5766_v47 }
 0x4c8   : > { %5771 = vmatprep.subr.bf16.mxu0 %v5770_v50 }
 0x4cb   : > { %5773 = vmatpush3.bf16.msra.mxu0 %v5770_v50 }
 0x4cc   : > { %5775 = vmatprep.subr.bf16.mxu0 %v5774_v53 }
 0x4cf   : > { %5777 = vmatpush3.bf16.msra.mxu0 %v5774_v53 }
 0x4d1   : > { %v1547_v36 = vpop.permute.xlu0 %1546 }
 0x4d2   : > { %5427 = vmatmul.mubr.msk.f32.vlgmr.msra.gmra.mrb[10].mxu0 %vm1029_vm1, %v4770_v54  ;;  %v1542_v37 = vpop.permute.xlu1 %1541 }
 0x4d3   : > { %5429 = vmatprep.mubr.msk.f32.mxu0 %vm1029_vm1, %v4771_v55 }
 0x4d5   : > { %v1716_v0 = vpop.permute.xlu0 %1715 }
 0x4d6   : > { %5430 = vmatmul.mubr.msk.f32.gmra.mrb[12].mxu0 %vm1029_vm1, %v4772_v56  ;;  %v1711_v1 = vpop.permute.xlu1 %1710 }
 0x4d7   : > { %5432 = vmatprep.mubr.msk.f32.mxu0 %vm1029_vm1, %v4773_v58 }
 0x4d9   : > { %v1557_v2 = vpop.permute.xlu0 %1556 }
 0x4da   : > { %5433 = vmatmul.mubr.msk.f32.gmra.mrb[14].mxu0 %vm1029_vm1, %v4774_v59  ;;  %v1552_v3 = vpop.permute.xlu1 %1551 }
 0x4db   : > { %5435 = vmatprep.mubr.msk.f32.mxu0 %vm1029_vm1, %v4775_v61 }
 0x4dd   : > { %v1726_v5 = vpop.permute.xlu0 %1725 }
 0x4de   : > { %5436 = vmatmul.mubr.msk.f32.gmra.mrb[16].mxu0 %vm1029_vm1, %v4776_v62  ;;  %v1721_v7 = vpop.permute.xlu1 %1720 }
 0x4df   : > { %5446 = vmatprep.mubr.msk.f32.mxu0 %vm1295_vm2, %v4797_v28 }
 0x4e1   : > { %v1527_v10 = vpop.permute.xlu0 %1526 }
 0x4e2   : > { %v1522_v11 = vpop.permute.xlu1 %1521 }
 0x4e5   : > { %v1696_v22 = vpop.permute.xlu0 %1695 }
 0x4e6   : > { %v1691_v26 = vpop.permute.xlu1 %1690 }
 0x4e9   : > { %v1537_v38 = vpop.permute.xlu0 %1536 }
 0x4ea   : > { %v1532_v40 = vpop.permute.xlu1 %1531 }
 0x4ed   : > { %v1706_v46 = vpop.permute.xlu0 %1705 }
 0x4ee   : > { %v1701_v48 = vpop.permute.xlu1 %1700 }
 0x5a5   : > { %v5428_v4 = vpop.f32.mrb[10].mxu0 }
 0x5a6   : > { %v1649_v6 = vpop.f32.mrb[11].mxu0  ;;  %v1655_v34 = vadd.f32 %v5428_v4, %v1527_v10  ;;  %v1794_v10 = vpop.permute.xlu0 %1793 }
 0x5a7   : > { %v1650_v39 = vadd.f32 %v1649_v6, %v1522_v11  ;;  %v1789_v11 = vpop.permute.xlu1 %1788 }
 0x5a8   : > { %v1729_v41 = vadd.f32 %v1696_v22, %v1655_v34 }
 0x5a9   : > { %v5431_v8 = vpop.f32.mrb[12].mxu0  ;;  %v1728_v43 = vadd.f32 %v1691_v26, %v1650_v39  ;;  %v4840_v39 = vld [vmem:[%s7383_s10 + $0xb8] sm:$0xff] }
 0x5aa   : > { %v1659_v9 = vpop.f32.mrb[13].mxu0  ;;  %v1665_v42 = vadd.f32 %v5431_v8, %v1537_v38  ;;  %v4799_v8 = vld [vmem:[%s7384_s11 + $0x50] sm:$0xff]  ;;  %v906_v38 = vld [vmem:[%s6355_s0 + $0xa0] sm:$0xff] }
 0x5ab   : > { %v1660_v44 = vadd.f32 %v1659_v9, %v1532_v40  ;;  %v4800_v9 = vld [vmem:[%s7384_s11 + $0x58] sm:$0xff]  ;;  %v4839_v40 = vld [vmem:[%s7383_s10 + $0xb0] sm:$0xff] }
 0x5ac   : > { %v1731_v49 = vadd.f32 %v1706_v46, %v1665_v42  ;;  %v908_v42 = vld [vmem:[%s6355_s0 + $0xb0] sm:$0xff]  ;;  %v902_v46 = vld [vmem:[%s6355_s0 + $0x80] sm:$0xff] }
 0x5ad   : > { %v5434_v12 = vpop.f32.mrb[14].mxu0  ;;  %v1730_v51 = vadd.f32 %v1701_v48, %v1660_v44  ;;  %v4833_v44 = vld [vmem:[%s7383_s10 + $0x80] sm:$0xff]  ;;  %v4835_v48 = vld [vmem:[%s7383_s10 + $0x90] sm:$0xff] }
 0x5ae   : > { %v1675_v15 = vadd.f32 %v5434_v12, %v1547_v36  ;;  %v1669_v16 = vpop.f32.mrb[15].mxu0 }
 0x5af   : > { %v1670_v17 = vadd.f32 %v1669_v16, %v1542_v37 }
 0x5b0   : > { %v1733_v19 = vadd.f32 %v1716_v0, %v1675_v15 }
 0x5b1   : > { %v1732_v20 = vadd.f32 %v1711_v1, %v1670_v17  ;;  %v5437_v21 = vpop.f32.mrb[16].mxu0 }
 0x5b2   : > { %v4794_v23 = vmul.f32 -1.442695, %v1733_v19  ;;  %v1685_v24 = vadd.f32 %v5437_v21, %v1557_v2  ;;  %v1679_v25 = vpop.f32.mrb[17].mxu0 }
 0x5b3   : > { %v4793_v27 = vmul.f32 -1.442695, %v1732_v20  ;;  %v1680_v29 = vadd.f32 %v1679_v25, %v1552_v3  ;;  %v1804_v20 = vpop.permute.xlu0 %1803 }
 0x5b4   : > { %6016 = vpow2.f32 %v4794_v23  ;;  %v1735_v31 = vadd.f32 %v1726_v5, %v1685_v24  ;;  %v1799_v23 = vpop.permute.xlu1 %1798 }
 0x5b5   : > { %6018 = vpow2.f32 %v4793_v27  ;;  %v1734_v32 = vadd.f32 %v1721_v7, %v1680_v29  ;;  %v4798_v7 = vld [vmem:[%s7384_s11 + $0x48] sm:$0xff] }
 0x5b6   : > { %v4796_v33 = vmul.f32 -1.442695, %v1735_v31 }
 0x5b7   : > { %v4795_v35 = vmul.f32 -1.442695, %v1734_v32 }
 0x5b8   : > { %6020 = vpow2.f32 %v4796_v33 }
 0x5b9   : > { %6022 = vpow2.f32 %v4795_v35  ;;  %v907_v35 = vld [vmem:[%s6355_s0 + $0xa8] sm:$0xff] }
 0x5ba   : > { %6024 = vtanh.f32 %v1729_v41  ;;  %v909_v41 = vld [vmem:[%s6355_s0 + $0xb8] sm:$0xff] }
 0x5bb   : > { %6026 = vtanh.f32 %v1728_v43  ;;  %v4834_v43 = vld [vmem:[%s7383_s10 + $0x88] sm:$0xff] }
 0x5be   : > { %v6017_v45 = vpop.eup %6016 }
 0x5bf   : > { %v6019_v47 = vpop.eup %6018  ;;  %v1753_v50 = vadd.f32 1.0, %v6017_v45  ;;  %v903_v45 = vld [vmem:[%s6355_s0 + $0x88] sm:$0xff] }
 0x5c0   : > { %v1752_v52 = vadd.f32 1.0, %v6019_v47  ;;  %v4836_v47 = vld [vmem:[%s7383_s10 + $0x98] sm:$0xff] }
 0x5c1   : > { %6028 = vrcp.f32 %v1753_v50  ;;  %v904_v50 = vld [vmem:[%s6355_s0 + $0x90] sm:$0xff] }
 0x5c2   : > { %v6021_v53 = vpop.eup %6020  ;;  %6030 = vrcp.f32 %v1752_v52  ;;  %v1251_v52 = vld [vmem:[%s7385_s12 + $0x20] sm:$0xff] }
 0x5c3   : > { %v6023_v54 = vpop.eup %6022  ;;  %6032 = vtanh.f32 %v1731_v49  ;;  %v1755_v55 = vadd.f32 1.0, %v6021_v53  ;;  %v905_v49 = vld [vmem:[%s6355_s0 + $0x98] sm:$0xff]  ;;  %v4810_v53 = vld [vmem:[%s7385_s12 + $0x68] sm:$0xff] }
 0x5c4   : > { %6034 = vtanh.f32 %v1730_v51  ;;  %v1754_v56 = vadd.f32 1.0, %v6023_v54  ;;  %v6025_v58 = vpop.eup %6024  ;;  %v1252_v51 = vld [vmem:[%s7385_s12 + $0x28] sm:$0xff]  ;;  %v4809_v54 = vld [vmem:[%s7385_s12 + $0x60] sm:$0xff] }
 0x5c5   : > { %6036 = vrcp.f32 %v1755_v55  ;;  %v6027_v59 = vpop.eup %6026  ;;  %v4866_v55 = vld [vmem:[%s7385_s12 + $0xa8] sm:$0xff] }
 0x5c6   : > { %6038 = vrcp.f32 %v1754_v56  ;;  %v4865_v56 = vld [vmem:[%s7385_s12 + $0xa0] sm:$0xff] }
 0x5cb   : > { %v6029_v61 = vpop.eup %6028 }
 0x5cc   : > { %v6031_v62 = vpop.eup %6030  ;;  %v1765_v28 = vmul.f32 %v6029_v61, %v6025_v58  ;;  %v1254_v58 = vld [vmem:[%s7385_s12 + $0x38] sm:$0xff] }
 0x5cd   : > { %v6033_v36 = vpop.eup %6032  ;;  %v1764_v37 = vmul.f32 %v6031_v62, %v6027_v59  ;;  %v1253_v59 = vld [vmem:[%s7385_s12 + $0x30] sm:$0xff]  ;;  %v4812_v61 = vld [vmem:[%s7385_s12 + $0x78] sm:$0xff] }
 0x5ce   : > { %v6035_v0 = vpop.eup %6034  ;;  %v4811_v62 = vld [vmem:[%s7385_s12 + $0x70] sm:$0xff] }
 0x5cf   : > { %v6037_v1 = vpop.eup %6036  ;;  %v5778_v2 = vpack.c.bf16 %v1765_v28, %v1764_v37  ;;  %v4868_v28 = vld [vmem:[%s7385_s12 + $0xb8] sm:$0xff]  ;;  %v736_v37 = vld [vmem:[%s7379_s6 + $0x8] sm:$0xff] }
 0x5d0   : > { %v6039_v3 = vpop.eup %6038  ;;  %v1767_v4 = vmul.f32 %v6037_v1, %v6033_v36  ;;  %v4867_v36 = vld [vmem:[%s7385_s12 + $0xb0] sm:$0xff] }
 0x5d1   : > { %5779 = vmatprep.subr.bf16.mxu0 %v5778_v2  ;;  %v1766_v5 = vmul.f32 %v6039_v3, %v6035_v0  ;;  %v2488_v0 = vld [vmem:[%s7387_s14 + $0x8] sm:$0xff]  ;;  %v4887_v1 = vld [vmem:[%s7379_s6 + $0x10] sm:$0xff] }
 0x5d2   : > { %5781 = vmatpush3.bf16.msra.mxu0 %v5778_v2  ;;  %v2487_v2 = vld [vmem:[%s7387_s14] sm:$0xff]  ;;  %v4894_v3 = vld [vmem:[%s7381_s8 + $0x28] sm:$0xff] }
 0x5d3   : > { %v5782_v6 = vpack.c.bf16 %v1767_v4, %v1766_v5  ;;  %v4893_v4 = vld [vmem:[%s7381_s8 + $0x20] sm:$0xff]  ;;  %v4896_v5 = vld [vmem:[%s7381_s8 + $0x38] sm:$0xff] }
 0x5d5   : > { %5783 = vmatprep.subr.bf16.mxu0 %v5782_v6 }
 0x5d6   : > { %5785 = vmatpush3.bf16.msra.mxu0 %v5782_v6  ;;  %v4895_v6 = vld [vmem:[%s7381_s8 + $0x30] sm:$0xff] }
 0x5d9   : > { %5447 = vmatmul.mubr.msk.f32.vlgmr.msra.gmra.mrb[18].mxu0 %vm1295_vm2, %v4798_v7  ;;  %v4822_v7 = vld [vmem:[%s7375_s2 + $0x6] ss:$0 sm:$0xff] }
 0x5da   : > { %5449 = vmatprep.mubr.msk.f32.mxu0 %vm1295_vm2, %v4799_v8 }
 0x5dd   : > { %5450 = vmatmul.mubr.msk.f32.gmra.mrb[20].mxu0 %vm1295_vm2, %v4800_v9 }
 0x6ac   : > { %v5448_v12 = vpop.f32.mrb[18].mxu0 }
 0x6ad   : > { %v1922_v15 = vadd.f32 %v5448_v12, %v1794_v10  ;;  %v1916_v16 = vpop.f32.mrb[19].mxu0 }
 0x6ae   : > { %v1917_v17 = vadd.f32 %v1916_v16, %v1789_v11 }
 0x6af   : > { %v1956_v19 = vadd.f32 %v1922_v15, %v6456_v57 }
 0x6b0   : > { %v1955_v21 = vadd.f32 %v1917_v17, %v6459_v60  ;;  %v5451_v22 = vpop.f32.mrb[20].mxu0 }
 0x6b1   : > { %v1932_v24 = vadd.f32 %v5451_v22, %v1804_v20  ;;  %v1926_v25 = vpop.f32.mrb[21].mxu0  ;;  %v1960_v26 = vmul.f32 %v6298_v14, %v1956_v19 }
 0x6b2   : > { %v1927_v27 = vadd.f32 %v1926_v25, %v1799_v23  ;;  %v1959_v29 = vmul.f32 %v6298_v14, %v1955_v21  ;;  %v4824_v23 = vld [vmem:[%s7375_s2 + $0x8] ss:$0 sm:$0xff] }
 0x6b3   : > { %v1958_v31 = vadd.f32 %v1932_v24, %v6468_v30  ;;  %1969 = vrot.lane.b32.xlu0 %v1960_v26, %s7402_s17  ;;  %v4825_v30 = vld [vmem:[%s7382_s9 + $0x80] sm:$0xff] }
 0x6b4   : > { %v1957_v32 = vadd.f32 %v1927_v27, %v6471_v63  ;;  %1967 = vrot.lane.b32.xlu1 %v1959_v29, %s7402_s17  ;;  %v6611_v57 = vpack.c.bf16 %v1960_v26, %v1959_v29  ;;  %v4837_v63 = vld [vmem:[%s7383_s10 + $0xa0] sm:$0xff]  ;;  %5482 = vmatprep.mubr.msk.f32.mxu1 %vm1029_vm1, %v4825_v30  ;;  %v4830_v30 = vld [vmem:[%s7382_s9 + $0xa8] sm:$0xff] }
 0x6b5   : > { %v1962_v60 = vmul.f32 %v6298_v14, %v1958_v31 }
 0x6b6   : > { %v1961_v33 = vmul.f32 %v6298_v14, %v1957_v32  ;;  %v4838_v14 = vld [vmem:[%s7383_s10 + $0xa8] sm:$0xff] }
 0x6b7   : > { %1973 = vrot.lane.b32.xlu0 %v1962_v60, %s7402_s17 }
 0x6b8   : > { %1971 = vrot.lane.b32.xlu1 %v1961_v33, %s7402_s17  ;;  %v6617_v34 = vpack.c.bf16 %v1962_v60, %v1961_v33 }
 0x6bb   : > { %1997 = vrot.lane.b32.xlu0 %v1960_v26, %s7401_s23 }
 0x6bc   : > { %1995 = vrot.lane.b32.xlu1 %v1959_v29, %s7401_s23 }
 0x6bf   : > { %2001 = vrot.lane.b32.xlu0 %v1962_v60, %s7401_s23 }
 0x6c0   : > { %1999 = vrot.lane.b32.xlu1 %v1961_v33, %s7401_s23  ;;  %v4826_v33 = vld [vmem:[%s7382_s9 + $0x88] sm:$0xff] }
 0x6c3   : > { %2076 = vperm.xlu0 %5990, %v4838_v14   ;;  %v4829_v14 = vld [vmem:[%s7382_s9 + $0xa0] sm:$0xff] }
 0x6c4   : > { %2071 = vperm.xlu1 %5991, %v4837_v63   ;;  %v4831_v63 = vld [vmem:[%s7382_s9 + $0xb0] sm:$0xff] }
 0x6c7   : > { %2245 = vperm.xlu0 %5990, %v907_v35   ;;  %v4832_v35 = vld [vmem:[%s7382_s9 + $0xb8] sm:$0xff] }
 0x6c8   : > { %2240 = vperm.xlu1 %5991, %v906_v38   ;;  %v4801_v38 = vld [vmem:[%s7384_s11 + $0x60] sm:$0xff] }
 0x6c9   : > { %5452 = vmatprep.mubr.msk.f32.mxu0 %vm1295_vm2, %v4801_v38 }
 0x6cb   : > { %2086 = vperm.xlu0 %5990, %v4840_v39   ;;  %v4802_v39 = vld [vmem:[%s7384_s11 + $0x68] sm:$0xff] }
 0x6cc   : > { %2081 = vperm.xlu1 %5991, %v4839_v40   ;;  %5453 = vmatmul.mubr.msk.f32.gmra.mrb[6].mxu0 %vm1295_vm2, %v4802_v39  ;;  %v4803_v40 = vld [vmem:[%s7384_s11 + $0x70] sm:$0xff] }
 0x6cd   : > { %5455 = vmatprep.mubr.msk.f32.mxu0 %vm1295_vm2, %v4803_v40 }
 0x6cf   : > { %2255 = vperm.xlu0 %5990, %v909_v41   ;;  %v4804_v41 = vld [vmem:[%s7384_s11 + $0x78] sm:$0xff] }
 0x6d0   : > { %2250 = vperm.xlu1 %5991, %v908_v42   ;;  %5456 = vmatmul.mubr.msk.f32.gmra.mrb[8].mxu0 %vm1295_vm2, %v4804_v41  ;;  %v4853_v42 = vld [vmem:[%s7384_s11 + $0x80] sm:$0xff] }
 0x6d1   : > { %5502 = vmatprep.mubr.msk.f32.mxu0 %vm1295_vm2, %v4853_v42 }
 0x6d3   : > { %2056 = vperm.xlu0 %5990, %v4834_v43  }
 0x6d4   : > { %2051 = vperm.xlu1 %5991, %v4833_v44  }
 0x6d7   : > { %2225 = vperm.xlu0 %5990, %v903_v45  }
 0x6d8   : > { %2220 = vperm.xlu1 %5991, %v902_v46  }
 0x6db   : > { %2066 = vperm.xlu0 %5990, %v4836_v47  }
 0x6dc   : > { %2061 = vperm.xlu1 %5991, %v4835_v48  }
 0x6df   : > { %2235 = vperm.xlu0 %5990, %v905_v49  }
 0x6e0   : > { %2230 = vperm.xlu1 %5991, %v904_v50  }
 0x6e3   : > { %1282 = vperm.xlu0 %5990, %v1252_v51  }
 0x6e4   : > { %1277 = vperm.xlu1 %5991, %v1251_v52  }
 0x6e7   : > { %1813 = vperm.xlu0 %5990, %v4810_v53  }
 0x6e8   : > { %1808 = vperm.xlu1 %5991, %v4809_v54  }
 0x6eb   : > { %2339 = vperm.xlu0 %5990, %v4866_v55  }
 0x6ec   : > { %2334 = vperm.xlu1 %5991, %v4865_v56  }
 0x6ef   : > { %1292 = vperm.xlu0 %5990, %v1254_v58  }
 0x6f0   : > { %1287 = vperm.xlu1 %5991, %v1253_v59  }
 0x6f3   : > { %1823 = vperm.xlu0 %5990, %v4812_v61  }
 0x6f4   : > { %1818 = vperm.xlu1 %5991, %v4811_v62  }
 0x6f7   : > { %2349 = vperm.xlu0 %5990, %v4868_v28  }
 0x6f8   : > { %2344 = vperm.xlu1 %5991, %v4867_v36  }
 0x6fb   : > { %744 = vperm.xlu0 %5990, %v736_v37  }
 0x6fc   : > { %2496 = vperm.xlu1 %5991, %v2488_v0  }
 0x6ff   : > { %2766 = vperm.xlu0 %5990, %v4887_v1  }
 0x700   : > { %2491 = vperm.xlu1 %5991, %v2487_v2  }
 0x703   : > { %2795 = vperm.xlu0 %5990, %v4894_v3  }
 0x704   : > { %2790 = vperm.xlu1 %5991, %v4893_v4  }
 0x707   : > { %2805 = vperm.xlu0 %5990, %v4896_v5  }
 0x708   : > { %2800 = vperm.xlu1 %5991, %v4895_v6  }
 0x725   : > { %v1970_v8 = vpop.permute.xlu0 %1969 }
 0x726   : > { %v1984_v9 = vmul.f32 %v4822_v7, %v1970_v8  ;;  %v1968_v10 = vpop.permute.xlu1 %1967 }
 0x727   : > { %v1983_v11 = vmul.f32 %v4822_v7, %v1968_v10 }
 0x729   : > { %v5786_v12 = vpack.c.bf16 %v1984_v9, %v1983_v11  ;;  %v1974_v15 = vpop.permute.xlu0 %1973 }
 0x72a   : > { %v1986_v16 = vmul.f32 %v4822_v7, %v1974_v15  ;;  %v1972_v17 = vpop.permute.xlu1 %1971 }
 0x72b   : > { %v1985_v19 = vmul.f32 %v4822_v7, %v1972_v17  ;;  %5787 = vmatprep.subr.bf16.mxu1 %v5786_v12 }
 0x72c   : > { %5789 = vmatpush3.bf16.msra.mxu1 %v5786_v12 }
 0x72d   : > { %v5790_v20 = vpack.c.bf16 %v1986_v16, %v1985_v19  ;;  %v1998_v21 = vpop.permute.xlu0 %1997 }
 0x72e   : > { %v1996_v22 = vpop.permute.xlu1 %1995  ;;  %v2012_v24 = vmul.f32 %v4824_v23, %v1998_v21 }
 0x72f   : > { %5791 = vmatprep.subr.bf16.mxu1 %v5790_v20  ;;  %v2011_v25 = vmul.f32 %v4824_v23, %v1996_v22 }
 0x730   : > { %5793 = vmatpush3.bf16.msra.mxu1 %v5790_v20 }
 0x731   : > { %5795 = vmatprep.subr.bf16.mxu1 %v6611_v57  ;;  %v2002_v26 = vpop.permute.xlu0 %2001  ;;  %v5802_v29 = vpack.c.bf16 %v2012_v24, %v2011_v25 }
 0x732   : > { %v2000_v27 = vpop.permute.xlu1 %1999  ;;  %v2014_v31 = vmul.f32 %v4824_v23, %v2002_v26 }
 0x733   : > { %v2013_v32 = vmul.f32 %v4824_v23, %v2000_v27 }
 0x734   : > { %5797 = vmatpush3.bf16.msra.mxu1 %v6611_v57  ;;  %v4827_v57 = vld [vmem:[%s7382_s9 + $0x90] sm:$0xff] }
 0x735   : > { %5799 = vmatprep.subr.bf16.mxu1 %v6617_v34  ;;  %v5806_v60 = vpack.c.bf16 %v2014_v31, %v2013_v32 }
 0x738   : > { %5801 = vmatpush3.bf16.msra.mxu1 %v6617_v34  ;;  %v4828_v34 = vld [vmem:[%s7382_s9 + $0x98] sm:$0xff] }
 0x739   : > { %5803 = vmatprep.subr.bf16.mxu1 %v5802_v29 }
 0x73c   : > { %5805 = vmatpush3.bf16.msra.mxu1 %v5802_v29 }
 0x73d   : > { %5807 = vmatprep.subr.bf16.mxu1 %v5806_v60 }
 0x740   : > { %5809 = vmatpush3.bf16.msra.mxu1 %v5806_v60 }
 0x742   : > { %v2077_v43 = vpop.permute.xlu0 %2076 }
 0x743   : > { %5483 = vmatmul.mubr.msk.f32.vlgmr.msra.gmra.mrb[12].mxu1 %vm1029_vm1, %v4826_v33  ;;  %v2072_v44 = vpop.permute.xlu1 %2071 }
 0x744   : > { %5485 = vmatprep.mubr.msk.f32.mxu1 %vm1029_vm1, %v4827_v57 }
 0x746   : > { %v2246_v45 = vpop.permute.xlu0 %2245 }
 0x747   : > { %5486 = vmatmul.mubr.msk.f32.gmra.mrb[14].mxu1 %vm1029_vm1, %v4828_v34  ;;  %v2241_v46 = vpop.permute.xlu1 %2240 }
 0x748   : > { %5488 = vmatprep.mubr.msk.f32.mxu1 %vm1029_vm1, %v4829_v14 }
 0x74a   : > { %v2087_v47 = vpop.permute.xlu0 %2086 }
 0x74b   : > { %5489 = vmatmul.mubr.msk.f32.gmra.mrb[16].mxu1 %vm1029_vm1, %v4830_v30  ;;  %v2082_v48 = vpop.permute.xlu1 %2081 }
 0x74c   : > { %5491 = vmatprep.mubr.msk.f32.mxu1 %vm1029_vm1, %v4831_v63 }
 0x74e   : > { %v2256_v50 = vpop.permute.xlu0 %2255 }
 0x74f   : > { %5492 = vmatmul.mubr.msk.f32.gmra.mrb[18].mxu1 %vm1029_vm1, %v4832_v35  ;;  %v2251_v52 = vpop.permute.xlu1 %2250 }
 0x752   : > { %v2057_v55 = vpop.permute.xlu0 %2056 }
 0x753   : > { %v2052_v56 = vpop.permute.xlu1 %2051 }
 0x756   : > { %v2226_v0 = vpop.permute.xlu0 %2225 }
 0x757   : > { %v2221_v4 = vpop.permute.xlu1 %2220 }
 0x75a   : > { %v2067_v12 = vpop.permute.xlu0 %2066 }
 0x75b   : > { %v2062_v16 = vpop.permute.xlu1 %2061 }
 0x75e   : > { %v2236_v23 = vpop.permute.xlu0 %2235 }
 0x75f   : > { %v2231_v25 = vpop.permute.xlu1 %2230 }
 0x816   : > { %v5484_v49 = vpop.f32.mrb[12].mxu1 }
 0x817   : > { %v2179_v51 = vpop.f32.mrb[13].mxu1  ;;  %v2185_v10 = vadd.f32 %v5484_v49, %v2057_v55  ;;  %v4856_v49 = vld [vmem:[%s7384_s11 + $0x98] sm:$0xff]  ;;  %v1283_v55 = vpop.permute.xlu0 %1282 }
 0x818   : > { %v2180_v15 = vadd.f32 %v2179_v51, %v2052_v56  ;;  %v4858_v51 = vld [vmem:[%s7384_s11 + $0xa8] sm:$0xff]  ;;  %v1278_v56 = vpop.permute.xlu1 %1277 }
 0x819   : > { %v2259_v17 = vadd.f32 %v2226_v0, %v2185_v10 }
 0x81a   : > { %v5487_v53 = vpop.f32.mrb[14].mxu1  ;;  %v2258_v20 = vadd.f32 %v2221_v4, %v2180_v15 }
 0x81b   : > { %v2189_v54 = vpop.f32.mrb[15].mxu1  ;;  %v2195_v19 = vadd.f32 %v5487_v53, %v2067_v12  ;;  %v4860_v53 = vld [vmem:[%s7384_s11 + $0xb8] sm:$0xff] }
 0x81c   : > { %v2190_v21 = vadd.f32 %v2189_v54, %v2062_v16  ;;  %v2485_v54 = vld [vmem:[%s7386_s13] sm:$0xff] }
 0x81d   : > { %v2261_v26 = vadd.f32 %v2236_v23, %v2195_v19  ;;  %5522 = vmatprep.mubr.msk.f32.mxu1 %vm1295_vm2, %v2485_v54 }
 0x81e   : > { %v5490_v58 = vpop.f32.mrb[16].mxu1  ;;  %v2260_v29 = vadd.f32 %v2231_v25, %v2190_v21  ;;  %v6810_v21 = vld [vmem:[%s6293_s25] ss:$0 sm:$0xff] }
 0x81f   : > { %v2205_v59 = vadd.f32 %v5490_v58, %v2077_v43  ;;  %v2199_v61 = vpop.f32.mrb[17].mxu1  ;;  %v1814_v58 = vpop.permute.xlu0 %1813 }
 0x820   : > { %v2200_v62 = vadd.f32 %v2199_v61, %v2072_v44  ;;  %v5934_v4 = vadd.f32 %v1814_v58, %v1283_v55  ;;  %v4890_v55 = vld [vmem:[%s7380_s7 + $0x28] sm:$0xff]  ;;  %v4892_v58 = vld [vmem:[%s7380_s7 + $0x38] sm:$0xff] }
 0x821   : > { %v2263_v28 = vadd.f32 %v2246_v45, %v2205_v59  ;;  %v1809_v59 = vpop.permute.xlu1 %1808 }
 0x822   : > { %v2262_v36 = vadd.f32 %v2241_v46, %v2200_v62  ;;  %v5493_v37 = vpop.f32.mrb[18].mxu1 }
 0x823   : > { %v4850_v1 = vmul.f32 -1.442695, %v2263_v28  ;;  %v2215_v2 = vadd.f32 %v5493_v37, %v2087_v47  ;;  %v2209_v3 = vpop.f32.mrb[19].mxu1  ;;  %v4854_v47 = vld [vmem:[%s7384_s11 + $0x88] sm:$0xff]  ;;  %v2340_v61 = vpop.permute.xlu0 %2339 }
 0x824   : > { %v4849_v5 = vmul.f32 -1.442695, %v2262_v36  ;;  %v2210_v6 = vadd.f32 %v2209_v3, %v2082_v48  ;;  %v4855_v48 = vld [vmem:[%s7384_s11 + $0x90] sm:$0xff] }
 0x825   : > { %6040 = vpow2.f32 %v4850_v1  ;;  %v2265_v7 = vadd.f32 %v2256_v50, %v2215_v2  ;;  %v4857_v50 = vld [vmem:[%s7384_s11 + $0xa0] sm:$0xff]  ;;  %v2335_v62 = vpop.permute.xlu1 %2334 }
 0x826   : > { %6042 = vpow2.f32 %v4849_v5  ;;  %v2264_v8 = vadd.f32 %v2251_v52, %v2210_v6  ;;  %v4859_v52 = vld [vmem:[%s7384_s11 + $0xb0] sm:$0xff]  ;;  %v5937_v6 = vadd.f32 %v1809_v59, %v1278_v56 }
 0x827   : > { %v4852_v9 = vmul.f32 -1.442695, %v2265_v7  ;;  %v1293_v28 = vpop.permute.xlu0 %1292  ;;  %v5935_v7 = vadd.f32 %v5934_v4, %v2340_v61  ;;  %v4891_v56 = vld [vmem:[%s7380_s7 + $0x30] sm:$0xff] }
 0x828   : > { %v4851_v11 = vmul.f32 -1.442695, %v2264_v8  ;;  %v5938_v8 = vadd.f32 %v5937_v6, %v2335_v62 }
 0x829   : > { %6044 = vpow2.f32 %v4852_v9  ;;  %v1288_v36 = vpop.permute.xlu1 %1287 }
 0x82a   : > { %6046 = vpow2.f32 %v4851_v11 }
 0x82b   : > { %6048 = vtanh.f32 %v2259_v17  ;;  %v1824_v1 = vpop.permute.xlu0 %1823 }
 0x82c   : > { %6050 = vtanh.f32 %v2258_v20  ;;  %v5940_v11 = vadd.f32 %v1824_v1, %v1293_v28 }
 0x82d   : > { %v1819_v2 = vpop.permute.xlu1 %1818 }
 0x82e   : > { %v5943_v17 = vadd.f32 %v1819_v2, %v1288_v36 }
 0x82f   : > { %v6041_v22 = vpop.eup %6040  ;;  %v2350_v9 = vpop.permute.xlu0 %2349 }
 0x830   : > { %v6043_v24 = vpop.eup %6042  ;;  %v2283_v27 = vadd.f32 1.0, %v6041_v22  ;;  %v5941_v20 = vadd.f32 %v5940_v11, %v2350_v9  ;;  %v4928_v11 = vld [vmem:[%s7382_s9 + $0xc0] sm:$0xff] }
 0x831   : > { %v2282_v31 = vadd.f32 1.0, %v6043_v24  ;;  %v2345_v12 = vpop.permute.xlu1 %2344 }
 0x832   : > { %6052 = vrcp.f32 %v2283_v27  ;;  %v5944_v23 = vadd.f32 %v5943_v17, %v2345_v12  ;;  %v4940_v12 = vld [vmem:[%s7383_s10 + $0xe0] sm:$0xff]  ;;  %v4943_v17 = vld [vmem:[%s7383_s10 + $0xf8] sm:$0xff] }
 0x833   : > { %v6045_v32 = vpop.eup %6044  ;;  %6054 = vrcp.f32 %v2282_v31 }
 0x834   : > { %v6047_v60 = vpop.eup %6046  ;;  %6056 = vtanh.f32 %v2261_v26  ;;  %v2285_v33 = vadd.f32 1.0, %v6045_v32 }
 0x835   : > { %6058 = vtanh.f32 %v2260_v29  ;;  %v2284_v57 = vadd.f32 1.0, %v6047_v60  ;;  %v6049_v34 = vpop.eup %6048 }
 0x836   : > { %6060 = vrcp.f32 %v2285_v33  ;;  %v6051_v14 = vpop.eup %6050 }
 0x837   : > { %6062 = vrcp.f32 %v2284_v57  ;;  %v2486_v57 = vld [vmem:[%s7386_s13 + $0x8] sm:$0xff] }
 0x83c   : > { %v6053_v30 = vpop.eup %6052 }
 0x83d   : > { %v6055_v63 = vpop.eup %6054  ;;  %v2295_v35 = vmul.f32 %v6053_v30, %v6049_v34  ;;  %v4881_v34 = vld [vmem:[%s7378_s5 + $0x10] sm:$0xff] }
 0x83e   : > { %v6057_v38 = vpop.eup %6056  ;;  %v2294_v39 = vmul.f32 %v6055_v63, %v6051_v14  ;;  %v2497_v14 = vpop.permute.xlu1 %2496 }
 0x83f   : > { %v6059_v40 = vpop.eup %6058 }
 0x840   : > { %v6061_v41 = vpop.eup %6060  ;;  %v5810_v42 = vpack.c.bf16 %v2295_v35, %v2294_v39  ;;  %v745_v39 = vpop.permute.xlu0 %744 }
 0x841   : > { %v6063_v43 = vpop.eup %6062  ;;  %v2297_v44 = vmul.f32 %v6061_v41, %v6057_v38 }
 0x842   : > { %5811 = vmatprep.subr.bf16.mxu0 %v5810_v42  ;;  %v2296_v45 = vmul.f32 %v6063_v43, %v6059_v40  ;;  %v748_v40 = vadd.f32 %v6295_v13, %v745_v39  ;;  %v2492_v43 = vpop.permute.xlu1 %2491  ;;  %v4880_v13 = vld [vmem:[%s7377_s4 + $0x18] sm:$0xff] }
 0x843   : > { %5813 = vmatpush3.bf16.msra.mxu0 %v5810_v42 }
 0x844   : > { %v5814_v46 = vpack.c.bf16 %v2297_v44, %v2296_v45  ;;  %v756_v41 = vmul.f32 %v6810_v21, %v748_v40 }
 0x846   : > { %5815 = vmatprep.subr.bf16.mxu0 %v5814_v46  ;;  %v2791_v61 = vpop.permute.xlu1 %2790 }
 0x847   : > { %5817 = vmatpush3.bf16.msra.mxu0 %v5814_v46 }
 0x84a   : > { %5503 = vmatmul.mubr.msk.f32.vlgmr.msra.gmra.mrb[22].mxu0 %vm1295_vm2, %v4854_v47  ;;  %v2801_v4 = vpop.permute.xlu1 %2800 }
 0x84b   : > { %5505 = vmatprep.mubr.msk.f32.mxu0 %vm1295_vm2, %v4855_v48  ;;  %v4882_v48 = vld [vmem:[%s7378_s5 + $0x18] sm:$0xff] }
 0x84e   : > { %5506 = vmatmul.mubr.msk.f32.gmra.mrb[24].mxu0 %vm1295_vm2, %v4856_v49  ;;  %v4879_v49 = vld [vmem:[%s7377_s4 + $0x10] sm:$0xff] }
 0x84f   : > { %5508 = vmatprep.mubr.msk.f32.mxu0 %vm1295_vm2, %v4857_v50  ;;  %v4889_v50 = vld [vmem:[%s7380_s7 + $0x20] sm:$0xff] }
 0x852   : > { %5509 = vmatmul.mubr.msk.f32.gmra.mrb[6].mxu0 %vm1295_vm2, %v4858_v51 }
 0x853   : > { %5511 = vmatprep.mubr.msk.f32.mxu0 %vm1295_vm2, %v4859_v52  ;;  %v2767_v52 = vpop.permute.xlu0 %2766 }
 0x856   : > { %5512 = vmatmul.mubr.msk.f32.gmra.mrb[8].mxu0 %vm1295_vm2, %v4860_v53 }
 0x857   : > { %v2796_v59 = vpop.permute.xlu0 %2795  ;;  %5567 = vmatprep.mubr.msk.f32.mxu0 %vm1029_vm1, %v4928_v11 }
 0x85b   : > { %v2806_v1 = vpop.permute.xlu0 %2805 }
 0x91d   : > { %v5504_v37 = vpop.f32.mrb[22].mxu0 }
 0x91e   : > { %v2442_v0 = vpop.f32.mrb[23].mxu0 }
 0x921   : > { %v5507_v3 = vpop.f32.mrb[24].mxu0 }
 0x922   : > { %v2450_v5 = vpop.f32.mrb[25].mxu0 }
 0x925   : > { %v5510_v10 = vpop.f32.mrb[6].mxu0 }
 0x926   : > { %v5936_v15 = vadd.f32 %v5935_v7, %v5510_v10  ;;  %v2458_v16 = vpop.f32.mrb[7].mxu0  ;;  %v4941_v10 = vld [vmem:[%s7383_s10 + $0xe8] sm:$0xff] }
 0x927   : > { %v5939_v19 = vadd.f32 %v5938_v8, %v2458_v16  ;;  %v4905_v16 = vld [vmem:[%s6355_s0 + $0xe0] sm:$0xff] }
 0x928   : > { %v2482_v22 = vmul.f32 %v6810_v21, %v5936_v15  ;;  %v4906_v15 = vld [vmem:[%s6355_s0 + $0xe8] sm:$0xff] }
 0x929   : > { %v2481_v24 = vmul.f32 %v6810_v21, %v5939_v19  ;;  %v5513_v25 = vpop.f32.mrb[8].mxu0  ;;  %v4942_v19 = vld [vmem:[%s7383_s10 + $0xf0] sm:$0xff] }
 0x92a   : > { %v5942_v26 = vadd.f32 %v5941_v20, %v5513_v25  ;;  %v2468_v27 = vpop.f32.mrb[9].mxu0  ;;  %v4908_v20 = vld [vmem:[%s6355_s0 + $0xf8] sm:$0xff]  ;;  %v4902_v25 = vld [vmem:[%s6355_s0 + $0xc8] sm:$0xff] }
 0x92b   : > { %v5945_v29 = vadd.f32 %v5944_v23, %v2468_v27  ;;  %v5818_v31 = vpack.c.bf16 %v2482_v22, %v2481_v24  ;;  %v4907_v22 = vld [vmem:[%s6355_s0 + $0xf0] sm:$0xff]  ;;  %v4937_v23 = vld [vmem:[%s7383_s10 + $0xc8] sm:$0xff]  ;;  %v4936_v24 = vld [vmem:[%s7383_s10 + $0xc0] sm:$0xff] }
 0x92c   : > { %v2484_v32 = vmul.f32 %v6810_v21, %v5942_v26  ;;  %v4901_v26 = vld [vmem:[%s6355_s0 + $0xc0] sm:$0xff]  ;;  %v4939_v27 = vld [vmem:[%s7383_s10 + $0xd8] sm:$0xff] }
 0x92d   : > { %v2483_v60 = vmul.f32 %v6810_v21, %v5945_v29  ;;  %5819 = vmatprep.subr.bf16.mxu1 %v5818_v31  ;;  %v4938_v29 = vld [vmem:[%s7383_s10 + $0xd0] sm:$0xff] }
 0x92e   : > { %5821 = vmatpush3.bf16.msra.mxu1 %v5818_v31  ;;  %v4904_v31 = vld [vmem:[%s6355_s0 + $0xd8] sm:$0xff] }
 0x92f   : > { %v5822_v33 = vpack.c.bf16 %v2484_v32, %v2483_v60  ;;  %v4903_v32 = vld [vmem:[%s6355_s0 + $0xd0] sm:$0xff]  ;;  %v4965_v60 = vld [vmem:[%s7385_s12 + $0xc8] sm:$0xff] }
 0x931   : > { %5823 = vmatprep.subr.bf16.mxu1 %v5822_v33 }
 0x932   : > { %5825 = vmatpush3.bf16.msra.mxu1 %v5822_v33  ;;  %v4964_v33 = vld [vmem:[%s7385_s12 + $0xc0] sm:$0xff] }
 0x935   : > { %5523 = vmatmul.mubr.msk.f32.vlgmr.msra.gmra.mrb[20].mxu1 %vm1295_vm2, %v2486_v57  ;;  %v4967_v57 = vld [vmem:[%s7385_s12 + $0xd8] sm:$0xff] }
 0x936   : > { %5527 = vmatprep.mubr.msk.f32.mxu1 %vm572_vm0, %v4881_v34  ;;  %v4966_v34 = vld [vmem:[%s7385_s12 + $0xd0] sm:$0xff] }
 0xa08   : > { %v5524_v30 = vpop.f32.mrb[20].mxu1 }
 0xa09   : > { %v6824_v63 = vadd.f32 %v5524_v30, %v2497_v14  ;;  %v2571_v35 = vpop.f32.mrb[21].mxu1  ;;  %v4925_v14 = vld [vmem:[%s7375_s2] ss:$0 sm:$0xff] }
 0xa0a   : > { %v2572_v44 = vadd.f32 %v2571_v35, %v2492_v43 }
 0xa0b   : > { %v2580_v38 = vmul.f32 1.442695, %v6824_v63 }
 0xa0d   : > { %6064 = vpow2.f32 %v2580_v38 }
 0xa17   : > { %v6065_v42 = vpop.eup %6064 }
 0xa18   : > { %v2582_v45 = vmul.f32 %v6065_v42, %v756_v41 }
 0xa1a   : > { %v2583_v46 = vadd.f32 %v2582_v45, %v2572_v44 }
 0xa1c   : > { %v2584_v47 = vmul.f32 %v6810_v21, %v2583_v46 }
 0xa1e   : > { %5525 = vmatprep.subr.mxu1 %v2584_v47 }
 0xa1f   : > { %5526 = vmatpush3.msra.mxu1 %v2584_v47 }
 0xa20   : > { %5528 = vmatmul.mubr.msk.f32.vlgmr.msra.gmra.mrb[22].mxu1 %vm572_vm0, %v4882_v48  ;;  %5530 = vmatprep.subr.mxu1 %v6301_v18 }
 0xa21   : > { %5531 = vmatpush3.msra.mxu1 %v6301_v18  ;;  %5532 = vmatprep.mubr.msk.f32.mxu1 %vm572_vm0, %v4879_v49  ;;  %v4927_v49 = vld [vmem:[%s7375_s2 + $0x2] ss:$0 sm:$0xff] }
 0xa28   : > { %5533 = vmatmul.mubr.msk.f32.vlgmr.msra.gmra.mrb[22].mxu1 %vm572_vm0, %v4880_v13 }
 0xa29   : > { %5537 = vmatprep.mubr.msk.f32.mxu1 %vm572_vm0, %v4889_v50 }
 0xafb   : > { %v6848_v51 = vpop.f32.mrb[22].mxu1 }
 0xafc   : > { %v2752_v53 = vpop.f32.mrb[23].mxu1 }
 0xafd   : > { %v2774_v54 = vadd.f32 %v2767_v52, %v2752_v53 }
 0xaff   : > { %v2776_v18 = vmul.f32 %v6810_v21, %v2774_v54 }
 0xb01   : > { %4616 = vst [vmem:[%s6855_s30] sm:$0xff] %v2776_v18  ;;  %5535 = vmatprep.subr.mxu1 %v2776_v18 }
 0xb02   : > { %5536 = vmatpush3.msra.mxu1 %v2776_v18 }
 0xb03   : > { %5538 = vmatmul.mubr.msk.f32.vlgmr.msra.gmra.mrb[24].mxu1 %vm572_vm0, %v4890_v55 }
 0xb04   : > { %5540 = vmatprep.mubr.msk.f32.mxu1 %vm572_vm0, %v4891_v56 }
 0xb07   : > { %5541 = vmatmul.mubr.msk.f32.gmra.mrb[26].mxu1 %vm572_vm0, %v4892_v58 }
 0xbd6   : > { %v5539_v62 = vpop.f32.mrb[24].mxu1 }
 0xbd7   : > { %v2892_v28 = vadd.f32 %v5539_v62, %v2796_v59  ;;  %v2886_v36 = vpop.f32.mrb[25].mxu1  ;;  %v4929_v59 = vld [vmem:[%s7382_s9 + $0xc8] sm:$0xff]  ;;  %v4931_v62 = vld [vmem:[%s7382_s9 + $0xd8] sm:$0xff] }
 0xbd8   : > { %v2887_v37 = vadd.f32 %v2886_v36, %v2791_v61  ;;  %v4930_v61 = vld [vmem:[%s7382_s9 + $0xd0] sm:$0xff]  ;;  %v4933_v36 = vld [vmem:[%s7382_s9 + $0xe8] sm:$0xff] }
 0xbd9   : > { %v6872_v0 = vmul.f32 %v6810_v21, %v2892_v28  ;;  %v4932_v28 = vld [vmem:[%s7382_s9 + $0xe0] sm:$0xff] }
 0xbda   : > { %v6875_v2 = vmul.f32 %v6810_v21, %v2887_v37  ;;  %v5542_v3 = vpop.f32.mrb[26].mxu1  ;;  %v4934_v37 = vld [vmem:[%s7382_s9 + $0xf0] sm:$0xff] }
 0xbdb   : > { %v2902_v5 = vadd.f32 %v5542_v3, %v2806_v1  ;;  %2936 = vrot.lane.b32.xlu0 %v6872_v0, %s7402_s17  ;;  %v2896_v6 = vpop.f32.mrb[27].mxu1  ;;  %v4935_v1 = vld [vmem:[%s7382_s9 + $0xf8] sm:$0xff]  ;;  %v4956_v3 = vld [vmem:[%s7384_s11 + $0xc0] sm:$0xff] }
 0xbdc   : > { %v2897_v7 = vadd.f32 %v2896_v6, %v2801_v4  ;;  %2934 = vrot.lane.b32.xlu1 %v6875_v2, %s7402_s17  ;;  %v5834_v48 = vpack.c.bf16 %v6872_v0, %v6875_v2  ;;  %5587 = vmatprep.mubr.msk.f32.mxu1 %vm1295_vm2, %v4956_v3 }
 0xbdd   : > { %v6882_v8 = vmul.f32 %v6810_v21, %v2902_v5 }
 0xbde   : > { %v6885_v9 = vmul.f32 %v6810_v21, %v2897_v7 }
 0xbdf   : > { %2940 = vrot.lane.b32.xlu0 %v6882_v8, %s7402_s17 }
 0xbe0   : > { %2938 = vrot.lane.b32.xlu1 %v6885_v9, %s7402_s17  ;;  %v5838_v52 = vpack.c.bf16 %v6882_v8, %v6885_v9 }
 0xbe3   : > { %2963 = vrot.lane.b32.xlu0 %v6872_v0, %s7401_s23 }
 0xbe4   : > { %2961 = vrot.lane.b32.xlu1 %v6875_v2, %s7401_s23 }
 0xbe7   : > { %2967 = vrot.lane.b32.xlu0 %v6882_v8, %s7401_s23 }
 0xbe8   : > { %2965 = vrot.lane.b32.xlu1 %v6885_v9, %s7401_s23 }
 0xbeb   : > { %3041 = vperm.xlu0 %5990, %v4941_v10  }
 0xbec   : > { %3036 = vperm.xlu1 %5991, %v4940_v12  }
 0xbef   : > { %3210 = vperm.xlu0 %5990, %v4906_v15  }
 0xbf0   : > { %3205 = vperm.xlu1 %5991, %v4905_v16  }
 0xbf3   : > { %3051 = vperm.xlu0 %5990, %v4943_v17  }
 0xbf4   : > { %3046 = vperm.xlu1 %5991, %v4942_v19  }
 0xbf7   : > { %3220 = vperm.xlu0 %5990, %v4908_v20  }
 0xbf8   : > { %3215 = vperm.xlu1 %5991, %v4907_v22  }
 0xbfb   : > { %3021 = vperm.xlu0 %5990, %v4937_v23  }
 0xbfc   : > { %3016 = vperm.xlu1 %5991, %v4936_v24  }
 0xbff   : > { %3190 = vperm.xlu0 %5990, %v4902_v25  }
 0xc00   : > { %3185 = vperm.xlu1 %5991, %v4901_v26  }
 0xc03   : > { %3031 = vperm.xlu0 %5990, %v4939_v27  }
 0xc04   : > { %3026 = vperm.xlu1 %5991, %v4938_v29  }
 0xc07   : > { %3200 = vperm.xlu0 %5990, %v4904_v31  }
 0xc08   : > { %3195 = vperm.xlu1 %5991, %v4903_v32  }
 0xc0b   : > { %3288 = vperm.xlu0 %5990, %v4965_v60  }
 0xc0c   : > { %3283 = vperm.xlu1 %5991, %v4964_v33  }
 0xc0f   : > { %3298 = vperm.xlu0 %5990, %v4967_v57  }
 0xc10   : > { %3293 = vperm.xlu1 %5991, %v4966_v34  }
 0xc4d   : > { %v2937_v30 = vpop.permute.xlu0 %2936 }
 0xc4e   : > { %v2950_v35 = vmul.f32 %v4925_v14, %v2937_v30  ;;  %v2935_v38 = vpop.permute.xlu1 %2934 }
 0xc4f   : > { %v2949_v39 = vmul.f32 %v4925_v14, %v2935_v38 }
 0xc51   : > { %v5826_v40 = vpack.c.bf16 %v2950_v35, %v2949_v39  ;;  %v2941_v41 = vpop.permute.xlu0 %2940 }
 0xc52   : > { %v2952_v42 = vmul.f32 %v4925_v14, %v2941_v41  ;;  %v2939_v43 = vpop.permute.xlu1 %2938 }
 0xc53   : > { %v2951_v44 = vmul.f32 %v4925_v14, %v2939_v43  ;;  %5827 = vmatprep.subr.bf16.mxu0 %v5826_v40 }
 0xc54   : > { %5829 = vmatpush3.bf16.msra.mxu0 %v5826_v40 }
 0xc55   : > { %v5830_v45 = vpack.c.bf16 %v2952_v42, %v2951_v44  ;;  %v2964_v46 = vpop.permute.xlu0 %2963 }
 0xc56   : > { %v2962_v47 = vpop.permute.xlu1 %2961  ;;  %v2977_v13 = vmul.f32 %v4927_v49, %v2964_v46 }
 0xc57   : > { %5831 = vmatprep.subr.bf16.mxu0 %v5830_v45  ;;  %v2976_v50 = vmul.f32 %v4927_v49, %v2962_v47 }
 0xc58   : > { %5833 = vmatpush3.bf16.msra.mxu0 %v5830_v45 }
 0xc59   : > { %5835 = vmatprep.subr.bf16.mxu0 %v5834_v48  ;;  %v2968_v53 = vpop.permute.xlu0 %2967  ;;  %v5842_v18 = vpack.c.bf16 %v2977_v13, %v2976_v50 }
 0xc5a   : > { %v2966_v54 = vpop.permute.xlu1 %2965  ;;  %v2979_v55 = vmul.f32 %v4927_v49, %v2968_v53 }
 0xc5b   : > { %v2978_v56 = vmul.f32 %v4927_v49, %v2966_v54 }
 0xc5c   : > { %5837 = vmatpush3.bf16.msra.mxu0 %v5834_v48 }
 0xc5d   : > { %5839 = vmatprep.subr.bf16.mxu0 %v5838_v52  ;;  %v5846_v58 = vpack.c.bf16 %v2979_v55, %v2978_v56 }
 0xc60   : > { %5841 = vmatpush3.bf16.msra.mxu0 %v5838_v52 }
 0xc61   : > { %5843 = vmatprep.subr.bf16.mxu0 %v5842_v18 }
 0xc64   : > { %5845 = vmatpush3.bf16.msra.mxu0 %v5842_v18 }
 0xc65   : > { %5847 = vmatprep.subr.bf16.mxu0 %v5846_v58 }
 0xc68   : > { %5849 = vmatpush3.bf16.msra.mxu0 %v5846_v58 }
 0xc6a   : > { %v3042_v4 = vpop.permute.xlu0 %3041 }
 0xc6b   : > { %5568 = vmatmul.mubr.msk.f32.vlgmr.msra.gmra.mrb[26].mxu0 %vm1029_vm1, %v4929_v59  ;;  %v3037_v5 = vpop.permute.xlu1 %3036 }
 0xc6c   : > { %5570 = vmatprep.mubr.msk.f32.mxu0 %vm1029_vm1, %v4930_v61 }
 0xc6e   : > { %v3211_v6 = vpop.permute.xlu0 %3210 }
 0xc6f   : > { %5571 = vmatmul.mubr.msk.f32.gmra.mrb[28].mxu0 %vm1029_vm1, %v4931_v62  ;;  %v3206_v7 = vpop.permute.xlu1 %3205 }
 0xc70   : > { %5573 = vmatprep.mubr.msk.f32.mxu0 %vm1029_vm1, %v4932_v28 }
 0xc72   : > { %v3052_v10 = vpop.permute.xlu0 %3051 }
 0xc73   : > { %5574 = vmatmul.mubr.msk.f32.gmra.mrb[30].mxu0 %vm1029_vm1, %v4933_v36  ;;  %v3047_v11 = vpop.permute.xlu1 %3046 }
 0xc74   : > { %5576 = vmatprep.mubr.msk.f32.mxu0 %vm1029_vm1, %v4934_v37 }
 0xc76   : > { %v3221_v15 = vpop.permute.xlu0 %3220 }
 0xc77   : > { %5577 = vmatmul.mubr.msk.f32.gmra.mrb[32].mxu0 %vm1029_vm1, %v4935_v1  ;;  %v3216_v17 = vpop.permute.xlu1 %3215 }
 0xc7a   : > { %v3022_v22 = vpop.permute.xlu0 %3021 }
 0xc7b   : > { %v3017_v23 = vpop.permute.xlu1 %3016 }
 0xc7e   : > { %v3191_v60 = vpop.permute.xlu0 %3190 }
 0xc7f   : > { %v3186_v14 = vpop.permute.xlu1 %3185 }
 0xc82   : > { %v3032_v43 = vpop.permute.xlu0 %3031 }
 0xc83   : > { %v3027_v45 = vpop.permute.xlu1 %3026 }
 0xc86   : > { %v3201_v50 = vpop.permute.xlu0 %3200 }
 0xc87   : > { %v3196_v53 = vpop.permute.xlu1 %3195 }
 0xd3e   : > { %v5569_v12 = vpop.f32.mrb[26].mxu0 }
 0xd3f   : > { %v3144_v16 = vpop.f32.mrb[27].mxu0  ;;  %v3150_v41 = vadd.f32 %v5569_v12, %v3022_v22  ;;  %v3289_v22 = vpop.permute.xlu0 %3288 }
 0xd40   : > { %v3145_v44 = vadd.f32 %v3144_v16, %v3017_v23  ;;  %v3284_v23 = vpop.permute.xlu1 %3283 }
 0xd41   : > { %v3224_v46 = vadd.f32 %v3191_v60, %v3150_v41  ;;  %v4963_v41 = vld [vmem:[%s7384_s11 + $0xf8] sm:$0xff] }
 0xd42   : > { %v5572_v19 = vpop.f32.mrb[28].mxu0  ;;  %v3223_v48 = vadd.f32 %v3186_v14, %v3145_v44  ;;  %v4996_v44 = vld [vmem:[%s7383_s10 + $0x120] sm:$0xff] }
 0xd43   : > { %v3154_v20 = vpop.f32.mrb[29].mxu0  ;;  %v3160_v47 = vadd.f32 %v5572_v19, %v3032_v43  ;;  %v4958_v19 = vld [vmem:[%s7384_s11 + $0xd0] sm:$0xff]  ;;  %v4984_v43 = vld [vmem:[%s7382_s9 + $0x100] sm:$0xff] }
 0xd44   : > { %v3155_v49 = vadd.f32 %v3154_v20, %v3027_v45  ;;  %v4959_v20 = vld [vmem:[%s7384_s11 + $0xd8] sm:$0xff]  ;;  %v4914_v45 = vld [vmem:[%s6355_s0 + $0x128] sm:$0xff] }
 0xd45   : > { %v3226_v54 = vadd.f32 %v3201_v50, %v3160_v47  ;;  %v4999_v47 = vld [vmem:[%s7383_s10 + $0x138] sm:$0xff]  ;;  %v4993_v50 = vld [vmem:[%s7383_s10 + $0x108] sm:$0xff] }
 0xd46   : > { %v5575_v24 = vpop.f32.mrb[30].mxu0  ;;  %v3225_v55 = vadd.f32 %v3196_v53, %v3155_v49  ;;  %v4916_v49 = vld [vmem:[%s6355_s0 + $0x138] sm:$0xff]  ;;  %v4910_v53 = vld [vmem:[%s6355_s0 + $0x108] sm:$0xff] }
 0xd47   : > { %v3170_v25 = vadd.f32 %v5575_v24, %v3042_v4  ;;  %v3164_v26 = vpop.f32.mrb[31].mxu0 }
 0xd48   : > { %v3165_v27 = vadd.f32 %v3164_v26, %v3037_v5 }
 0xd49   : > { %v3228_v29 = vadd.f32 %v3211_v6, %v3170_v25 }
 0xd4a   : > { %v3227_v31 = vadd.f32 %v3206_v7, %v3165_v27  ;;  %v5578_v32 = vpop.f32.mrb[32].mxu0 }
 0xd4b   : > { %v4953_v33 = vmul.f32 -1.442695, %v3228_v29  ;;  %v3180_v57 = vadd.f32 %v5578_v32, %v3052_v10  ;;  %v3174_v34 = vpop.f32.mrb[33].mxu0 }
 0xd4c   : > { %v4952_v30 = vmul.f32 -1.442695, %v3227_v31  ;;  %v3175_v35 = vadd.f32 %v3174_v34, %v3047_v11  ;;  %v3299_v31 = vpop.permute.xlu0 %3298 }
 0xd4d   : > { %6066 = vpow2.f32 %v4953_v33  ;;  %v3230_v38 = vadd.f32 %v3221_v15, %v3180_v57  ;;  %v3294_v33 = vpop.permute.xlu1 %3293 }
 0xd4e   : > { %6068 = vpow2.f32 %v4952_v30  ;;  %v3229_v39 = vadd.f32 %v3216_v17, %v3175_v35  ;;  %v4957_v17 = vld [vmem:[%s7384_s11 + $0xc8] sm:$0xff] }
 0xd4f   : > { %v4955_v40 = vmul.f32 -1.442695, %v3230_v38 }
 0xd50   : > { %v4954_v42 = vmul.f32 -1.442695, %v3229_v39 }
 0xd51   : > { %6070 = vpow2.f32 %v4955_v40  ;;  %v4962_v40 = vld [vmem:[%s7384_s11 + $0xf0] sm:$0xff] }
 0xd52   : > { %6072 = vpow2.f32 %v4954_v42  ;;  %v4997_v42 = vld [vmem:[%s7383_s10 + $0x128] sm:$0xff] }
 0xd53   : > { %6074 = vtanh.f32 %v3224_v46  ;;  %v4913_v46 = vld [vmem:[%s6355_s0 + $0x120] sm:$0xff] }
 0xd54   : > { %6076 = vtanh.f32 %v3223_v48  ;;  %v4998_v48 = vld [vmem:[%s7383_s10 + $0x130] sm:$0xff] }
 0xd57   : > { %v6067_v13 = vpop.eup %6066 }
 0xd58   : > { %v6069_v52 = vpop.eup %6068  ;;  %v3248_v18 = vadd.f32 1.0, %v6067_v13  ;;  %v4915_v13 = vld [vmem:[%s6355_s0 + $0x130] sm:$0xff] }
 0xd59   : > { %v3247_v56 = vadd.f32 1.0, %v6069_v52  ;;  %v4992_v52 = vld [vmem:[%s7383_s10 + $0x100] sm:$0xff] }
 0xd5a   : > { %6078 = vrcp.f32 %v3248_v18  ;;  %v4995_v18 = vld [vmem:[%s7383_s10 + $0x118] sm:$0xff] }
 0xd5b   : > { %v6071_v58 = vpop.eup %6070  ;;  %6080 = vrcp.f32 %v3247_v56  ;;  %v4912_v56 = vld [vmem:[%s6355_s0 + $0x118] sm:$0xff] }
 0xd5c   : > { %v6073_v59 = vpop.eup %6072  ;;  %6082 = vtanh.f32 %v3226_v54  ;;  %v3250_v61 = vadd.f32 1.0, %v6071_v58  ;;  %v4909_v54 = vld [vmem:[%s6355_s0 + $0x100] sm:$0xff]  ;;  %v4911_v58 = vld [vmem:[%s6355_s0 + $0x110] sm:$0xff] }
 0xd5d   : > { %6084 = vtanh.f32 %v3225_v55  ;;  %v3249_v62 = vadd.f32 1.0, %v6073_v59  ;;  %v6075_v28 = vpop.eup %6074  ;;  %v4994_v55 = vld [vmem:[%s7383_s10 + $0x110] sm:$0xff]  ;;  %v5021_v59 = vld [vmem:[%s7385_s12 + $0x108] sm:$0xff] }
 0xd5e   : > { %6086 = vrcp.f32 %v3250_v61  ;;  %v6077_v36 = vpop.eup %6076  ;;  %v5020_v61 = vld [vmem:[%s7385_s12 + $0x100] sm:$0xff] }
 0xd5f   : > { %6088 = vrcp.f32 %v3249_v62  ;;  %v5023_v62 = vld [vmem:[%s7385_s12 + $0x118] sm:$0xff] }
 0xd64   : > { %v6079_v37 = vpop.eup %6078 }
 0xd65   : > { %v6081_v1 = vpop.eup %6080  ;;  %v3260_v3 = vmul.f32 %v6079_v37, %v6075_v28  ;;  %v5022_v28 = vld [vmem:[%s7385_s12 + $0x110] sm:$0xff] }
 0xd66   : > { %v6083_v4 = vpop.eup %6082  ;;  %v3259_v5 = vmul.f32 %v6081_v1, %v6077_v36  ;;  %v4981_v36 = vld [vmem:[%s7375_s2 + $0x3] ss:$0 sm:$0xff] }
 0xd67   : > { %v6085_v6 = vpop.eup %6084 }
 0xd68   : > { %v6087_v7 = vpop.eup %6086  ;;  %v5850_v10 = vpack.c.bf16 %v3260_v3, %v3259_v5 }
 0xd69   : > { %v6089_v11 = vpop.eup %6088  ;;  %v3262_v12 = vmul.f32 %v6087_v7, %v6083_v4 }
 0xd6a   : > { %5851 = vmatprep.subr.bf16.mxu1 %v5850_v10  ;;  %v3261_v15 = vmul.f32 %v6089_v11, %v6085_v6 }
 0xd6b   : > { %5853 = vmatpush3.bf16.msra.mxu1 %v5850_v10 }
 0xd6c   : > { %v5854_v16 = vpack.c.bf16 %v3262_v12, %v3261_v15 }
 0xd6e   : > { %5855 = vmatprep.subr.bf16.mxu1 %v5854_v16 }
 0xd6f   : > { %5857 = vmatpush3.bf16.msra.mxu1 %v5854_v16 }
 0xd72   : > { %5588 = vmatmul.mubr.msk.f32.vlgmr.msra.gmra.mrb[28].mxu1 %vm1295_vm2, %v4957_v17 }
 0xd73   : > { %5590 = vmatprep.mubr.msk.f32.mxu1 %vm1295_vm2, %v4958_v19  ;;  %v4983_v19 = vld [vmem:[%s7375_s2 + $0x5] ss:$0 sm:$0xff] }
 0xd76   : > { %5591 = vmatmul.mubr.msk.f32.gmra.mrb[30].mxu1 %vm1295_vm2, %v4959_v20 }
 0xe45   : > { %v5589_v24 = vpop.f32.mrb[28].mxu1 }
 0xe46   : > { %v3417_v25 = vadd.f32 %v5589_v24, %v3289_v22  ;;  %v3411_v26 = vpop.f32.mrb[29].mxu1 }
 0xe47   : > { %v3412_v27 = vadd.f32 %v3411_v26, %v3284_v23 }
 0xe48   : > { %v3451_v29 = vadd.f32 %v3417_v25, %v6872_v0 }
 0xe49   : > { %v3450_v32 = vadd.f32 %v3412_v27, %v6875_v2  ;;  %v5592_v60 = vpop.f32.mrb[30].mxu1 }
 0xe4a   : > { %v7004_v57 = vmul.f32 %v6810_v21, %v3451_v29  ;;  %v3427_v34 = vadd.f32 %v5592_v60, %v3299_v31  ;;  %v3421_v14 = vpop.f32.mrb[31].mxu1  ;;  %v4986_v60 = vld [vmem:[%s7382_s9 + $0x110] sm:$0xff] }
 0xe4b   : > { %v7007_v30 = vmul.f32 %v6810_v21, %v3450_v32  ;;  %v3422_v35 = vadd.f32 %v3421_v14, %v3294_v33  ;;  %v4985_v32 = vld [vmem:[%s7382_s9 + $0x108] sm:$0xff]  ;;  %v4987_v33 = vld [vmem:[%s7382_s9 + $0x118] sm:$0xff] }
 0xe4c   : > { %v3453_v38 = vadd.f32 %v3427_v34, %v6882_v8  ;;  %3464 = vrot.lane.b32.xlu0 %v7004_v57, %s7402_s17  ;;  %v4960_v8 = vld [vmem:[%s7384_s11 + $0xe0] sm:$0xff]  ;;  %v4989_v14 = vld [vmem:[%s7382_s9 + $0x128] sm:$0xff] }
 0xe4d   : > { %v3452_v0 = vadd.f32 %v3422_v35, %v6885_v9  ;;  %3462 = vrot.lane.b32.xlu1 %v7007_v30, %s7402_s17  ;;  %v4961_v9 = vld [vmem:[%s7384_s11 + $0xe8] sm:$0xff]  ;;  %5593 = vmatprep.mubr.msk.f32.mxu1 %vm1295_vm2, %v4960_v8  ;;  %v5866_v17 = vpack.c.bf16 %v7004_v57, %v7007_v30  ;;  %v4988_v34 = vld [vmem:[%s7382_s9 + $0x120] sm:$0xff]  ;;  %v4990_v35 = vld [vmem:[%s7382_s9 + $0x130] sm:$0xff] }
 0xe4e   : > { %v7016_v2 = vmul.f32 %v6810_v21, %v3453_v38  ;;  %5594 = vmatmul.mubr.msk.f32.gmra.mrb[32].mxu1 %vm1295_vm2, %v4961_v9  ;;  %v4991_v38 = vld [vmem:[%s7382_s9 + $0x138] sm:$0xff] }
 0xe4f   : > { %v7019_v39 = vmul.f32 %v6810_v21, %v3452_v0  ;;  %5596 = vmatprep.mubr.msk.f32.mxu1 %vm1295_vm2, %v4962_v40  ;;  %v5012_v0 = vld [vmem:[%s7384_s11 + $0x100] sm:$0xff] }
 0xe50   : > { %3468 = vrot.lane.b32.xlu0 %v7016_v2, %s7402_s17 }
 0xe51   : > { %3466 = vrot.lane.b32.xlu1 %v7019_v39, %s7402_s17  ;;  %v5870_v23 = vpack.c.bf16 %v7016_v2, %v7019_v39 }
 0xe52   : > { %5597 = vmatmul.mubr.msk.f32.gmra.mrb[34].mxu1 %vm1295_vm2, %v4963_v41 }
 0xe53   : > { %5623 = vmatprep.mubr.msk.f32.mxu1 %vm1029_vm1, %v4984_v43 }
 0xe54   : > { %3491 = vrot.lane.b32.xlu0 %v7004_v57, %s7401_s23 }
 0xe55   : > { %3489 = vrot.lane.b32.xlu1 %v7007_v30, %s7401_s23 }
 0xe58   : > { %3495 = vrot.lane.b32.xlu0 %v7016_v2, %s7401_s23 }
 0xe59   : > { %3493 = vrot.lane.b32.xlu1 %v7019_v39, %s7401_s23 }
 0xe5c   : > { %3569 = vperm.xlu0 %5990, %v4997_v42  }
 0xe5d   : > { %3564 = vperm.xlu1 %5991, %v4996_v44  }
 0xe60   : > { %3738 = vperm.xlu0 %5990, %v4914_v45  }
 0xe61   : > { %3733 = vperm.xlu1 %5991, %v4913_v46  }
 0xe64   : > { %3579 = vperm.xlu0 %5990, %v4999_v47  }
 0xe65   : > { %3574 = vperm.xlu1 %5991, %v4998_v48  }
 0xe68   : > { %3748 = vperm.xlu0 %5990, %v4916_v49  }
 0xe69   : > { %3743 = vperm.xlu1 %5991, %v4915_v13  }
 0xe6c   : > { %3549 = vperm.xlu0 %5990, %v4993_v50  }
 0xe6d   : > { %3544 = vperm.xlu1 %5991, %v4992_v52  }
 0xe70   : > { %3718 = vperm.xlu0 %5990, %v4910_v53  }
 0xe71   : > { %3713 = vperm.xlu1 %5991, %v4909_v54  }
 0xe74   : > { %3559 = vperm.xlu0 %5990, %v4995_v18  }
 0xe75   : > { %3554 = vperm.xlu1 %5991, %v4994_v55  }
 0xe78   : > { %3728 = vperm.xlu0 %5990, %v4912_v56  }
 0xe79   : > { %3723 = vperm.xlu1 %5991, %v4911_v58  }
 0xe7c   : > { %3816 = vperm.xlu0 %5990, %v5021_v59  }
 0xe7d   : > { %3811 = vperm.xlu1 %5991, %v5020_v61  }
 0xe80   : > { %3826 = vperm.xlu0 %5990, %v5023_v62  }
 0xe81   : > { %3821 = vperm.xlu1 %5991, %v5022_v28  }
 0xebe   : > { %v3465_v37 = vpop.permute.xlu0 %3464 }
 0xebf   : > { %v3478_v1 = vmul.f32 %v4981_v36, %v3465_v37  ;;  %v3463_v3 = vpop.permute.xlu1 %3462 }
 0xec0   : > { %v3477_v4 = vmul.f32 %v4981_v36, %v3463_v3 }
 0xec2   : > { %v5858_v5 = vpack.c.bf16 %v3478_v1, %v3477_v4  ;;  %v3469_v6 = vpop.permute.xlu0 %3468 }
 0xec3   : > { %v3480_v7 = vmul.f32 %v4981_v36, %v3469_v6  ;;  %v3467_v10 = vpop.permute.xlu1 %3466 }
 0xec4   : > { %v3479_v11 = vmul.f32 %v4981_v36, %v3467_v10  ;;  %5859 = vmatprep.subr.bf16.mxu1 %v5858_v5 }
 0xec5   : > { %5861 = vmatpush3.bf16.msra.mxu1 %v5858_v5 }
 0xec6   : > { %v5862_v12 = vpack.c.bf16 %v3480_v7, %v3479_v11  ;;  %v3492_v15 = vpop.permute.xlu0 %3491 }
 0xec7   : > { %v3490_v16 = vpop.permute.xlu1 %3489  ;;  %v3505_v20 = vmul.f32 %v4983_v19, %v3492_v15 }
 0xec8   : > { %5863 = vmatprep.subr.bf16.mxu1 %v5862_v12  ;;  %v3504_v22 = vmul.f32 %v4983_v19, %v3490_v16 }
 0xec9   : > { %5865 = vmatpush3.bf16.msra.mxu1 %v5862_v12 }
 0xeca   : > { %5867 = vmatprep.subr.bf16.mxu1 %v5866_v17  ;;  %v3496_v24 = vpop.permute.xlu0 %3495  ;;  %v5874_v26 = vpack.c.bf16 %v3505_v20, %v3504_v22 }
 0xecb   : > { %v3494_v25 = vpop.permute.xlu1 %3493  ;;  %v3507_v27 = vmul.f32 %v4983_v19, %v3496_v24 }
 0xecc   : > { %v3506_v29 = vmul.f32 %v4983_v19, %v3494_v25 }
 0xecd   : > { %5869 = vmatpush3.bf16.msra.mxu1 %v5866_v17 }
 0xece   : > { %5871 = vmatprep.subr.bf16.mxu1 %v5870_v23  ;;  %v5878_v31 = vpack.c.bf16 %v3507_v27, %v3506_v29 }
 0xed1   : > { %5873 = vmatpush3.bf16.msra.mxu1 %v5870_v23 }
 0xed2   : > { %5875 = vmatprep.subr.bf16.mxu1 %v5874_v26 }
 0xed5   : > { %5877 = vmatpush3.bf16.msra.mxu1 %v5874_v26 }
 0xed6   : > { %5879 = vmatprep.subr.bf16.mxu1 %v5878_v31 }
 0xed9   : > { %5881 = vmatpush3.bf16.msra.mxu1 %v5878_v31 }
 0xedb   : > { %v3570_v8 = vpop.permute.xlu0 %3569 }
 0xedc   : > { %5624 = vmatmul.mubr.msk.f32.vlgmr.msra.gmra.mrb[36].mxu1 %vm1029_vm1, %v4985_v32  ;;  %v3565_v9 = vpop.permute.xlu1 %3564 }
 0xedd   : > { %5626 = vmatprep.mubr.msk.f32.mxu1 %vm1029_vm1, %v4986_v60 }
 0xedf   : > { %v3739_v40 = vpop.permute.xlu0 %3738 }
 0xee0   : > { %5627 = vmatmul.mubr.msk.f32.gmra.mrb[38].mxu1 %vm1029_vm1, %v4987_v33  ;;  %v3734_v41 = vpop.permute.xlu1 %3733 }
 0xee1   : > { %5629 = vmatprep.mubr.msk.f32.mxu1 %vm1029_vm1, %v4988_v34 }
 0xee3   : > { %v3580_v42 = vpop.permute.xlu0 %3579 }
 0xee4   : > { %5630 = vmatmul.mubr.msk.f32.gmra.mrb[40].mxu1 %vm1029_vm1, %v4989_v14  ;;  %v3575_v43 = vpop.permute.xlu1 %3574 }
 0xee5   : > { %5632 = vmatprep.mubr.msk.f32.mxu1 %vm1029_vm1, %v4990_v35 }
 0xee7   : > { %v3749_v45 = vpop.permute.xlu0 %3748 }
 0xee8   : > { %5633 = vmatmul.mubr.msk.f32.gmra.mrb[42].mxu1 %vm1029_vm1, %v4991_v38  ;;  %v3744_v47 = vpop.permute.xlu1 %3743 }
 0xee9   : > { %5643 = vmatprep.mubr.msk.f32.mxu1 %vm1295_vm2, %v5012_v0 }
 0xeeb   : > { %v3550_v13 = vpop.permute.xlu0 %3549 }
 0xeec   : > { %v3545_v50 = vpop.permute.xlu1 %3544 }
 0xeef   : > { %v3719_v59 = vpop.permute.xlu0 %3718 }
 0xef0   : > { %v3714_v36 = vpop.permute.xlu1 %3713 }
 0xef3   : > { %v3560_v10 = vpop.permute.xlu0 %3559 }
 0xef4   : > { %v3555_v12 = vpop.permute.xlu1 %3554 }
 0xef7   : > { %v3729_v22 = vpop.permute.xlu0 %3728 }
 0xef8   : > { %v3724_v24 = vpop.permute.xlu1 %3723 }
 0xfaf   : > { %v5625_v44 = vpop.f32.mrb[36].mxu1 }
 0xfb0   : > { %v3672_v46 = vpop.f32.mrb[37].mxu1  ;;  %v3678_v6 = vadd.f32 %v5625_v44, %v3550_v13  ;;  %v5016_v13 = vld [vmem:[%s7384_s11 + $0x120] sm:$0xff] }
 0xfb1   : > { %v3673_v11 = vadd.f32 %v3672_v46, %v3545_v50  ;;  %v5017_v50 = vld [vmem:[%s7384_s11 + $0x128] sm:$0xff] }
 0xfb2   : > { %v3752_v15 = vadd.f32 %v3719_v59, %v3678_v6 }
 0xfb3   : > { %v5628_v48 = vpop.f32.mrb[38].mxu1  ;;  %v3751_v17 = vadd.f32 %v3714_v36, %v3673_v11  ;;  %v7175_v11 = vld [vmem:[%s6293_s25] ss:$0 sm:$0xff] }
 0xfb4   : > { %v3682_v49 = vpop.f32.mrb[39].mxu1  ;;  %v3688_v16 = vadd.f32 %v5628_v48, %v3560_v10  ;;  %v5014_v48 = vld [vmem:[%s7384_s11 + $0x110] sm:$0xff] }
 0xfb5   : > { %v3683_v19 = vadd.f32 %v3682_v49, %v3555_v12  ;;  %v5015_v49 = vld [vmem:[%s7384_s11 + $0x118] sm:$0xff]  ;;  %v5040_v12 = vld [vmem:[%s7382_s9 + $0x140] sm:$0xff] }
 0xfb6   : > { %v3754_v25 = vadd.f32 %v3729_v22, %v3688_v16  ;;  %5679 = vmatprep.mubr.msk.f32.mxu0 %vm1029_vm1, %v5040_v12  ;;  %v4922_v16 = vld [vmem:[%s6355_s0 + $0x168] sm:$0xff]  ;;  %v4924_v22 = vld [vmem:[%s6355_s0 + $0x178] sm:$0xff] }
 0xfb7   : > { %v5631_v52 = vpop.f32.mrb[40].mxu1  ;;  %v3753_v27 = vadd.f32 %v3724_v24, %v3683_v19  ;;  %v5055_v19 = vld [vmem:[%s7383_s10 + $0x178] sm:$0xff]  ;;  %v5049_v24 = vld [vmem:[%s7383_s10 + $0x148] sm:$0xff] }
 0xfb8   : > { %v3698_v53 = vadd.f32 %v5631_v52, %v3570_v8  ;;  %v3692_v54 = vpop.f32.mrb[41].mxu1  ;;  %v3817_v52 = vpop.permute.xlu0 %3816  ;;  %v5047_v12 = vld [vmem:[%s7382_s9 + $0x178] sm:$0xff] }
 0xfb9   : > { %v3693_v18 = vadd.f32 %v3692_v54, %v3565_v9 }
 0xfba   : > { %v3756_v55 = vadd.f32 %v3739_v40, %v3698_v53  ;;  %v3812_v53 = vpop.permute.xlu1 %3811 }
 0xfbb   : > { %v3755_v56 = vadd.f32 %v3734_v41, %v3693_v18  ;;  %v5634_v58 = vpop.f32.mrb[42].mxu1 }
 0xfbc   : > { %v5009_v61 = vmul.f32 -1.442695, %v3756_v55  ;;  %v3708_v62 = vadd.f32 %v5634_v58, %v3580_v42  ;;  %v3702_v28 = vpop.f32.mrb[43].mxu1  ;;  %v3827_v59 = vpop.permute.xlu0 %3826 }
 0xfbd   : > { %v5008_v37 = vmul.f32 -1.442695, %v3755_v56  ;;  %v3703_v1 = vadd.f32 %v3702_v28, %v3575_v43 }
 0xfbe   : > { %6090 = vpow2.f32 %v5009_v61  ;;  %v3758_v3 = vadd.f32 %v3749_v45, %v3708_v62  ;;  %v3822_v28 = vpop.permute.xlu1 %3821 }
 0xfbf   : > { %6092 = vpow2.f32 %v5008_v37  ;;  %v3757_v4 = vadd.f32 %v3744_v47, %v3703_v1  ;;  %v5013_v47 = vld [vmem:[%s7384_s11 + $0x108] sm:$0xff] }
 0xfc0   : > { %v5011_v5 = vmul.f32 -1.442695, %v3758_v3 }
 0xfc1   : > { %v5010_v7 = vmul.f32 -1.442695, %v3757_v4 }
 0xfc2   : > { %6094 = vpow2.f32 %v5011_v5 }
 0xfc3   : > { %6096 = vpow2.f32 %v5010_v7 }
 0xfc4   : > { %6098 = vtanh.f32 %v3752_v15  ;;  %v5052_v15 = vld [vmem:[%s7383_s10 + $0x160] sm:$0xff] }
 0xfc5   : > { %6100 = vtanh.f32 %v3751_v17  ;;  %v4921_v17 = vld [vmem:[%s6355_s0 + $0x160] sm:$0xff] }
 0xfc8   : > { %v6091_v20 = vpop.eup %6090 }
 0xfc9   : > { %v6093_v23 = vpop.eup %6092  ;;  %v3776_v26 = vadd.f32 1.0, %v6091_v20  ;;  %v5054_v20 = vld [vmem:[%s7383_s10 + $0x170] sm:$0xff] }
 0xfca   : > { %v3775_v29 = vadd.f32 1.0, %v6093_v23  ;;  %v4923_v23 = vld [vmem:[%s6355_s0 + $0x170] sm:$0xff] }
 0xfcb   : > { %6102 = vrcp.f32 %v3776_v26  ;;  %v4918_v26 = vld [vmem:[%s6355_s0 + $0x148] sm:$0xff] }
 0xfcc   : > { %v6095_v31 = vpop.eup %6094  ;;  %6104 = vrcp.f32 %v3775_v29  ;;  %v5051_v29 = vld [vmem:[%s7383_s10 + $0x158] sm:$0xff] }
 0xfcd   : > { %v6097_v32 = vpop.eup %6096  ;;  %6106 = vtanh.f32 %v3754_v25  ;;  %v3778_v60 = vadd.f32 1.0, %v6095_v31  ;;  %v5048_v25 = vld [vmem:[%s7383_s10 + $0x140] sm:$0xff]  ;;  %v5050_v31 = vld [vmem:[%s7383_s10 + $0x150] sm:$0xff] }
 0xfce   : > { %6108 = vtanh.f32 %v3753_v27  ;;  %v3777_v33 = vadd.f32 1.0, %v6097_v32  ;;  %v6099_v34 = vpop.eup %6098  ;;  %v4917_v27 = vld [vmem:[%s6355_s0 + $0x140] sm:$0xff]  ;;  %v4920_v32 = vld [vmem:[%s6355_s0 + $0x158] sm:$0xff] }
 0xfcf   : > { %6110 = vrcp.f32 %v3778_v60  ;;  %v6101_v14 = vpop.eup %6100  ;;  %v4919_v60 = vld [vmem:[%s6355_s0 + $0x150] sm:$0xff] }
 0xfd0   : > { %6112 = vrcp.f32 %v3777_v33  ;;  %v4969_v33 = vld [vmem:[%s7385_s12 + $0xe8] sm:$0xff] }
 0xfd5   : > { %v6103_v35 = vpop.eup %6102 }
 0xfd6   : > { %v6105_v38 = vpop.eup %6104  ;;  %v3788_v0 = vmul.f32 %v6103_v35, %v6099_v34  ;;  %v4968_v34 = vld [vmem:[%s7385_s12 + $0xe0] sm:$0xff] }
 0xfd7   : > { %v6107_v8 = vpop.eup %6106  ;;  %v3787_v9 = vmul.f32 %v6105_v38, %v6101_v14  ;;  %v5025_v14 = vld [vmem:[%s7385_s12 + $0x128] sm:$0xff]  ;;  %v5024_v35 = vld [vmem:[%s7385_s12 + $0x120] sm:$0xff] }
 0xfd8   : > { %v6109_v40 = vpop.eup %6108  ;;  %v5081_v38 = vld [vmem:[%s7385_s12 + $0x168] sm:$0xff] }
 0xfd9   : > { %v6111_v41 = vpop.eup %6110  ;;  %v5882_v42 = vpack.c.bf16 %v3788_v0, %v3787_v9  ;;  %v5080_v0 = vld [vmem:[%s7385_s12 + $0x160] sm:$0xff]  ;;  %v4970_v9 = vld [vmem:[%s7385_s12 + $0xf0] sm:$0xff] }
 0xfda   : > { %v6113_v43 = vpop.eup %6112  ;;  %v3790_v44 = vmul.f32 %v6111_v41, %v6107_v8  ;;  %v4971_v8 = vld [vmem:[%s7385_s12 + $0xf8] sm:$0xff]  ;;  %v5026_v41 = vld [vmem:[%s7385_s12 + $0x130] sm:$0xff] }
 0xfdb   : > { %5883 = vmatprep.subr.bf16.mxu1 %v5882_v42  ;;  %v3789_v45 = vmul.f32 %v6113_v43, %v6109_v40  ;;  %v5027_v40 = vld [vmem:[%s7385_s12 + $0x138] sm:$0xff]  ;;  %v5082_v43 = vld [vmem:[%s7385_s12 + $0x170] sm:$0xff] }
 0xfdc   : > { %5885 = vmatpush3.bf16.msra.mxu1 %v5882_v42  ;;  %v5083_v42 = vld [vmem:[%s7385_s12 + $0x178] sm:$0xff] }
 0xfdd   : > { %v5886_v46 = vpack.c.bf16 %v3790_v44, %v3789_v45  ;;  %v4888_v44 = vld [vmem:[%s7379_s6 + $0x18] sm:$0xff] }
 0xfde   : > { %v5095_v45 = vld [vmem:[%s7387_s14 + $0x18] sm:$0xff] }
 0xfdf   : > { %5887 = vmatprep.subr.bf16.mxu1 %v5886_v46 }
 0xfe0   : > { %5889 = vmatpush3.bf16.msra.mxu1 %v5886_v46  ;;  %v5094_v46 = vld [vmem:[%s7387_s14 + $0x10] sm:$0xff] }
 0xfe3   : > { %5644 = vmatmul.mubr.msk.f32.vlgmr.msra.gmra.mrb[44].mxu1 %vm1295_vm2, %v5013_v47  ;;  %v5037_v47 = vld [vmem:[%s7375_s2 + $0x6] ss:$0 sm:$0xff] }
 0xfe4   : > { %5646 = vmatprep.mubr.msk.f32.mxu1 %vm1295_vm2, %v5014_v48 }
 0xfe7   : > { %5647 = vmatmul.mubr.msk.f32.gmra.mrb[46].mxu1 %vm1295_vm2, %v5015_v49 }
 0xfe8   : > { %5649 = vmatprep.mubr.msk.f32.mxu1 %vm1295_vm2, %v5016_v13 }
 0xfeb   : > { %5650 = vmatmul.mubr.msk.f32.gmra.mrb[32].mxu1 %vm1295_vm2, %v5017_v50 }
0x10b6   : > { %v5645_v54 = vpop.f32.mrb[44].mxu1 }
0x10b7   : > { %v3945_v18 = vadd.f32 %v5645_v54, %v3817_v52  ;;  %v3939_v55 = vpop.f32.mrb[45].mxu1 }
0x10b8   : > { %v3940_v56 = vadd.f32 %v3939_v55, %v3812_v53 }
0x10b9   : > { %v3979_v58 = vadd.f32 %v3945_v18, %v7004_v57 }
0x10ba   : > { %v3978_v61 = vadd.f32 %v3940_v56, %v7007_v30  ;;  %v5648_v62 = vpop.f32.mrb[46].mxu1 }
0x10bb   : > { %v3983_v36 = vmul.f32 %v6810_v21, %v3979_v58  ;;  %v3955_v37 = vadd.f32 %v5648_v62, %v3827_v59  ;;  %v3949_v1 = vpop.f32.mrb[47].mxu1 }
0x10bc   : > { %v3982_v3 = vmul.f32 %v6810_v21, %v3978_v61  ;;  %v3950_v4 = vadd.f32 %v3949_v1, %v3822_v28  ;;  %v5039_v61 = vld [vmem:[%s7375_s2 + $0x8] ss:$0 sm:$0xff] }
0x10bd   : > { %v3981_v5 = vadd.f32 %v3955_v37, %v7016_v2  ;;  %3992 = vrot.lane.b32.xlu0 %v3983_v36, %s7402_s17 }
0x10be   : > { %v3980_v6 = vadd.f32 %v3950_v4, %v7019_v39  ;;  %v7166_v57 = vpop.f32.mrb[32].mxu1  ;;  %3990 = vrot.lane.b32.xlu1 %v3982_v3, %s7402_s17  ;;  %v7169_v30 = vpack.c.bf16 %v3983_v36, %v3982_v3 }
0x10bf   : > { %v3985_v7 = vmul.f32 %v6810_v21, %v3981_v5  ;;  %v7172_v10 = vpop.f32.mrb[33].mxu1  ;;  %v5053_v21 = vld [vmem:[%s7383_s10 + $0x168] sm:$0xff] }
0x10c0   : > { %v3984_v2 = vmul.f32 %v7175_v11, %v3980_v6  ;;  %v5041_v6 = vld [vmem:[%s7382_s9 + $0x148] sm:$0xff] }
0x10c1   : > { %3996 = vrot.lane.b32.xlu0 %v3985_v7, %s7402_s17 }
0x10c2   : > { %3994 = vrot.lane.b32.xlu1 %v3984_v2, %s7402_s17  ;;  %v7180_v39 = vpack.c.bf16 %v3985_v7, %v3984_v2 }
0x10c5   : > { %4019 = vrot.lane.b32.xlu0 %v3983_v36, %s7401_s23 }
0x10c6   : > { %4017 = vrot.lane.b32.xlu1 %v3982_v3, %s7401_s23 }
0x10c9   : > { %4023 = vrot.lane.b32.xlu0 %v3985_v7, %s7401_s23  ;;  %v5043_v7 = vld [vmem:[%s7382_s9 + $0x158] sm:$0xff] }
0x10ca   : > { %4021 = vrot.lane.b32.xlu1 %v3984_v2, %s7401_s23  ;;  %v5044_v2 = vld [vmem:[%s7382_s9 + $0x160] sm:$0xff] }
0x10cd   : > { %4097 = vperm.xlu0 %5990, %v5053_v21   ;;  %v5046_v21 = vld [vmem:[%s7382_s9 + $0x170] sm:$0xff] }
0x10ce   : > { %4092 = vperm.xlu1 %5991, %v5052_v15   ;;  %v5018_v15 = vld [vmem:[%s7384_s11 + $0x130] sm:$0xff] }
0x10cf   : > { %5652 = vmatprep.mubr.msk.f32.mxu1 %vm1295_vm2, %v5018_v15 }
0x10d1   : > { %4266 = vperm.xlu0 %5990, %v4922_v16   ;;  %v5019_v16 = vld [vmem:[%s7384_s11 + $0x138] sm:$0xff] }
0x10d2   : > { %4261 = vperm.xlu1 %5991, %v4921_v17   ;;  %5653 = vmatmul.mubr.msk.f32.gmra.mrb[34].mxu1 %vm1295_vm2, %v5019_v16  ;;  %v5068_v17 = vld [vmem:[%s7384_s11 + $0x140] sm:$0xff] }
0x10d5   : > { %4107 = vperm.xlu0 %5990, %v5055_v19   ;;  %v5074_v19 = vld [vmem:[%s7384_s11 + $0x170] sm:$0xff] }
0x10d6   : > { %4102 = vperm.xlu1 %5991, %v5054_v20   ;;  %5708 = vmatprep.mubr.msk.f32.mxu1 %vm1295_vm2, %v5074_v19 }
0x10d9   : > { %4276 = vperm.xlu0 %5990, %v4924_v22  }
0x10da   : > { %4271 = vperm.xlu1 %5991, %v4923_v23  }
0x10dd   : > { %4077 = vperm.xlu0 %5990, %v5049_v24  }
0x10de   : > { %4072 = vperm.xlu1 %5991, %v5048_v25  }
0x10e1   : > { %4246 = vperm.xlu0 %5990, %v4918_v26  }
0x10e2   : > { %4241 = vperm.xlu1 %5991, %v4917_v27  }
0x10e5   : > { %4087 = vperm.xlu0 %5990, %v5051_v29  }
0x10e6   : > { %4082 = vperm.xlu1 %5991, %v5050_v31  }
0x10e9   : > { %4256 = vperm.xlu0 %5990, %v4920_v32  }
0x10ea   : > { %4251 = vperm.xlu1 %5991, %v4919_v60  }
0x10ed   : > { %3308 = vperm.xlu0 %5990, %v4969_v33  }
0x10ee   : > { %3303 = vperm.xlu1 %5991, %v4968_v34  }
0x10f1   : > { %3836 = vperm.xlu0 %5990, %v5025_v14  }
0x10f2   : > { %3831 = vperm.xlu1 %5991, %v5024_v35  }
0x10f5   : > { %4360 = vperm.xlu0 %5990, %v5081_v38  }
0x10f6   : > { %4355 = vperm.xlu1 %5991, %v5080_v0  }
0x10f9   : > { %3318 = vperm.xlu0 %5990, %v4971_v8  }
0x10fa   : > { %3313 = vperm.xlu1 %5991, %v4970_v9  }
0x10fd   : > { %3846 = vperm.xlu0 %5990, %v5027_v40  }
0x10fe   : > { %3841 = vperm.xlu1 %5991, %v5026_v41  }
0x1101   : > { %4370 = vperm.xlu0 %5990, %v5083_v42  }
0x1102   : > { %4365 = vperm.xlu1 %5991, %v5082_v43  }
0x1105   : > { %2771 = vperm.xlu0 %5990, %v4888_v44  }
0x1106   : > { %4519 = vperm.xlu1 %5991, %v5095_v45  }
0x1109   : > { %4514 = vperm.xlu0 %5990, %v5094_v46  }
0x112f   : > { %v3993_v48 = vpop.permute.xlu0 %3992 }
0x1130   : > { %v4006_v49 = vmul.f32 %v5037_v47, %v3993_v48  ;;  %v3991_v13 = vpop.permute.xlu1 %3990 }
0x1131   : > { %v4005_v50 = vmul.f32 %v5037_v47, %v3991_v13 }
0x1133   : > { %v5890_v52 = vpack.c.bf16 %v4006_v49, %v4005_v50  ;;  %v3997_v53 = vpop.permute.xlu0 %3996 }
0x1134   : > { %v4008_v54 = vmul.f32 %v5037_v47, %v3997_v53  ;;  %v3995_v18 = vpop.permute.xlu1 %3994 }
0x1135   : > { %v4007_v55 = vmul.f32 %v5037_v47, %v3995_v18  ;;  %5891 = vmatprep.subr.bf16.mxu0 %v5890_v52 }
0x1136   : > { %5893 = vmatpush3.bf16.msra.mxu0 %v5890_v52 }
0x1137   : > { %v5894_v56 = vpack.c.bf16 %v4008_v54, %v4007_v55  ;;  %v4020_v58 = vpop.permute.xlu0 %4019 }
0x1138   : > { %v4018_v59 = vpop.permute.xlu1 %4017  ;;  %v4033_v62 = vmul.f32 %v5039_v61, %v4020_v58 }
0x1139   : > { %5895 = vmatprep.subr.bf16.mxu0 %v5894_v56  ;;  %v4032_v28 = vmul.f32 %v5039_v61, %v4018_v59 }
0x113a   : > { %5897 = vmatpush3.bf16.msra.mxu0 %v5894_v56 }
0x113b   : > { %5899 = vmatprep.subr.bf16.mxu0 %v7169_v30  ;;  %v4024_v36 = vpop.permute.xlu0 %4023  ;;  %v5906_v1 = vpack.c.bf16 %v4033_v62, %v4032_v28 }
0x113c   : > { %v4022_v37 = vpop.permute.xlu1 %4021  ;;  %v4035_v3 = vmul.f32 %v5039_v61, %v4024_v36 }
0x113d   : > { %v4034_v4 = vmul.f32 %v5039_v61, %v4022_v37 }
0x113e   : > { %5901 = vmatpush3.bf16.msra.mxu0 %v7169_v30  ;;  %v5042_v30 = vld [vmem:[%s7382_s9 + $0x150] sm:$0xff] }
0x113f   : > { %5903 = vmatprep.subr.bf16.mxu0 %v7180_v39  ;;  %v5910_v5 = vpack.c.bf16 %v4035_v3, %v4034_v4 }
0x1142   : > { %5905 = vmatpush3.bf16.msra.mxu0 %v7180_v39  ;;  %v5045_v39 = vld [vmem:[%s7382_s9 + $0x168] sm:$0xff] }
0x1143   : > { %5907 = vmatprep.subr.bf16.mxu0 %v5906_v1 }
0x1146   : > { %5909 = vmatpush3.bf16.msra.mxu0 %v5906_v1 }
0x1147   : > { %5911 = vmatprep.subr.bf16.mxu0 %v5910_v5 }
0x114a   : > { %5913 = vmatpush3.bf16.msra.mxu0 %v5910_v5 }
0x114c   : > { %v4098_v20 = vpop.permute.xlu0 %4097 }
0x114d   : > { %5680 = vmatmul.mubr.msk.f32.vlgmr.msra.gmra.mrb[34].mxu0 %vm1029_vm1, %v5041_v6  ;;  %v4093_v22 = vpop.permute.xlu1 %4092 }
0x114e   : > { %5682 = vmatprep.mubr.msk.f32.mxu0 %vm1029_vm1, %v5042_v30 }
0x1150   : > { %v4267_v23 = vpop.permute.xlu0 %4266 }
0x1151   : > { %5683 = vmatmul.mubr.msk.f32.gmra.mrb[36].mxu0 %vm1029_vm1, %v5043_v7  ;;  %v4262_v24 = vpop.permute.xlu1 %4261 }
0x1152   : > { %5685 = vmatprep.mubr.msk.f32.mxu0 %vm1029_vm1, %v5044_v2 }
0x1154   : > { %v4108_v25 = vpop.permute.xlu0 %4107 }
0x1155   : > { %5686 = vmatmul.mubr.msk.f32.gmra.mrb[38].mxu0 %vm1029_vm1, %v5045_v39  ;;  %v4103_v26 = vpop.permute.xlu1 %4102 }
0x1156   : > { %5688 = vmatprep.mubr.msk.f32.mxu0 %vm1029_vm1, %v5046_v21 }
0x1158   : > { %v4277_v29 = vpop.permute.xlu0 %4276 }
0x1159   : > { %5689 = vmatmul.mubr.msk.f32.gmra.mrb[40].mxu0 %vm1029_vm1, %v5047_v12  ;;  %v4272_v32 = vpop.permute.xlu1 %4271 }
0x115a   : > { %5699 = vmatprep.mubr.msk.f32.mxu0 %vm1295_vm2, %v5068_v17 }
0x115c   : > { %v4078_v34 = vpop.permute.xlu0 %4077 }
0x115d   : > { %v4073_v14 = vpop.permute.xlu1 %4072 }
0x1160   : > { %v4247_v42 = vpop.permute.xlu0 %4246 }
0x1161   : > { %v4242_v46 = vpop.permute.xlu1 %4241 }
0x1164   : > { %v4088_v54 = vpop.permute.xlu0 %4087 }
0x1165   : > { %v4083_v55 = vpop.permute.xlu1 %4082 }
0x1168   : > { %v4257_v28 = vpop.permute.xlu0 %4256 }
0x1169   : > { %v4252_v37 = vpop.permute.xlu1 %4251 }
0x1220   : > { %v5681_v27 = vpop.f32.mrb[34].mxu0 }
0x1221   : > { %v4200_v31 = vpop.f32.mrb[35].mxu0  ;;  %v4206_v52 = vadd.f32 %v5681_v27, %v4078_v34  ;;  %v5073_v34 = vld [vmem:[%s7384_s11 + $0x168] sm:$0xff] }
0x1222   : > { %v4201_v18 = vadd.f32 %v4200_v31, %v4073_v14  ;;  %v5075_v31 = vld [vmem:[%s7384_s11 + $0x178] sm:$0xff]  ;;  %v5092_v14 = vld [vmem:[%s7386_s13 + $0x10] sm:$0xff] }
0x1223   : > { %v4280_v56 = vadd.f32 %v4247_v42, %v4206_v52 }
0x1224   : > { %v5684_v60 = vpop.f32.mrb[36].mxu0  ;;  %v4279_v59 = vadd.f32 %v4242_v46, %v4201_v18 }
0x1225   : > { %v4210_v33 = vpop.f32.mrb[37].mxu0  ;;  %v4216_v58 = vadd.f32 %v5684_v60, %v4088_v54  ;;  %v5071_v60 = vld [vmem:[%s7384_s11 + $0x158] sm:$0xff] }
0x1226   : > { %v4211_v61 = vadd.f32 %v4210_v33, %v4083_v55  ;;  %v5072_v33 = vld [vmem:[%s7384_s11 + $0x160] sm:$0xff] }
0x1227   : > { %v4282_v1 = vadd.f32 %v4257_v28, %v4216_v58 }
0x1228   : > { %v5687_v35 = vpop.f32.mrb[38].mxu0  ;;  %v4281_v4 = vadd.f32 %v4252_v37, %v4211_v61 }
0x1229   : > { %v4226_v38 = vadd.f32 %v5687_v35, %v4098_v20  ;;  %v4220_v0 = vpop.f32.mrb[39].mxu0  ;;  %v3309_v35 = vpop.permute.xlu0 %3308 }
0x122a   : > { %v4221_v8 = vadd.f32 %v4220_v0, %v4093_v22 }
0x122b   : > { %v4284_v9 = vadd.f32 %v4267_v23, %v4226_v38  ;;  %v3304_v38 = vpop.permute.xlu1 %3303 }
0x122c   : > { %v4283_v40 = vadd.f32 %v4262_v24, %v4221_v8  ;;  %v5690_v41 = vpop.f32.mrb[40].mxu0 }
0x122d   : > { %v5065_v43 = vmul.f32 -1.442695, %v4284_v9  ;;  %v4236_v44 = vadd.f32 %v5690_v41, %v4108_v25  ;;  %v4230_v45 = vpop.f32.mrb[41].mxu0  ;;  %v3837_v0 = vpop.permute.xlu0 %3836 }
0x122e   : > { %v5064_v47 = vmul.f32 -1.442695, %v4283_v40  ;;  %v4231_v48 = vadd.f32 %v4230_v45, %v4103_v26 }
0x122f   : > { %6114 = vpow2.f32 %v5065_v43  ;;  %v4286_v49 = vadd.f32 %v4277_v29, %v4236_v44  ;;  %v5069_v29 = vld [vmem:[%s7384_s11 + $0x148] sm:$0xff]  ;;  %v3832_v8 = vpop.permute.xlu1 %3831 }
0x1230   : > { %6116 = vpow2.f32 %v5064_v47  ;;  %v4285_v13 = vadd.f32 %v4272_v32, %v4231_v48  ;;  %v5070_v32 = vld [vmem:[%s7384_s11 + $0x150] sm:$0xff] }
0x1231   : > { %v5067_v50 = vmul.f32 -1.442695, %v4286_v49  ;;  %v4361_v9 = vpop.permute.xlu0 %4360  ;;  %v5946_v49 = vadd.f32 %v3837_v0, %v3309_v35 }
0x1232   : > { %v5066_v53 = vmul.f32 -1.442695, %v4285_v13 }
0x1233   : > { %6118 = vpow2.f32 %v5067_v50  ;;  %v4356_v40 = vpop.permute.xlu1 %4355  ;;  %v5950_v50 = vadd.f32 %v3832_v8, %v3304_v38 }
0x1234   : > { %6120 = vpow2.f32 %v5066_v53 }
0x1235   : > { %6122 = vtanh.f32 %v4280_v56  ;;  %v3319_v41 = vpop.permute.xlu0 %3318 }
0x1236   : > { %6124 = vtanh.f32 %v4279_v59  ;;  %v5947_v59 = vadd.f32 %v5946_v49, %v7166_v57 }
0x1237   : > { %v3314_v42 = vpop.permute.xlu1 %3313 }
0x1239   : > { %v6115_v62 = vpop.eup %6114  ;;  %v3847_v43 = vpop.permute.xlu0 %3846 }
0x123a   : > { %v6117_v36 = vpop.eup %6116  ;;  %v4304_v3 = vadd.f32 1.0, %v6115_v62  ;;  %v5954_v46 = vadd.f32 %v3847_v43, %v3319_v41  ;;  %v5951_v62 = vadd.f32 %v5950_v50, %v7172_v10  ;;  %v5093_v10 = vld [vmem:[%s7386_s13 + $0x18] sm:$0xff] }
0x123b   : > { %v4303_v5 = vadd.f32 1.0, %v6117_v36  ;;  %v3842_v44 = vpop.permute.xlu1 %3841 }
0x123c   : > { %6126 = vrcp.f32 %v4304_v3  ;;  %v5957_v48 = vadd.f32 %v3842_v44, %v3314_v42  ;;  %v5948_v3 = vadd.f32 %v5947_v59, %v4361_v9 }
0x123d   : > { %v6119_v6 = vpop.eup %6118  ;;  %6128 = vrcp.f32 %v4303_v5  ;;  %v4371_v45 = vpop.permute.xlu0 %4370 }
0x123e   : > { %v6121_v30 = vpop.eup %6120  ;;  %6130 = vtanh.f32 %v4282_v1  ;;  %v4306_v7 = vadd.f32 1.0, %v6119_v6  ;;  %v5955_v13 = vadd.f32 %v5954_v46, %v4371_v45 }
0x123f   : > { %6132 = vtanh.f32 %v4281_v4  ;;  %v4305_v2 = vadd.f32 1.0, %v6121_v30  ;;  %v6123_v39 = vpop.eup %6122  ;;  %v4366_v47 = vpop.permute.xlu1 %4365  ;;  %v5952_v4 = vadd.f32 %v5951_v62, %v4356_v40 }
0x1240   : > { %6134 = vrcp.f32 %v4306_v7  ;;  %v6125_v21 = vpop.eup %6124  ;;  %v5958_v52 = vadd.f32 %v5957_v48, %v4366_v47 }
0x1241   : > { %6136 = vrcp.f32 %v4305_v2 }
0x1246   : > { %v6127_v12 = vpop.eup %6126 }
0x1247   : > { %v6129_v15 = vpop.eup %6128  ;;  %v4316_v16 = vmul.f32 %v6127_v12, %v6123_v39 }
0x1248   : > { %v6131_v17 = vpop.eup %6130  ;;  %v4315_v19 = vmul.f32 %v6129_v15, %v6125_v21  ;;  %v2585_v21 = vmul.f32 %v7175_v11, %v6824_v63 }
0x1249   : > { %v6133_v20 = vpop.eup %6132 }
0x124a   : > { %v6135_v22 = vpop.eup %6134  ;;  %v5914_v23 = vpack.c.bf16 %v4316_v16, %v4315_v19  ;;  %v2586_v12 = vrot.slane %v2585_v21, 4  ;;  %v4520_v16 = vpop.permute.xlu1 %4519 }
0x124b   : > { %v6137_v24 = vpop.eup %6136  ;;  %v4318_v25 = vmul.f32 %v6135_v22, %v6131_v17 }
0x124c   : > { %5915 = vmatprep.subr.bf16.mxu0 %v5914_v23  ;;  %5930 = vmatprep.subr.bf16.mxu1 %v5914_v23  ;;  %v4317_v26 = vmul.f32 %v6137_v24, %v6133_v20  ;;  %v2587_v15 = vadd.f32 %v2586_v12, %v2585_v21 }
0x124d   : > { %5917 = vmatpush3.bf16.msra.mxu0 %v5914_v23  ;;  %5932 = vmatpush3.bf16.msra.mxu1 %v5914_v23 }
0x124e   : > { %v5918_v27 = vpack.c.bf16 %v4318_v25, %v4317_v26  ;;  %v2588_v22 = vrot.slane %v2587_v15, 2 }
0x1250   : > { %5919 = vmatprep.subr.bf16.mxu0 %v5918_v27  ;;  %5931 = vmatprep.subr.bf16.mxu1 %v5918_v27  ;;  %v2589_v26 = vadd.f32 %v2588_v22, %v2587_v15 }
0x1251   : > { %5921 = vmatpush3.bf16.msra.mxu0 %v5918_v27  ;;  %5933 = vmatpush3.bf16.msra.mxu1 %v5918_v27  ;;  %v2772_v27 = vpop.permute.xlu0 %2771 }
0x1254   : > { %5700 = vmatmul.mubr.msk.f32.vlgmr.msra.gmra.mrb[42].mxu0 %vm1295_vm2, %v5069_v29  ;;  %5709 = vmatmul.mubr.msk.f32.vlgmr.msra.gmra.mrb[34].mxu1 %vm1295_vm2, %v5075_v31 }
0x1255   : > { %5702 = vmatprep.mubr.msk.f32.mxu0 %vm1295_vm2, %v5070_v32  ;;  %v2775_v32 = vadd.f32 %v6848_v51, %v2772_v27  ;;  %v4515_v35 = vpop.permute.xlu0 %4514 }
0x1258   : > { %5703 = vmatmul.mubr.msk.f32.gmra.mrb[44].mxu0 %vm1295_vm2, %v5071_v60  ;;  %v2590_v60 = vrot.slane %v2589_v26, 1 }
0x1259   : > { %5705 = vmatprep.mubr.msk.f32.mxu0 %vm1295_vm2, %v5072_v33 }
0x125a   : > { %v2591_v38 = vadd.f32 %v2590_v60, %v2589_v26 }
0x125c   : > { %5706 = vmatmul.mubr.msk.f32.gmra.mrb[46].mxu0 %vm1295_vm2, %v5073_v34  ;;  %v2777_v34 = vmul.f32 %v7175_v11, %v2775_v32 }
0x125d   : > { %5719 = vmatprep.mubr.msk.f32.mxu0 %vm1295_vm2, %v5092_v14 }
0x1327   : > { %v5710_v53 = vpop.f32.mrb[34].mxu1  ;;  %v5701_v54 = vpop.f32.mrb[42].mxu0 }
0x1328   : > { %v5956_v18 = vadd.f32 %v5955_v13, %v5710_v53  ;;  %v4489_v55 = vpop.f32.mrb[35].mxu1  ;;  %v4463_v56 = vpop.f32.mrb[43].mxu0 }
0x1329   : > { %v5959_v58 = vadd.f32 %v5958_v52, %v4489_v55 }
0x132a   : > { %v4505_v61 = vmul.f32 %v7175_v11, %v5956_v18 }
0x132b   : > { %v4504_v28 = vmul.f32 %v7175_v11, %v5959_v58  ;;  %v5704_v36 = vpop.f32.mrb[44].mxu0 }
0x132c   : > { %v4471_v37 = vpop.f32.mrb[45].mxu0 }
0x132d   : > { %v5926_v1 = vpack.c.bf16 %v4505_v61, %v4504_v28 }
0x132f   : > { %v5707_v5 = vpop.f32.mrb[46].mxu0 }
0x1330   : > { %v5949_v6 = vadd.f32 %v5948_v3, %v5707_v5  ;;  %v4479_v30 = vpop.f32.mrb[47].mxu0 }
0x1331   : > { %v5953_v7 = vadd.f32 %v5952_v4, %v4479_v30 }
0x1332   : > { %v4503_v2 = vmul.f32 %v7175_v11, %v5949_v6 }
0x1333   : > { %v4502_v39 = vmul.f32 %v7175_v11, %v5953_v7 }
0x1335   : > { %v5922_v57 = vpack.c.bf16 %v4503_v2, %v4502_v39 }
0x1337   : > { %5923 = vmatprep.subr.bf16.mxu0 %v5922_v57 }
0x1338   : > { %5925 = vmatpush3.bf16.msra.mxu0 %v5922_v57 }
0x1339   : > { %5927 = vmatprep.subr.bf16.mxu0 %v5926_v1 }
0x133c   : > { %5929 = vmatpush3.bf16.msra.mxu0 %v5926_v1 }
0x133f   : > { %5720 = vmatmul.mubr.msk.f32.vlgmr.msra.gmra.mrb[48].mxu0 %vm1295_vm2, %v5093_v10 }
0x1412   : > { %v5721_v17 = vpop.f32.mrb[48].mxu0 }
0x1413   : > { %v4600_v19 = vadd.f32 %v5721_v17, %v4520_v16  ;;  %v4594_v20 = vpop.f32.mrb[49].mxu0 }
0x1414   : > { %v4595_v8 = vadd.f32 %v4594_v20, %v4515_v35 }
0x1415   : > { %v4603_v23 = vmul.f32 1.442695, %v4600_v19  ;;  %v4608_v24 = vmul.f32 %v7175_v11, %v4600_v19 }
0x1417   : > { %6138 = vpow2.f32 %v4603_v23  ;;  %v4609_v25 = vrot.slane %v4608_v24, 4 }
0x1419   : > { %v4610_v29 = vadd.f32 %v4609_v25, %v4608_v24 }
0x141b   : > { %v4611_v31 = vrot.slane %v4610_v29, 2 }
0x141d   : > { %v4612_v63 = vadd.f32 %v4611_v31, %v4610_v29 }
0x141f   : > { %v4613_v33 = vrot.slane %v4612_v63, 1 }
0x1421   : > { %v6139_v14 = vpop.eup %6138  ;;  %v4614_v0 = vadd.f32 %v4613_v33, %v4612_v63 }
0x1422   : > { %v4605_v9 = vmul.f32 %v6139_v14, %v2777_v34 }
0x1423   : > { %v4615_v40 = vadd.f32 %v4614_v0, %v2591_v38 }
0x1424   : > { %v4606_v41 = vadd.f32 %v4605_v9, %v4595_v8 }
0x1425   : > { %4618 = vadd.xlane.f32.xlu1 %v4615_v40 }
0x1426   : > { %v4607_v42 = vmul.f32 %v7175_v11, %v4606_v41 }
0x1428   : > { %4617 = vst [vmem:[%s6855_s30 + $0x8] sm:$0xff] %v4607_v42 }
0x14b2   : > { %v4619_v51 = vpop.xlane.xlu1 %4618 }
0x14b3   : > { %4621 = vst.msk [vmem:[%s564_s20] sm:$0x1] %vm4620_vm3, %v4619_v51 }
0x14b4 PF: > { %s27_s21 = sadd.s32 1, %s6148_s21  }
0x14b5   : > { %p24_p4 = scmp.ge.s32.totalorder %s27_s21, 4  }
0x14b7   :  { %26 = sbr.rel (!%p24_p4) target bundleno = 4 (0x4), region = 161 }

</bundles_post_ra>
